<compile_context>
chip_gen: v6e
topology: v6e:2x2x1
jax: 0.10.0
libtpu: 0.0.40
codegen_flags: <defaults>
</compile_context>

<pallas_src>
import functools

import jax
import jax.numpy as jnp
from jax.experimental import pallas as pl
from jax.experimental.pallas import tpu as pltpu


_LN_EPS = 1e-5
_VMEM_LIMIT_BYTES = 16 * 1024 * 1024  # well under v7x's 64 MiB physical VMEM


# ---------------------------------------------------------------------------
# In-kernel building blocks (traced inline into the fused stack kernels).
# ---------------------------------------------------------------------------
def _linear(x, w_ref, b_ref):
    """y = x @ W + b; W block is (1, in, out) bf16, b block is (1, 1, out)."""
    return (
        jnp.dot(x.astype(jnp.bfloat16), w_ref[0],
                preferred_element_type=jnp.float32)
        + b_ref[0]
    )


def _layer_norm(y, gamma, beta, eps=_LN_EPS):
    mu = jnp.mean(y, axis=-1, keepdims=True)
    var = jnp.mean(jnp.square(y - mu), axis=-1, keepdims=True)
    return (y - mu) * jax.lax.rsqrt(var + eps) * gamma + beta


def _attention_heads(q, k, v, wp_v, *, batch, num_heads):
    """Multi-head attention with the head merge fused into the out-projection.

    q: (B*Nq, C) f32 (already scaled by d**-0.5 via the Q weights),
    k, v: (B*Nk, C) f32, wp_v: (C, C) bf16 value.
    Returns (B*Nq, C) f32 = concat_h(softmax(q_h k_h^T) v_h) @ Wp.
    """
    rq, c = q.shape
    rk = k.shape[0]
    nq = rq // batch
    nk = rk // batch
    d = c // num_heads

    # Leading-dim split only (last two dims stay tile-aligned); cast once.
    q3 = q.reshape(batch, nq, c).astype(jnp.bfloat16)
    k3 = k.reshape(batch, nk, c).astype(jnp.bfloat16)
    v3 = v.reshape(batch, nk, c).astype(jnp.bfloat16)

    acc = None
    for h in range(num_heads):
        sl = slice(h * d, (h + 1) * d)
        s = jnp.einsum("bnd,bmd->bnm", q3[:, :, sl], k3[:, :, sl],
                       preferred_element_type=jnp.float32)        # (B, Nq, Nk)
        s = s - jnp.max(s, axis=-1, keepdims=True)
        p = jnp.exp(s)
        p = p * pl.reciprocal(jnp.sum(p, axis=-1, keepdims=True), approx=True)
        o = jnp.einsum("bnm,bmd->bnd", p.astype(jnp.bfloat16), v3[:, :, sl],
                       preferred_element_type=jnp.float32)        # (B, Nq, d)
        # Fuse the head merge into a slice of Wp: lane-dense (Rq, C) result.
        contrib = jnp.dot(o.reshape(rq, d).astype(jnp.bfloat16), wp_v[sl, :],
                          preferred_element_type=jnp.float32)      # (Rq, C)
        acc = contrib if acc is None else acc + contrib
    return acc


def _mlp(y, w1, b1, w2, b2):
    h = jnp.maximum(_linear(y, w1, b1), 0.0)
    return _linear(h, w2, b2)


# ---------------------------------------------------------------------------
# Fused stack kernels (grid iterates over layers; weights stream per layer,
# the activation is carried across layers in a VMEM scratch).
# ---------------------------------------------------------------------------
def encoder_stack_kernel(x_ref, pe_ref,
                         wqk, bqk, wv, bv, wp, bp, g1, be1,
                         w1, b1, w2, b2, g2, be2,
                         o_ref, carry, *, num_heads):
    layer = pl.program_id(0)
    B, N, C = x_ref.shape
    R = B * N

    @pl.when(layer == 0)
    def _():
        carry[...] = x_ref[...].reshape(R, C)

    x = carry[...]                                   # (R, C) f32
    xq = x + pe_ref[...]                             # q/k input = x + pe

    qk = _linear(xq, wqk, bqk)                       # fused Q|K projection
    q, k = qk[:, :C], qk[:, C:]                      # free 128-lane slices
    v = _linear(x, wv, bv)
    a = _attention_heads(q, k, v, wp[0], batch=B, num_heads=num_heads) + bp[0]
    y = _layer_norm(x + a, g1[0], be1[0])

    m = _mlp(y, w1, b1, w2, b2)
    out = _layer_norm(y + m, g2[0], be2[0])

    carry[...] = out

    @pl.when(layer == pl.num_programs(0) - 1)
    def _():
        o_ref[...] = out.reshape(B, N, C).astype(o_ref.dtype)


def decoder_stack_kernel(x_ref, qe_ref, pe_ref, fg_ref, fb_ref,
                         twqk, tbqk, twv, tbv, twp, tbp, g1, be1,
                         xwq, xbq, xwk, xbk, xwv, xbv, xwp, xbp, g2, be2,
                         w1, b1, w2, b2, g3, be3,
                         o_ref, carry, *, num_heads):
    layer = pl.program_id(0)
    B, N, C = x_ref.shape
    Rq = qe_ref.shape[0]
    Nq = Rq // B

    @pl.when(layer == 0)
    def _():
        carry[...] = jnp.zeros_like(carry)           # t = zeros_like(query_embed)

    t = carry[...]                                   # (Rq, C) f32
    qe = qe_ref[...]
    x2 = x_ref[...].reshape(B * N, C)                # encoder memory (rows)
    xk_in = x2 + pe_ref[...]                         # k input of cross-attn

    # --- self-attention: q = k = t + qe, v = t ---
    tq = t + qe
    qk = _linear(tq, twqk, tbqk)
    q, k = qk[:, :C], qk[:, C:]
    v = _linear(t, twv, tbv)
    a1 = _attention_heads(q, k, v, twp[0], batch=B, num_heads=num_heads) + tbp[0]
    t = _layer_norm(t + a1, g1[0], be1[0])

    # --- cross-attention: q = t + qe, k = x + pe, v = x ---
    q = _linear(t + qe, xwq, xbq)
    k = _linear(xk_in, xwk, xbk)
    v = _linear(x2, xwv, xbv)
    a2 = _attention_heads(q, k, v, xwp[0], batch=B, num_heads=num_heads) + xbp[0]
    t = _layer_norm(t + a2, g2[0], be2[0])

    # --- MLP ---
    m = _mlp(t, w1, b1, w2, b2)
    t = _layer_norm(t + m, g3[0], be3[0])

    carry[...] = t
    # Fused Decoder.norm: this layer's intermediate output.
    o_ref[0] = _layer_norm(t, fg_ref[...], fb_ref[...]).reshape(
        B, Nq, C).astype(o_ref.dtype)


# ---------------------------------------------------------------------------
# pallas_call wrappers.
# ---------------------------------------------------------------------------
_ENC_KEYS = ("wqk", "bqk", "wv", "bv", "wp", "bp", "g1", "be1",
             "w1", "b1", "w2", "b2", "g2", "be2")
_DEC_KEYS = ("twqk", "tbqk", "twv", "tbv", "twp", "tbp", "g1", "be1",
             "xwq", "xbq", "xwk", "xbk", "xwv", "xbv", "xwp", "xbp",
             "g2", "be2",
             "w1", "b1", "w2", "b2", "g3", "be3")


def _stacked_weight_spec(arr):
    """Block = one layer's slab; index_map walks the leading layer axis."""
    ndim = arr.ndim
    block = (1,) + tuple(arr.shape[1:])

    def idx(l, _tail=(0,) * (ndim - 1)):
        return (l,) + _tail

    return pl.BlockSpec(block, idx)


def _const_spec(shape):
    zeros = (0,) * len(shape)
    return pl.BlockSpec(tuple(shape), lambda l, _z=zeros: _z)


def encoder_stack_pallas(x, pe_b, params, *, num_heads):
    B, N, C = x.shape
    L = params["wqk"].shape[0]
    weights = tuple(params[k] for k in _ENC_KEYS)
    in_specs = [_const_spec((B, N, C)), _const_spec(pe_b.shape)]
    in_specs += [_stacked_weight_spec(w) for w in weights]
    return pl.pallas_call(
        functools.partial(encoder_stack_kernel, num_heads=num_heads),
        out_shape=jax.ShapeDtypeStruct((B, N, C), jnp.float32),
        grid=(L,),
        in_specs=in_specs,
        out_specs=pl.BlockSpec((B, N, C), lambda l: (0, 0, 0)),
        scratch_shapes=[pltpu.VMEM((B * N, C), jnp.float32)],
        compiler_params=pltpu.CompilerParams(
            dimension_semantics=("arbitrary",),
            vmem_limit_bytes=_VMEM_LIMIT_BYTES),
    )(x, pe_b, *weights)


def decoder_stack_pallas(x, qe_b, pe_b, fg, fb, params, *, num_heads,
                         num_queries):
    B, N, C = x.shape
    L = params["twqk"].shape[0]
    Nq = num_queries
    weights = tuple(params[k] for k in _DEC_KEYS)
    in_specs = [_const_spec((B, N, C)), _const_spec(qe_b.shape),
                _const_spec(pe_b.shape), _const_spec(fg.shape),
                _const_spec(fb.shape)]
    in_specs += [_stacked_weight_spec(w) for w in weights]
    return pl.pallas_call(
        functools.partial(decoder_stack_kernel, num_heads=num_heads),
        out_shape=jax.ShapeDtypeStruct((L, B, Nq, C), jnp.float32),
        grid=(L,),
        in_specs=in_specs,
        out_specs=pl.BlockSpec((1, B, Nq, C), lambda l: (l, 0, 0, 0)),
        scratch_shapes=[pltpu.VMEM((B * Nq, C), jnp.float32)],
        compiler_params=pltpu.CompilerParams(
            dimension_semantics=("arbitrary",),
            vmem_limit_bytes=_VMEM_LIMIT_BYTES),
    )(x, qe_b, pe_b, fg, fb, *weights)


# ---------------------------------------------------------------------------
# Parameter init (deterministic, layer-stacked), positional encoding, forward.
# ---------------------------------------------------------------------------
def _rand(key, shape, scale=0.02):
    return jax.random.normal(key, shape, jnp.float32) * scale


def init_encoder_params(key, num_layers, d_model, d_ff, num_heads):
    L, C, F = num_layers, d_model, d_ff
    qscale = (C // num_heads) ** (-0.5)        # softmax scale folded into Q
    ks = jax.random.split(key, 12)
    wq = _rand(ks[0], (L, C, C)) * qscale
    bq = _rand(ks[1], (L, 1, C)) * qscale
    wk = _rand(ks[2], (L, C, C))
    bk = _rand(ks[3], (L, 1, C))
    ones = jnp.ones((L, 1, C), jnp.float32)
    zeros = jnp.zeros((L, 1, C), jnp.float32)
    return {
        "wqk": jnp.concatenate([wq, wk], axis=-1).astype(jnp.bfloat16),
        "bqk": jnp.concatenate([bq, bk], axis=-1),
        "wv": _rand(ks[4], (L, C, C)).astype(jnp.bfloat16),
        "bv": _rand(ks[5], (L, 1, C)),
        "wp": _rand(ks[6], (L, C, C)).astype(jnp.bfloat16),
        "bp": _rand(ks[7], (L, 1, C)),
        "w1": _rand(ks[8], (L, C, F)).astype(jnp.bfloat16),
        "b1": _rand(ks[9], (L, 1, F)),
        "w2": _rand(ks[10], (L, F, C)).astype(jnp.bfloat16),
        "b2": _rand(ks[11], (L, 1, C)),
        "g1": ones, "be1": zeros, "g2": ones, "be2": zeros,
    }


def init_decoder_params(key, num_layers, d_model, d_ff, num_heads):
    L, C, F = num_layers, d_model, d_ff
    qscale = (C // num_heads) ** (-0.5)
    ks = jax.random.split(key, 20)
    twq = _rand(ks[0], (L, C, C)) * qscale
    tbq = _rand(ks[1], (L, 1, C)) * qscale
    twk = _rand(ks[2], (L, C, C))
    tbk = _rand(ks[3], (L, 1, C))
    ones = jnp.ones((L, 1, C), jnp.float32)
    zeros = jnp.zeros((L, 1, C), jnp.float32)
    return {
        "twqk": jnp.concatenate([twq, twk], axis=-1).astype(jnp.bfloat16),
        "tbqk": jnp.concatenate([tbq, tbk], axis=-1),
        "twv": _rand(ks[4], (L, C, C)).astype(jnp.bfloat16),
        "tbv": _rand(ks[5], (L, 1, C)),
        "twp": _rand(ks[6], (L, C, C)).astype(jnp.bfloat16),
        "tbp": _rand(ks[7], (L, 1, C)),
        "xwq": (_rand(ks[8], (L, C, C)) * qscale).astype(jnp.bfloat16),
        "xbq": _rand(ks[9], (L, 1, C)) * qscale,
        "xwk": _rand(ks[10], (L, C, C)).astype(jnp.bfloat16),
        "xbk": _rand(ks[11], (L, 1, C)),
        "xwv": _rand(ks[12], (L, C, C)).astype(jnp.bfloat16),
        "xbv": _rand(ks[13], (L, 1, C)),
        "xwp": _rand(ks[14], (L, C, C)).astype(jnp.bfloat16),
        "xbp": _rand(ks[15], (L, 1, C)),
        "w1": _rand(ks[16], (L, C, F)).astype(jnp.bfloat16),
        "b1": _rand(ks[17], (L, 1, F)),
        "w2": _rand(ks[18], (L, F, C)).astype(jnp.bfloat16),
        "b2": _rand(ks[19], (L, 1, C)),
        "g1": ones, "be1": zeros, "g2": ones, "be2": zeros,
        "g3": ones, "be3": zeros,
    }


def init_transformer_params(key, d_model, d_ff, num_layers, num_heads):
    k_enc, k_dec = jax.random.split(key)
    return {
        "encoder": init_encoder_params(k_enc, num_layers, d_model, d_ff, num_heads),
        "decoder": init_decoder_params(k_dec, num_layers, d_model, d_ff, num_heads),
        "final_g": jnp.ones((1, d_model), jnp.float32),
        "final_b": jnp.zeros((1, d_model), jnp.float32),
    }


def sinusoidal_pe(n, d):
    # TODO(synk): get_positional_encoding is undefined in the source; standard
    # sinusoidal positional encoding is substituted.
    pos = jnp.arange(n, dtype=jnp.float32)[:, None]
    i = jnp.arange(d, dtype=jnp.float32)[None, :]
    angle = pos / jnp.power(10000.0, 2.0 * jnp.floor(i / 2.0) / d)
    return jnp.where((jnp.arange(d) % 2) == 0,
                     jnp.sin(angle), jnp.cos(angle)).astype(jnp.float32)


def transformer_forward(x_img, query_embed, params, *, num_heads=8):
    """Mirrors Transformer.forward: returns (decoder intermediates, encoder out)."""
    B, c, fh, fw = x_img.shape
    N = fh * fw
    x = jnp.transpose(x_img.reshape(B, c, N), (0, 2, 1)).astype(jnp.float32)
    pe = sinusoidal_pe(N, c)
    pe_b = jnp.broadcast_to(pe[None], (B, N, c)).reshape(B * N, c)

    x_enc = encoder_stack_pallas(x, pe_b, params["encoder"],
                                 num_heads=num_heads)

    nq = query_embed.shape[0]
    qe_b = jnp.broadcast_to(query_embed[None].astype(jnp.float32),
                            (B, nq, c)).reshape(B * nq, c)
    t_stack = decoder_stack_pallas(x_enc, qe_b, pe_b,
                                   params["final_g"], params["final_b"],
                                   params["decoder"],
                                   num_heads=num_heads, num_queries=nq)
    return t_stack, x_enc


# ---------------------------------------------------------------------------
# Pure-JAX reference (same bf16 matmul operands) for a silent sanity check.
# ---------------------------------------------------------------------------
def _ref_linear(x, w, b):
    return jnp.dot(x.astype(jnp.bfloat16), w,
                   preferred_element_type=jnp.float32) + b


def _ref_ln(y, g, b, eps=_LN_EPS):
    mu = jnp.mean(y, axis=-1, keepdims=True)
    var = jnp.mean(jnp.square(y - mu), axis=-1, keepdims=True)
    return (y - mu) * jax.lax.rsqrt(var + eps) * g + b


def _ref_mha(q_in, k_in, v_in, wq, bq, wk, bk, wv, bv, wp, bp, num_heads):
    # Q weights are pre-scaled by head_dim**-0.5, so no extra score scale.
    q = _ref_linear(q_in, wq, bq)
    k = _ref_linear(k_in, wk, bk)
    v = _ref_linear(v_in, wv, bv)
    B, nq, C = q.shape
    nk = k.shape[1]
    d = C // num_heads
    qh = q.reshape(B, nq, num_heads, d).astype(jnp.bfloat16)
    kh = k.reshape(B, nk, num_heads, d).astype(jnp.bfloat16)
    vh = v.reshape(B, nk, num_heads, d).astype(jnp.bfloat16)
    s = jnp.einsum("bnhd,bmhd->bhnm", qh, kh,
                   preferred_element_type=jnp.float32)
    att = jax.nn.softmax(s, axis=-1)
    out = jnp.einsum("bhnm,bmhd->bnhd", att.astype(jnp.bfloat16), vh,
                     preferred_element_type=jnp.float32).reshape(B, nq, C)
    return _ref_linear(out, wp, bp)


def _ref_encoder(x, pe, p, num_heads):
    L = p["wqk"].shape[0]
    C = x.shape[-1]
    for l in range(L):
        wqk, bqk = p["wqk"][l], p["bqk"][l]
        xq = x + pe[None]
        a = _ref_mha(xq, xq, x, wqk[:, :C], bqk[:, :C], wqk[:, C:], bqk[:, C:],
                     p["wv"][l], p["bv"][l], p["wp"][l], p["bp"][l], num_heads)
        y = _ref_ln(x + a, p["g1"][l], p["be1"][l])
        h = jnp.maximum(_ref_linear(y, p["w1"][l], p["b1"][l]), 0.0)
        m = _ref_linear(h, p["w2"][l], p["b2"][l])
        x = _ref_ln(y + m, p["g2"][l], p["be2"][l])
    return x


def _ref_decoder(x, query_embed, pe, p, fg, fb, num_heads):
    L = p["twqk"].shape[0]
    B, _, C = x.shape
    nq = query_embed.shape[0]
    qe = query_embed[None].astype(jnp.float32)
    t = jnp.zeros((B, nq, C), jnp.float32)
    inter = []
    for l in range(L):
        twqk, tbqk = p["twqk"][l], p["tbqk"][l]
        tq = t + qe
        a1 = _ref_mha(tq, tq, t,
                      twqk[:, :C], tbqk[:, :C], twqk[:, C:], tbqk[:, C:],
                      p["twv"][l], p["tbv"][l], p["twp"][l], p["tbp"][l],
                      num_heads)
        t = _ref_ln(t + a1, p["g1"][l], p["be1"][l])
        a2 = _ref_mha(t + qe, x + pe[None], x,
                      p["xwq"][l], p["xbq"][l], p["xwk"][l], p["xbk"][l],
                      p["xwv"][l], p["xbv"][l], p["xwp"][l], p["xbp"][l],
                      num_heads)
        t = _ref_ln(t + a2, p["g2"][l], p["be2"][l])
        h = jnp.maximum(_ref_linear(t, p["w1"][l], p["b1"][l]), 0.0)
        m = _ref_linear(h, p["w2"][l], p["b2"][l])
        t = _ref_ln(t + m, p["g3"][l], p["be3"][l])
        inter.append(_ref_ln(t, fg, fb))
    return jnp.stack(inter)


def _ref_transformer(x_img, query_embed, params, num_heads=8):
    B, c, fh, fw = x_img.shape
    N = fh * fw
    x = jnp.transpose(x_img.reshape(B, c, N), (0, 2, 1)).astype(jnp.float32)
    pe = sinusoidal_pe(N, c)
    x = _ref_encoder(x, pe, params["encoder"], num_heads)
    t = _ref_decoder(x, query_embed, pe, params["decoder"],
                     params["final_g"], params["final_b"], num_heads)
    return t, x


if __name__ == "__main__":
    # Small but lane-aligned shapes: d_model = 128 (one full lane width),
    # 4x4 feature map -> 16 memory tokens, 8 object queries, 8 heads.
    B, d_model, fh, fw = 2, 128, 4, 4
    num_queries, num_heads = 8, 8
    d_ff = 2048              # module's d_feedforward default
    num_layers = 6           # module's Encoder / Decoder default

    key = jax.random.PRNGKey(0)
    kx, kq, kp = jax.random.split(key, 3)
    x_img = jax.random.normal(kx, (B, d_model, fh, fw), jnp.float32)
    query_embed = jax.random.normal(kq, (num_queries, d_model), jnp.float32)
    params = init_transformer_params(kp, d_model, d_ff, num_layers, num_heads)

    t_out, x_out = transformer_forward(x_img, query_embed, params,
                                       num_heads=num_heads)
    t_out = jax.block_until_ready(t_out)
    x_out = jax.block_until_ready(x_out)

    t_ref, x_ref = _ref_transformer(x_img, query_embed, params, num_heads)
    assert t_out.shape == (num_layers, B, num_queries, d_model)
    assert x_out.shape == (B, fh * fw, d_model)
    # bf16 MXU operands + EUP approx reciprocal in the kernel softmax -> loose tol.
    assert jnp.allclose(x_out, x_ref, atol=3e-2, rtol=3e-2), "encoder mismatch"
    assert jnp.allclose(t_out, t_ref, atol=3e-2, rtol=3e-2), "decoder mismatch"

    print("KERNEL_OK")
</pallas_src>

<mosaic_0001>
module attributes {stable_mosaic.version = 11 : i64} {
  func.func @encoder_stack_kernel(%arg0: i32, %arg1: memref<2x16x128xf32, #tpu.memory_space<vmem>>, %arg2: memref<32x128xf32, #tpu.memory_space<vmem>>, %arg3: memref<1x128x256xbf16, #tpu.memory_space<vmem>>, %arg4: memref<1x1x256xf32, #tpu.memory_space<vmem>>, %arg5: memref<1x128x128xbf16, #tpu.memory_space<vmem>>, %arg6: memref<1x1x128xf32, #tpu.memory_space<vmem>>, %arg7: memref<1x128x128xbf16, #tpu.memory_space<vmem>>, %arg8: memref<1x1x128xf32, #tpu.memory_space<vmem>>, %arg9: memref<1x1x128xf32, #tpu.memory_space<vmem>>, %arg10: memref<1x1x128xf32, #tpu.memory_space<vmem>>, %arg11: memref<1x128x2048xbf16, #tpu.memory_space<vmem>>, %arg12: memref<1x1x2048xf32, #tpu.memory_space<vmem>>, %arg13: memref<1x2048x128xbf16, #tpu.memory_space<vmem>>, %arg14: memref<1x1x128xf32, #tpu.memory_space<vmem>>, %arg15: memref<1x1x128xf32, #tpu.memory_space<vmem>>, %arg16: memref<1x1x128xf32, #tpu.memory_space<vmem>>, %arg17: memref<2x16x128xf32, #tpu.memory_space<vmem>>, %arg18: memref<32x128xf32, #tpu.memory_space<vmem>>) attributes {dimension_semantics = [#tpu.dimension_semantics<arbitrary>], iteration_bounds = array<i64: 6>, scalar_prefetch = 0 : i64, scratch_operands = 1 : i64, tpu.core_type = #tpu.core_type<tc>, window_params = [{pipeline_mode = #tpu.pipeline_mode<synchronous>, transform_indices = @transform_0, window_bounds = array<i64: 2, 16, 128>}, {pipeline_mode = #tpu.pipeline_mode<synchronous>, transform_indices = @transform_1, window_bounds = array<i64: 32, 128>}, {transform_indices = @transform_2, window_bounds = array<i64: 1, 128, 256>}, {transform_indices = @transform_3, window_bounds = array<i64: 1, 1, 256>}, {transform_indices = @transform_4, window_bounds = array<i64: 1, 128, 128>}, {transform_indices = @transform_5, window_bounds = array<i64: 1, 1, 128>}, {transform_indices = @transform_6, window_bounds = array<i64: 1, 128, 128>}, {transform_indices = @transform_7, window_bounds = array<i64: 1, 1, 128>}, {transform_indices = @transform_8, window_bounds = array<i64: 1, 1, 128>}, {transform_indices = @transform_9, window_bounds = array<i64: 1, 1, 128>}, {transform_indices = @transform_10, window_bounds = array<i64: 1, 128, 2048>}, {transform_indices = @transform_11, window_bounds = array<i64: 1, 1, 2048>}, {transform_indices = @transform_12, window_bounds = array<i64: 1, 2048, 128>}, {transform_indices = @transform_13, window_bounds = array<i64: 1, 1, 128>}, {transform_indices = @transform_14, window_bounds = array<i64: 1, 1, 128>}, {transform_indices = @transform_15, window_bounds = array<i64: 1, 1, 128>}, {pipeline_mode = #tpu.pipeline_mode<synchronous>, transform_indices = @transform_16, window_bounds = array<i64: 2, 16, 128>}]} {
    %c0_i32 = arith.constant 0 : i32
    %0 = arith.cmpi eq, %arg0, %c0_i32 : i32
    %1 = arith.extui %0 : i1 to i32
    %c0_i32_0 = arith.constant 0 : i32
    %2 = arith.cmpi ne, %1, %c0_i32_0 : i32
    scf.if %2 {
      %c0_103 = arith.constant 0 : index
      %c0_104 = arith.constant 0 : index
      %c0_105 = arith.constant 0 : index
      %279 = vector.load %arg1[%c0_103, %c0_104, %c0_105] : memref<2x16x128xf32, #tpu.memory_space<vmem>>, vector<2x16x128xf32>
      %280 = vector.shape_cast %279 : vector<2x16x128xf32> to vector<32x128xf32>
      %c0_106 = arith.constant 0 : index
      %c0_107 = arith.constant 0 : index
      %281 = vector.load %arg18[%c0_106, %c0_107] : memref<32x128xf32, #tpu.memory_space<vmem>>, vector<32x128xf32>
      tpu.vector_store %arg18[%c0_106, %c0_107], %280 {strides = array<i32>} : memref<32x128xf32, #tpu.memory_space<vmem>>, vector<32x128xf32>,
    } else {
    }
    %c0 = arith.constant 0 : index
    %c0_1 = arith.constant 0 : index
    %3 = vector.load %arg18[%c0, %c0_1] : memref<32x128xf32, #tpu.memory_space<vmem>>, vector<32x128xf32>
    %c0_2 = arith.constant 0 : index
    %c0_3 = arith.constant 0 : index
    %4 = vector.load %arg2[%c0_2, %c0_3] : memref<32x128xf32, #tpu.memory_space<vmem>>, vector<32x128xf32>
    %5 = arith.addf %3, %4 : vector<32x128xf32>
    %6 = arith.truncf %5 : vector<32x128xf32> to vector<32x128xbf16>
    %c0_4 = arith.constant 0 : index
    %c0_5 = arith.constant 0 : index
    %c0_6 = arith.constant 0 : index
    %7 = vector.load %arg3[%c0_4, %c0_5, %c0_6] : memref<1x128x256xbf16, #tpu.memory_space<vmem>>, vector<1x128x256xbf16>
    %8 = vector.shape_cast %7 : vector<1x128x256xbf16> to vector<128x256xbf16>
    %cst = arith.constant dense<0.000000e+00> : vector<32x256xf32>
    %9 = tpu.matmul %6, %8, %cst {dimension_numbers = #tpu.dot_dimension_numbers<[1], [0], [0], [1], [0, 0, 1, 1], [], []>} : vector<32x128xbf16>, vector<128x256xbf16>, vector<32x256xf32> -> vector<32x256xf32>
    %c0_7 = arith.constant 0 : index
    %c0_8 = arith.constant 0 : index
    %c0_9 = arith.constant 0 : index
    %10 = vector.load %arg4[%c0_7, %c0_8, %c0_9] : memref<1x1x256xf32, #tpu.memory_space<vmem>>, vector<1x1x256xf32>
    %11 = vector.shape_cast %10 : vector<1x1x256xf32> to vector<1x256xf32>
    %12 = vector.broadcast %11 : vector<1x256xf32> to vector<32x256xf32>
    %13 = arith.addf %9, %12 : vector<32x256xf32>
    %14 = vector.extract_strided_slice %13 {offsets = [0, 0], sizes = [32, 128], strides = [1, 1]} : vector<32x256xf32> to vector<32x128xf32>
    %15 = vector.extract_strided_slice %13 {offsets = [0, 128], sizes = [32, 128], strides = [1, 1]} : vector<32x256xf32> to vector<32x128xf32>
    %16 = arith.truncf %3 : vector<32x128xf32> to vector<32x128xbf16>
    %c0_10 = arith.constant 0 : index
    %c0_11 = arith.constant 0 : index
    %c0_12 = arith.constant 0 : index
    %17 = vector.load %arg5[%c0_10, %c0_11, %c0_12] : memref<1x128x128xbf16, #tpu.memory_space<vmem>>, vector<1x128x128xbf16>
    %18 = vector.shape_cast %17 : vector<1x128x128xbf16> to vector<128x128xbf16>
    %cst_13 = arith.constant dense<0.000000e+00> : vector<32x128xf32>
    %19 = tpu.matmul %16, %18, %cst_13 {dimension_numbers = #tpu.dot_dimension_numbers<[1], [0], [0], [1], [0, 0, 1, 1], [], []>} : vector<32x128xbf16>, vector<128x128xbf16>, vector<32x128xf32> -> vector<32x128xf32>
    %c0_14 = arith.constant 0 : index
    %c0_15 = arith.constant 0 : index
    %c0_16 = arith.constant 0 : index
    %20 = vector.load %arg6[%c0_14, %c0_15, %c0_16] : memref<1x1x128xf32, #tpu.memory_space<vmem>>, vector<1x1x128xf32>
    %21 = vector.shape_cast %20 : vector<1x1x128xf32> to vector<1x128xf32>
    %22 = vector.broadcast %21 : vector<1x128xf32> to vector<32x128xf32>
    %23 = arith.addf %19, %22 : vector<32x128xf32>
    %c0_17 = arith.constant 0 : index
    %c0_18 = arith.constant 0 : index
    %c0_19 = arith.constant 0 : index
    %24 = vector.load %arg7[%c0_17, %c0_18, %c0_19] : memref<1x128x128xbf16, #tpu.memory_space<vmem>>, vector<1x128x128xbf16>
    %25 = vector.shape_cast %24 : vector<1x128x128xbf16> to vector<128x128xbf16>
    %26 = vector.shape_cast %14 : vector<32x128xf32> to vector<2x16x128xf32>
    %27 = arith.truncf %26 : vector<2x16x128xf32> to vector<2x16x128xbf16>
    %28 = vector.shape_cast %15 : vector<32x128xf32> to vector<2x16x128xf32>
    %29 = arith.truncf %28 : vector<2x16x128xf32> to vector<2x16x128xbf16>
    %30 = vector.shape_cast %23 : vector<32x128xf32> to vector<2x16x128xf32>
    %31 = arith.truncf %30 : vector<2x16x128xf32> to vector<2x16x128xbf16>
    %32 = vector.extract_strided_slice %27 {offsets = [0, 0, 0], sizes = [2, 16, 16], strides = [1, 1, 1]} : vector<2x16x128xbf16> to vector<2x16x16xbf16>
    %33 = vector.extract_strided_slice %29 {offsets = [0, 0, 0], sizes = [2, 16, 16], strides = [1, 1, 1]} : vector<2x16x128xbf16> to vector<2x16x16xbf16>
    "tpu.trace_start"() <{level = 10 : i32, message = "bnd,bmd->bnm"}> : () -> ()
    %cst_20 = arith.constant dense<0.000000e+00> : vector<2x16x16xf32>
    %34 = tpu.matmul %32, %33, %cst_20 {dimension_numbers = #tpu.dot_dimension_numbers<[2], [2], [1], [1], [0, 0, 0, 1, 1, 1], [0], [0]>} : vector<2x16x16xbf16>, vector<2x16x16xbf16>, vector<2x16x16xf32> -> vector<2x16x16xf32>
    "tpu.trace_stop"() : () -> ()
    %cst_21 = arith.constant dense<0xFF800000> : vector<2x16xf32>
    %35 = vector.multi_reduction <maximumf>, %34, %cst_21 [2] : vector<2x16x16xf32> to vector<2x16xf32>
    %36 = vector.shape_cast %35 : vector<2x16xf32> to vector<2x16x1xf32>
    %37 = vector.broadcast %36 : vector<2x16x1xf32> to vector<2x16x16xf32>
    %38 = arith.subf %34, %37 : vector<2x16x16xf32>
    %39 = math.exp %38 : vector<2x16x16xf32>
    %cst_22 = arith.constant dense<0.000000e+00> : vector<2x16xf32>
    %40 = vector.multi_reduction <add>, %39, %cst_22 [2] : vector<2x16x16xf32> to vector<2x16xf32>
    %41 = vector.shape_cast %40 : vector<2x16xf32> to vector<2x16x1xf32>
    %42 = tpu.reciprocal %41 {approx = true} : vector<2x16x1xf32> -> vector<2x16x1xf32>
    %43 = vector.broadcast %42 : vector<2x16x1xf32> to vector<2x16x16xf32>
    %44 = arith.mulf %39, %43 : vector<2x16x16xf32>
    %45 = arith.truncf %44 : vector<2x16x16xf32> to vector<2x16x16xbf16>
    %46 = vector.extract_strided_slice %31 {offsets = [0, 0, 0], sizes = [2, 16, 16], strides = [1, 1, 1]} : vector<2x16x128xbf16> to vector<2x16x16xbf16>
    "tpu.trace_start"() <{level = 10 : i32, message = "bnm,bmd->bnd"}> : () -> ()
    %cst_23 = arith.constant dense<0.000000e+00> : vector<2x16x16xf32>
    %47 = tpu.matmul %45, %46, %cst_23 {dimension_numbers = #tpu.dot_dimension_numbers<[2], [1], [1], [2], [0, 0, 0, 1, 1, 2], [0], [0]>} : vector<2x16x16xbf16>, vector<2x16x16xbf16>, vector<2x16x16xf32> -> vector<2x16x16xf32>
    "tpu.trace_stop"() : () -> ()
    %48 = vector.shape_cast %47 : vector<2x16x16xf32> to vector<32x16xf32>
    %49 = arith.truncf %48 : vector<32x16xf32> to vector<32x16xbf16>
    %50 = vector.extract_strided_slice %25 {offsets = [0, 0], sizes = [16, 128], strides = [1, 1]} : vector<128x128xbf16> to vector<16x128xbf16>
    %cst_24 = arith.constant dense<0.000000e+00> : vector<32x128xf32>
    %51 = tpu.matmul %49, %50, %cst_24 {dimension_numbers = #tpu.dot_dimension_numbers<[1], [0], [0], [1], [0, 0, 1, 1], [], []>} : vector<32x16xbf16>, vector<16x128xbf16>, vector<32x128xf32> -> vector<32x128xf32>
    %52 = vector.extract_strided_slice %27 {offsets = [0, 0, 16], sizes = [2, 16, 16], strides = [1, 1, 1]} : vector<2x16x128xbf16> to vector<2x16x16xbf16>
    %53 = vector.extract_strided_slice %29 {offsets = [0, 0, 16], sizes = [2, 16, 16], strides = [1, 1, 1]} : vector<2x16x128xbf16> to vector<2x16x16xbf16>
    "tpu.trace_start"() <{level = 10 : i32, message = "bnd,bmd->bnm"}> : () -> ()
    %cst_25 = arith.constant dense<0.000000e+00> : vector<2x16x16xf32>
    %54 = tpu.matmul %52, %53, %cst_25 {dimension_numbers = #tpu.dot_dimension_numbers<[2], [2], [1], [1], [0, 0, 0, 1, 1, 1], [0], [0]>} : vector<2x16x16xbf16>, vector<2x16x16xbf16>, vector<2x16x16xf32> -> vector<2x16x16xf32>
    "tpu.trace_stop"() : () -> ()
    %cst_26 = arith.constant dense<0xFF800000> : vector<2x16xf32>
    %55 = vector.multi_reduction <maximumf>, %54, %cst_26 [2] : vector<2x16x16xf32> to vector<2x16xf32>
    %56 = vector.shape_cast %55 : vector<2x16xf32> to vector<2x16x1xf32>
    %57 = vector.broadcast %56 : vector<2x16x1xf32> to vector<2x16x16xf32>
    %58 = arith.subf %54, %57 : vector<2x16x16xf32>
    %59 = math.exp %58 : vector<2x16x16xf32>
    %cst_27 = arith.constant dense<0.000000e+00> : vector<2x16xf32>
    %60 = vector.multi_reduction <add>, %59, %cst_27 [2] : vector<2x16x16xf32> to vector<2x16xf32>
    %61 = vector.shape_cast %60 : vector<2x16xf32> to vector<2x16x1xf32>
    %62 = tpu.reciprocal %61 {approx = true} : vector<2x16x1xf32> -> vector<2x16x1xf32>
    %63 = vector.broadcast %62 : vector<2x16x1xf32> to vector<2x16x16xf32>
    %64 = arith.mulf %59, %63 : vector<2x16x16xf32>
    %65 = arith.truncf %64 : vector<2x16x16xf32> to vector<2x16x16xbf16>
    %66 = vector.extract_strided_slice %31 {offsets = [0, 0, 16], sizes = [2, 16, 16], strides = [1, 1, 1]} : vector<2x16x128xbf16> to vector<2x16x16xbf16>
    "tpu.trace_start"() <{level = 10 : i32, message = "bnm,bmd->bnd"}> : () -> ()
    %cst_28 = arith.constant dense<0.000000e+00> : vector<2x16x16xf32>
    %67 = tpu.matmul %65, %66, %cst_28 {dimension_numbers = #tpu.dot_dimension_numbers<[2], [1], [1], [2], [0, 0, 0, 1, 1, 2], [0], [0]>} : vector<2x16x16xbf16>, vector<2x16x16xbf16>, vector<2x16x16xf32> -> vector<2x16x16xf32>
    "tpu.trace_stop"() : () -> ()
    %68 = vector.shape_cast %67 : vector<2x16x16xf32> to vector<32x16xf32>
    %69 = arith.truncf %68 : vector<32x16xf32> to vector<32x16xbf16>
    %70 = vector.extract_strided_slice %25 {offsets = [16, 0], sizes = [16, 128], strides = [1, 1]} : vector<128x128xbf16> to vector<16x128xbf16>
    %cst_29 = arith.constant dense<0.000000e+00> : vector<32x128xf32>
    %71 = tpu.matmul %69, %70, %cst_29 {dimension_numbers = #tpu.dot_dimension_numbers<[1], [0], [0], [1], [0, 0, 1, 1], [], []>} : vector<32x16xbf16>, vector<16x128xbf16>, vector<32x128xf32> -> vector<32x128xf32>
    %72 = arith.addf %51, %71 : vector<32x128xf32>
    %73 = vector.extract_strided_slice %27 {offsets = [0, 0, 32], sizes = [2, 16, 16], strides = [1, 1, 1]} : vector<2x16x128xbf16> to vector<2x16x16xbf16>
    %74 = vector.extract_strided_slice %29 {offsets = [0, 0, 32], sizes = [2, 16, 16], strides = [1, 1, 1]} : vector<2x16x128xbf16> to vector<2x16x16xbf16>
    "tpu.trace_start"() <{level = 10 : i32, message = "bnd,bmd->bnm"}> : () -> ()
    %cst_30 = arith.constant dense<0.000000e+00> : vector<2x16x16xf32>
    %75 = tpu.matmul %73, %74, %cst_30 {dimension_numbers = #tpu.dot_dimension_numbers<[2], [2], [1], [1], [0, 0, 0, 1, 1, 1], [0], [0]>} : vector<2x16x16xbf16>, vector<2x16x16xbf16>, vector<2x16x16xf32> -> vector<2x16x16xf32>
    "tpu.trace_stop"() : () -> ()
    %cst_31 = arith.constant dense<0xFF800000> : vector<2x16xf32>
    %76 = vector.multi_reduction <maximumf>, %75, %cst_31 [2] : vector<2x16x16xf32> to vector<2x16xf32>
    %77 = vector.shape_cast %76 : vector<2x16xf32> to vector<2x16x1xf32>
    %78 = vector.broadcast %77 : vector<2x16x1xf32> to vector<2x16x16xf32>
    %79 = arith.subf %75, %78 : vector<2x16x16xf32>
    %80 = math.exp %79 : vector<2x16x16xf32>
    %cst_32 = arith.constant dense<0.000000e+00> : vector<2x16xf32>
    %81 = vector.multi_reduction <add>, %80, %cst_32 [2] : vector<2x16x16xf32> to vector<2x16xf32>
    %82 = vector.shape_cast %81 : vector<2x16xf32> to vector<2x16x1xf32>
    %83 = tpu.reciprocal %82 {approx = true} : vector<2x16x1xf32> -> vector<2x16x1xf32>
    %84 = vector.broadcast %83 : vector<2x16x1xf32> to vector<2x16x16xf32>
    %85 = arith.mulf %80, %84 : vector<2x16x16xf32>
    %86 = arith.truncf %85 : vector<2x16x16xf32> to vector<2x16x16xbf16>
    %87 = vector.extract_strided_slice %31 {offsets = [0, 0, 32], sizes = [2, 16, 16], strides = [1, 1, 1]} : vector<2x16x128xbf16> to vector<2x16x16xbf16>
    "tpu.trace_start"() <{level = 10 : i32, message = "bnm,bmd->bnd"}> : () -> ()
    %cst_33 = arith.constant dense<0.000000e+00> : vector<2x16x16xf32>
    %88 = tpu.matmul %86, %87, %cst_33 {dimension_numbers = #tpu.dot_dimension_numbers<[2], [1], [1], [2], [0, 0, 0, 1, 1, 2], [0], [0]>} : vector<2x16x16xbf16>, vector<2x16x16xbf16>, vector<2x16x16xf32> -> vector<2x16x16xf32>
    "tpu.trace_stop"() : () -> ()
    %89 = vector.shape_cast %88 : vector<2x16x16xf32> to vector<32x16xf32>
    %90 = arith.truncf %89 : vector<32x16xf32> to vector<32x16xbf16>
    %91 = vector.extract_strided_slice %25 {offsets = [32, 0], sizes = [16, 128], strides = [1, 1]} : vector<128x128xbf16> to vector<16x128xbf16>
    %cst_34 = arith.constant dense<0.000000e+00> : vector<32x128xf32>
    %92 = tpu.matmul %90, %91, %cst_34 {dimension_numbers = #tpu.dot_dimension_numbers<[1], [0], [0], [1], [0, 0, 1, 1], [], []>} : vector<32x16xbf16>, vector<16x128xbf16>, vector<32x128xf32> -> vector<32x128xf32>
    %93 = arith.addf %72, %92 : vector<32x128xf32>
    %94 = vector.extract_strided_slice %27 {offsets = [0, 0, 48], sizes = [2, 16, 16], strides = [1, 1, 1]} : vector<2x16x128xbf16> to vector<2x16x16xbf16>
    %95 = vector.extract_strided_slice %29 {offsets = [0, 0, 48], sizes = [2, 16, 16], strides = [1, 1, 1]} : vector<2x16x128xbf16> to vector<2x16x16xbf16>
    "tpu.trace_start"() <{level = 10 : i32, message = "bnd,bmd->bnm"}> : () -> ()
    %cst_35 = arith.constant dense<0.000000e+00> : vector<2x16x16xf32>
    %96 = tpu.matmul %94, %95, %cst_35 {dimension_numbers = #tpu.dot_dimension_numbers<[2], [2], [1], [1], [0, 0, 0, 1, 1, 1], [0], [0]>} : vector<2x16x16xbf16>, vector<2x16x16xbf16>, vector<2x16x16xf32> -> vector<2x16x16xf32>
    "tpu.trace_stop"() : () -> ()
    %cst_36 = arith.constant dense<0xFF800000> : vector<2x16xf32>
    %97 = vector.multi_reduction <maximumf>, %96, %cst_36 [2] : vector<2x16x16xf32> to vector<2x16xf32>
    %98 = vector.shape_cast %97 : vector<2x16xf32> to vector<2x16x1xf32>
    %99 = vector.broadcast %98 : vector<2x16x1xf32> to vector<2x16x16xf32>
    %100 = arith.subf %96, %99 : vector<2x16x16xf32>
    %101 = math.exp %100 : vector<2x16x16xf32>
    %cst_37 = arith.constant dense<0.000000e+00> : vector<2x16xf32>
    %102 = vector.multi_reduction <add>, %101, %cst_37 [2] : vector<2x16x16xf32> to vector<2x16xf32>
    %103 = vector.shape_cast %102 : vector<2x16xf32> to vector<2x16x1xf32>
    %104 = tpu.reciprocal %103 {approx = true} : vector<2x16x1xf32> -> vector<2x16x1xf32>
    %105 = vector.broadcast %104 : vector<2x16x1xf32> to vector<2x16x16xf32>
    %106 = arith.mulf %101, %105 : vector<2x16x16xf32>
    %107 = arith.truncf %106 : vector<2x16x16xf32> to vector<2x16x16xbf16>
    %108 = vector.extract_strided_slice %31 {offsets = [0, 0, 48], sizes = [2, 16, 16], strides = [1, 1, 1]} : vector<2x16x128xbf16> to vector<2x16x16xbf16>
    "tpu.trace_start"() <{level = 10 : i32, message = "bnm,bmd->bnd"}> : () -> ()
    %cst_38 = arith.constant dense<0.000000e+00> : vector<2x16x16xf32>
    %109 = tpu.matmul %107, %108, %cst_38 {dimension_numbers = #tpu.dot_dimension_numbers<[2], [1], [1], [2], [0, 0, 0, 1, 1, 2], [0], [0]>} : vector<2x16x16xbf16>, vector<2x16x16xbf16>, vector<2x16x16xf32> -> vector<2x16x16xf32>
    "tpu.trace_stop"() : () -> ()
    %110 = vector.shape_cast %109 : vector<2x16x16xf32> to vector<32x16xf32>
    %111 = arith.truncf %110 : vector<32x16xf32> to vector<32x16xbf16>
    %112 = vector.extract_strided_slice %25 {offsets = [48, 0], sizes = [16, 128], strides = [1, 1]} : vector<128x128xbf16> to vector<16x128xbf16>
    %cst_39 = arith.constant dense<0.000000e+00> : vector<32x128xf32>
    %113 = tpu.matmul %111, %112, %cst_39 {dimension_numbers = #tpu.dot_dimension_numbers<[1], [0], [0], [1], [0, 0, 1, 1], [], []>} : vector<32x16xbf16>, vector<16x128xbf16>, vector<32x128xf32> -> vector<32x128xf32>
    %114 = arith.addf %93, %113 : vector<32x128xf32>
    %115 = vector.extract_strided_slice %27 {offsets = [0, 0, 64], sizes = [2, 16, 16], strides = [1, 1, 1]} : vector<2x16x128xbf16> to vector<2x16x16xbf16>
    %116 = vector.extract_strided_slice %29 {offsets = [0, 0, 64], sizes = [2, 16, 16], strides = [1, 1, 1]} : vector<2x16x128xbf16> to vector<2x16x16xbf16>
    "tpu.trace_start"() <{level = 10 : i32, message = "bnd,bmd->bnm"}> : () -> ()
    %cst_40 = arith.constant dense<0.000000e+00> : vector<2x16x16xf32>
    %117 = tpu.matmul %115, %116, %cst_40 {dimension_numbers = #tpu.dot_dimension_numbers<[2], [2], [1], [1], [0, 0, 0, 1, 1, 1], [0], [0]>} : vector<2x16x16xbf16>, vector<2x16x16xbf16>, vector<2x16x16xf32> -> vector<2x16x16xf32>
    "tpu.trace_stop"() : () -> ()
    %cst_41 = arith.constant dense<0xFF800000> : vector<2x16xf32>
    %118 = vector.multi_reduction <maximumf>, %117, %cst_41 [2] : vector<2x16x16xf32> to vector<2x16xf32>
    %119 = vector.shape_cast %118 : vector<2x16xf32> to vector<2x16x1xf32>
    %120 = vector.broadcast %119 : vector<2x16x1xf32> to vector<2x16x16xf32>
    %121 = arith.subf %117, %120 : vector<2x16x16xf32>
    %122 = math.exp %121 : vector<2x16x16xf32>
    %cst_42 = arith.constant dense<0.000000e+00> : vector<2x16xf32>
    %123 = vector.multi_reduction <add>, %122, %cst_42 [2] : vector<2x16x16xf32> to vector<2x16xf32>
    %124 = vector.shape_cast %123 : vector<2x16xf32> to vector<2x16x1xf32>
    %125 = tpu.reciprocal %124 {approx = true} : vector<2x16x1xf32> -> vector<2x16x1xf32>
    %126 = vector.broadcast %125 : vector<2x16x1xf32> to vector<2x16x16xf32>
    %127 = arith.mulf %122, %126 : vector<2x16x16xf32>
    %128 = arith.truncf %127 : vector<2x16x16xf32> to vector<2x16x16xbf16>
    %129 = vector.extract_strided_slice %31 {offsets = [0, 0, 64], sizes = [2, 16, 16], strides = [1, 1, 1]} : vector<2x16x128xbf16> to vector<2x16x16xbf16>
    "tpu.trace_start"() <{level = 10 : i32, message = "bnm,bmd->bnd"}> : () -> ()
    %cst_43 = arith.constant dense<0.000000e+00> : vector<2x16x16xf32>
    %130 = tpu.matmul %128, %129, %cst_43 {dimension_numbers = #tpu.dot_dimension_numbers<[2], [1], [1], [2], [0, 0, 0, 1, 1, 2], [0], [0]>} : vector<2x16x16xbf16>, vector<2x16x16xbf16>, vector<2x16x16xf32> -> vector<2x16x16xf32>
    "tpu.trace_stop"() : () -> ()
    %131 = vector.shape_cast %130 : vector<2x16x16xf32> to vector<32x16xf32>
    %132 = arith.truncf %131 : vector<32x16xf32> to vector<32x16xbf16>
    %133 = vector.extract_strided_slice %25 {offsets = [64, 0], sizes = [16, 128], strides = [1, 1]} : vector<128x128xbf16> to vector<16x128xbf16>
    %cst_44 = arith.constant dense<0.000000e+00> : vector<32x128xf32>
    %134 = tpu.matmul %132, %133, %cst_44 {dimension_numbers = #tpu.dot_dimension_numbers<[1], [0], [0], [1], [0, 0, 1, 1], [], []>} : vector<32x16xbf16>, vector<16x128xbf16>, vector<32x128xf32> -> vector<32x128xf32>
    %135 = arith.addf %114, %134 : vector<32x128xf32>
    %136 = vector.extract_strided_slice %27 {offsets = [0, 0, 80], sizes = [2, 16, 16], strides = [1, 1, 1]} : vector<2x16x128xbf16> to vector<2x16x16xbf16>
    %137 = vector.extract_strided_slice %29 {offsets = [0, 0, 80], sizes = [2, 16, 16], strides = [1, 1, 1]} : vector<2x16x128xbf16> to vector<2x16x16xbf16>
    "tpu.trace_start"() <{level = 10 : i32, message = "bnd,bmd->bnm"}> : () -> ()
    %cst_45 = arith.constant dense<0.000000e+00> : vector<2x16x16xf32>
    %138 = tpu.matmul %136, %137, %cst_45 {dimension_numbers = #tpu.dot_dimension_numbers<[2], [2], [1], [1], [0, 0, 0, 1, 1, 1], [0], [0]>} : vector<2x16x16xbf16>, vector<2x16x16xbf16>, vector<2x16x16xf32> -> vector<2x16x16xf32>
    "tpu.trace_stop"() : () -> ()
    %cst_46 = arith.constant dense<0xFF800000> : vector<2x16xf32>
    %139 = vector.multi_reduction <maximumf>, %138, %cst_46 [2] : vector<2x16x16xf32> to vector<2x16xf32>
    %140 = vector.shape_cast %139 : vector<2x16xf32> to vector<2x16x1xf32>
    %141 = vector.broadcast %140 : vector<2x16x1xf32> to vector<2x16x16xf32>
    %142 = arith.subf %138, %141 : vector<2x16x16xf32>
    %143 = math.exp %142 : vector<2x16x16xf32>
    %cst_47 = arith.constant dense<0.000000e+00> : vector<2x16xf32>
    %144 = vector.multi_reduction <add>, %143, %cst_47 [2] : vector<2x16x16xf32> to vector<2x16xf32>
    %145 = vector.shape_cast %144 : vector<2x16xf32> to vector<2x16x1xf32>
    %146 = tpu.reciprocal %145 {approx = true} : vector<2x16x1xf32> -> vector<2x16x1xf32>
    %147 = vector.broadcast %146 : vector<2x16x1xf32> to vector<2x16x16xf32>
    %148 = arith.mulf %143, %147 : vector<2x16x16xf32>
    %149 = arith.truncf %148 : vector<2x16x16xf32> to vector<2x16x16xbf16>
    %150 = vector.extract_strided_slice %31 {offsets = [0, 0, 80], sizes = [2, 16, 16], strides = [1, 1, 1]} : vector<2x16x128xbf16> to vector<2x16x16xbf16>
    "tpu.trace_start"() <{level = 10 : i32, message = "bnm,bmd->bnd"}> : () -> ()
    %cst_48 = arith.constant dense<0.000000e+00> : vector<2x16x16xf32>
    %151 = tpu.matmul %149, %150, %cst_48 {dimension_numbers = #tpu.dot_dimension_numbers<[2], [1], [1], [2], [0, 0, 0, 1, 1, 2], [0], [0]>} : vector<2x16x16xbf16>, vector<2x16x16xbf16>, vector<2x16x16xf32> -> vector<2x16x16xf32>
    "tpu.trace_stop"() : () -> ()
    %152 = vector.shape_cast %151 : vector<2x16x16xf32> to vector<32x16xf32>
    %153 = arith.truncf %152 : vector<32x16xf32> to vector<32x16xbf16>
    %154 = vector.extract_strided_slice %25 {offsets = [80, 0], sizes = [16, 128], strides = [1, 1]} : vector<128x128xbf16> to vector<16x128xbf16>
    %cst_49 = arith.constant dense<0.000000e+00> : vector<32x128xf32>
    %155 = tpu.matmul %153, %154, %cst_49 {dimension_numbers = #tpu.dot_dimension_numbers<[1], [0], [0], [1], [0, 0, 1, 1], [], []>} : vector<32x16xbf16>, vector<16x128xbf16>, vector<32x128xf32> -> vector<32x128xf32>
    %156 = arith.addf %135, %155 : vector<32x128xf32>
    %157 = vector.extract_strided_slice %27 {offsets = [0, 0, 96], sizes = [2, 16, 16], strides = [1, 1, 1]} : vector<2x16x128xbf16> to vector<2x16x16xbf16>
    %158 = vector.extract_strided_slice %29 {offsets = [0, 0, 96], sizes = [2, 16, 16], strides = [1, 1, 1]} : vector<2x16x128xbf16> to vector<2x16x16xbf16>
    "tpu.trace_start"() <{level = 10 : i32, message = "bnd,bmd->bnm"}> : () -> ()
    %cst_50 = arith.constant dense<0.000000e+00> : vector<2x16x16xf32>
    %159 = tpu.matmul %157, %158, %cst_50 {dimension_numbers = #tpu.dot_dimension_numbers<[2], [2], [1], [1], [0, 0, 0, 1, 1, 1], [0], [0]>} : vector<2x16x16xbf16>, vector<2x16x16xbf16>, vector<2x16x16xf32> -> vector<2x16x16xf32>
    "tpu.trace_stop"() : () -> ()
    %cst_51 = arith.constant dense<0xFF800000> : vector<2x16xf32>
    %160 = vector.multi_reduction <maximumf>, %159, %cst_51 [2] : vector<2x16x16xf32> to vector<2x16xf32>
    %161 = vector.shape_cast %160 : vector<2x16xf32> to vector<2x16x1xf32>
    %162 = vector.broadcast %161 : vector<2x16x1xf32> to vector<2x16x16xf32>
    %163 = arith.subf %159, %162 : vector<2x16x16xf32>
    %164 = math.exp %163 : vector<2x16x16xf32>
    %cst_52 = arith.constant dense<0.000000e+00> : vector<2x16xf32>
    %165 = vector.multi_reduction <add>, %164, %cst_52 [2] : vector<2x16x16xf32> to vector<2x16xf32>
    %166 = vector.shape_cast %165 : vector<2x16xf32> to vector<2x16x1xf32>
    %167 = tpu.reciprocal %166 {approx = true} : vector<2x16x1xf32> -> vector<2x16x1xf32>
    %168 = vector.broadcast %167 : vector<2x16x1xf32> to vector<2x16x16xf32>
    %169 = arith.mulf %164, %168 : vector<2x16x16xf32>
    %170 = arith.truncf %169 : vector<2x16x16xf32> to vector<2x16x16xbf16>
    %171 = vector.extract_strided_slice %31 {offsets = [0, 0, 96], sizes = [2, 16, 16], strides = [1, 1, 1]} : vector<2x16x128xbf16> to vector<2x16x16xbf16>
    "tpu.trace_start"() <{level = 10 : i32, message = "bnm,bmd->bnd"}> : () -> ()
    %cst_53 = arith.constant dense<0.000000e+00> : vector<2x16x16xf32>
    %172 = tpu.matmul %170, %171, %cst_53 {dimension_numbers = #tpu.dot_dimension_numbers<[2], [1], [1], [2], [0, 0, 0, 1, 1, 2], [0], [0]>} : vector<2x16x16xbf16>, vector<2x16x16xbf16>, vector<2x16x16xf32> -> vector<2x16x16xf32>
    "tpu.trace_stop"() : () -> ()
    %173 = vector.shape_cast %172 : vector<2x16x16xf32> to vector<32x16xf32>
    %174 = arith.truncf %173 : vector<32x16xf32> to vector<32x16xbf16>
    %175 = vector.extract_strided_slice %25 {offsets = [96, 0], sizes = [16, 128], strides = [1, 1]} : vector<128x128xbf16> to vector<16x128xbf16>
    %cst_54 = arith.constant dense<0.000000e+00> : vector<32x128xf32>
    %176 = tpu.matmul %174, %175, %cst_54 {dimension_numbers = #tpu.dot_dimension_numbers<[1], [0], [0], [1], [0, 0, 1, 1], [], []>} : vector<32x16xbf16>, vector<16x128xbf16>, vector<32x128xf32> -> vector<32x128xf32>
    %177 = arith.addf %156, %176 : vector<32x128xf32>
    %178 = vector.extract_strided_slice %27 {offsets = [0, 0, 112], sizes = [2, 16, 16], strides = [1, 1, 1]} : vector<2x16x128xbf16> to vector<2x16x16xbf16>
    %179 = vector.extract_strided_slice %29 {offsets = [0, 0, 112], sizes = [2, 16, 16], strides = [1, 1, 1]} : vector<2x16x128xbf16> to vector<2x16x16xbf16>
    "tpu.trace_start"() <{level = 10 : i32, message = "bnd,bmd->bnm"}> : () -> ()
    %cst_55 = arith.constant dense<0.000000e+00> : vector<2x16x16xf32>
    %180 = tpu.matmul %178, %179, %cst_55 {dimension_numbers = #tpu.dot_dimension_numbers<[2], [2], [1], [1], [0, 0, 0, 1, 1, 1], [0], [0]>} : vector<2x16x16xbf16>, vector<2x16x16xbf16>, vector<2x16x16xf32> -> vector<2x16x16xf32>
    "tpu.trace_stop"() : () -> ()
    %cst_56 = arith.constant dense<0xFF800000> : vector<2x16xf32>
    %181 = vector.multi_reduction <maximumf>, %180, %cst_56 [2] : vector<2x16x16xf32> to vector<2x16xf32>
    %182 = vector.shape_cast %181 : vector<2x16xf32> to vector<2x16x1xf32>
    %183 = vector.broadcast %182 : vector<2x16x1xf32> to vector<2x16x16xf32>
    %184 = arith.subf %180, %183 : vector<2x16x16xf32>
    %185 = math.exp %184 : vector<2x16x16xf32>
    %cst_57 = arith.constant dense<0.000000e+00> : vector<2x16xf32>
    %186 = vector.multi_reduction <add>, %185, %cst_57 [2] : vector<2x16x16xf32> to vector<2x16xf32>
    %187 = vector.shape_cast %186 : vector<2x16xf32> to vector<2x16x1xf32>
    %188 = tpu.reciprocal %187 {approx = true} : vector<2x16x1xf32> -> vector<2x16x1xf32>
    %189 = vector.broadcast %188 : vector<2x16x1xf32> to vector<2x16x16xf32>
    %190 = arith.mulf %185, %189 : vector<2x16x16xf32>
    %191 = arith.truncf %190 : vector<2x16x16xf32> to vector<2x16x16xbf16>
    %192 = vector.extract_strided_slice %31 {offsets = [0, 0, 112], sizes = [2, 16, 16], strides = [1, 1, 1]} : vector<2x16x128xbf16> to vector<2x16x16xbf16>
    "tpu.trace_start"() <{level = 10 : i32, message = "bnm,bmd->bnd"}> : () -> ()
    %cst_58 = arith.constant dense<0.000000e+00> : vector<2x16x16xf32>
    %193 = tpu.matmul %191, %192, %cst_58 {dimension_numbers = #tpu.dot_dimension_numbers<[2], [1], [1], [2], [0, 0, 0, 1, 1, 2], [0], [0]>} : vector<2x16x16xbf16>, vector<2x16x16xbf16>, vector<2x16x16xf32> -> vector<2x16x16xf32>
    "tpu.trace_stop"() : () -> ()
    %194 = vector.shape_cast %193 : vector<2x16x16xf32> to vector<32x16xf32>
    %195 = arith.truncf %194 : vector<32x16xf32> to vector<32x16xbf16>
    %196 = vector.extract_strided_slice %25 {offsets = [112, 0], sizes = [16, 128], strides = [1, 1]} : vector<128x128xbf16> to vector<16x128xbf16>
    %cst_59 = arith.constant dense<0.000000e+00> : vector<32x128xf32>
    %197 = tpu.matmul %195, %196, %cst_59 {dimension_numbers = #tpu.dot_dimension_numbers<[1], [0], [0], [1], [0, 0, 1, 1], [], []>} : vector<32x16xbf16>, vector<16x128xbf16>, vector<32x128xf32> -> vector<32x128xf32>
    %198 = arith.addf %177, %197 : vector<32x128xf32>
    %c0_60 = arith.constant 0 : index
    %c0_61 = arith.constant 0 : index
    %c0_62 = arith.constant 0 : index
    %199 = vector.load %arg8[%c0_60, %c0_61, %c0_62] : memref<1x1x128xf32, #tpu.memory_space<vmem>>, vector<1x1x128xf32>
    %200 = vector.shape_cast %199 : vector<1x1x128xf32> to vector<1x128xf32>
    %201 = vector.broadcast %200 : vector<1x128xf32> to vector<32x128xf32>
    %202 = arith.addf %198, %201 : vector<32x128xf32>
    %203 = arith.addf %3, %202 : vector<32x128xf32>
    %c0_63 = arith.constant 0 : index
    %c0_64 = arith.constant 0 : index
    %c0_65 = arith.constant 0 : index
    %204 = vector.load %arg9[%c0_63, %c0_64, %c0_65] : memref<1x1x128xf32, #tpu.memory_space<vmem>>, vector<1x1x128xf32>
    %205 = vector.shape_cast %204 : vector<1x1x128xf32> to vector<1x128xf32>
    %c0_66 = arith.constant 0 : index
    %c0_67 = arith.constant 0 : index
    %c0_68 = arith.constant 0 : index
    %206 = vector.load %arg10[%c0_66, %c0_67, %c0_68] : memref<1x1x128xf32, #tpu.memory_space<vmem>>, vector<1x1x128xf32>
    %207 = vector.shape_cast %206 : vector<1x1x128xf32> to vector<1x128xf32>
    %cst_69 = arith.constant dense<0.000000e+00> : vector<32xf32>
    %208 = vector.multi_reduction <add>, %203, %cst_69 [1] : vector<32x128xf32> to vector<32xf32>
    %209 = vector.shape_cast %208 : vector<32xf32> to vector<32x1xf32>
    %cst_70 = arith.constant 1.280000e+02 : f32
    %210 = vector.broadcast %cst_70 : f32 to vector<32x1xf32>
    %211 = arith.divf %209, %210 : vector<32x1xf32>
    %212 = vector.broadcast %211 : vector<32x1xf32> to vector<32x128xf32>
    %213 = arith.subf %203, %212 : vector<32x128xf32>
    %214 = arith.mulf %213, %213 : vector<32x128xf32>
    %cst_71 = arith.constant dense<0.000000e+00> : vector<32xf32>
    %215 = vector.multi_reduction <add>, %214, %cst_71 [1] : vector<32x128xf32> to vector<32xf32>
    %216 = vector.shape_cast %215 : vector<32xf32> to vector<32x1xf32>
    %cst_72 = arith.constant 1.280000e+02 : f32
    %217 = vector.broadcast %cst_72 : f32 to vector<32x1xf32>
    %218 = arith.divf %216, %217 : vector<32x1xf32>
    %219 = vector.broadcast %211 : vector<32x1xf32> to vector<32x128xf32>
    %220 = arith.subf %203, %219 : vector<32x128xf32>
    %cst_73 = arith.constant 9.99999974E-6 : f32
    %221 = vector.broadcast %cst_73 : f32 to vector<32x1xf32>
    %222 = arith.addf %218, %221 : vector<32x1xf32>
    %223 = math.rsqrt %222 : vector<32x1xf32>
    %224 = vector.broadcast %223 : vector<32x1xf32> to vector<32x128xf32>
    %225 = arith.mulf %220, %224 : vector<32x128xf32>
    %226 = vector.broadcast %205 : vector<1x128xf32> to vector<32x128xf32>
    %227 = arith.mulf %225, %226 : vector<32x128xf32>
    %228 = vector.broadcast %207 : vector<1x128xf32> to vector<32x128xf32>
    %229 = arith.addf %227, %228 : vector<32x128xf32>
    %230 = arith.truncf %229 : vector<32x128xf32> to vector<32x128xbf16>
    %c0_74 = arith.constant 0 : index
    %c0_75 = arith.constant 0 : index
    %c0_76 = arith.constant 0 : index
    %231 = vector.load %arg11[%c0_74, %c0_75, %c0_76] : memref<1x128x2048xbf16, #tpu.memory_space<vmem>>, vector<1x128x2048xbf16>
    %232 = vector.shape_cast %231 : vector<1x128x2048xbf16> to vector<128x2048xbf16>
    %cst_77 = arith.constant dense<0.000000e+00> : vector<32x2048xf32>
    %233 = tpu.matmul %230, %232, %cst_77 {dimension_numbers = #tpu.dot_dimension_numbers<[1], [0], [0], [1], [0, 0, 1, 1], [], []>} : vector<32x128xbf16>, vector<128x2048xbf16>, vector<32x2048xf32> -> vector<32x2048xf32>
    %c0_78 = arith.constant 0 : index
    %c0_79 = arith.constant 0 : index
    %c0_80 = arith.constant 0 : index
    %234 = vector.load %arg12[%c0_78, %c0_79, %c0_80] : memref<1x1x2048xf32, #tpu.memory_space<vmem>>, vector<1x1x2048xf32>
    %235 = vector.shape_cast %234 : vector<1x1x2048xf32> to vector<1x2048xf32>
    %236 = vector.broadcast %235 : vector<1x2048xf32> to vector<32x2048xf32>
    %237 = arith.addf %233, %236 : vector<32x2048xf32>
    %cst_81 = arith.constant 0.000000e+00 : f32
    %238 = vector.broadcast %cst_81 : f32 to vector<32x2048xf32>
    %239 = arith.maximumf %237, %238 : vector<32x2048xf32>
    %240 = arith.truncf %239 : vector<32x2048xf32> to vector<32x2048xbf16>
    %c0_82 = arith.constant 0 : index
    %c0_83 = arith.constant 0 : index
    %c0_84 = arith.constant 0 : index
    %241 = vector.load %arg13[%c0_82, %c0_83, %c0_84] : memref<1x2048x128xbf16, #tpu.memory_space<vmem>>, vector<1x2048x128xbf16>
    %242 = vector.shape_cast %241 : vector<1x2048x128xbf16> to vector<2048x128xbf16>
    %cst_85 = arith.constant dense<0.000000e+00> : vector<32x128xf32>
    %243 = tpu.matmul %240, %242, %cst_85 {dimension_numbers = #tpu.dot_dimension_numbers<[1], [0], [0], [1], [0, 0, 1, 1], [], []>} : vector<32x2048xbf16>, vector<2048x128xbf16>, vector<32x128xf32> -> vector<32x128xf32>
    %c0_86 = arith.constant 0 : index
    %c0_87 = arith.constant 0 : index
    %c0_88 = arith.constant 0 : index
    %244 = vector.load %arg14[%c0_86, %c0_87, %c0_88] : memref<1x1x128xf32, #tpu.memory_space<vmem>>, vector<1x1x128xf32>
    %245 = vector.shape_cast %244 : vector<1x1x128xf32> to vector<1x128xf32>
    %246 = vector.broadcast %245 : vector<1x128xf32> to vector<32x128xf32>
    %247 = arith.addf %243, %246 : vector<32x128xf32>
    %248 = arith.addf %229, %247 : vector<32x128xf32>
    %c0_89 = arith.constant 0 : index
    %c0_90 = arith.constant 0 : index
    %c0_91 = arith.constant 0 : index
    %249 = vector.load %arg15[%c0_89, %c0_90, %c0_91] : memref<1x1x128xf32, #tpu.memory_space<vmem>>, vector<1x1x128xf32>
    %250 = vector.shape_cast %249 : vector<1x1x128xf32> to vector<1x128xf32>
    %c0_92 = arith.constant 0 : index
    %c0_93 = arith.constant 0 : index
    %c0_94 = arith.constant 0 : index
    %251 = vector.load %arg16[%c0_92, %c0_93, %c0_94] : memref<1x1x128xf32, #tpu.memory_space<vmem>>, vector<1x1x128xf32>
    %252 = vector.shape_cast %251 : vector<1x1x128xf32> to vector<1x128xf32>
    %cst_95 = arith.constant dense<0.000000e+00> : vector<32xf32>
    %253 = vector.multi_reduction <add>, %248, %cst_95 [1] : vector<32x128xf32> to vector<32xf32>
    %254 = vector.shape_cast %253 : vector<32xf32> to vector<32x1xf32>
    %cst_96 = arith.constant 1.280000e+02 : f32
    %255 = vector.broadcast %cst_96 : f32 to vector<32x1xf32>
    %256 = arith.divf %254, %255 : vector<32x1xf32>
    %257 = vector.broadcast %256 : vector<32x1xf32> to vector<32x128xf32>
    %258 = arith.subf %248, %257 : vector<32x128xf32>
    %259 = arith.mulf %258, %258 : vector<32x128xf32>
    %cst_97 = arith.constant dense<0.000000e+00> : vector<32xf32>
    %260 = vector.multi_reduction <add>, %259, %cst_97 [1] : vector<32x128xf32> to vector<32xf32>
    %261 = vector.shape_cast %260 : vector<32xf32> to vector<32x1xf32>
    %cst_98 = arith.constant 1.280000e+02 : f32
    %262 = vector.broadcast %cst_98 : f32 to vector<32x1xf32>
    %263 = arith.divf %261, %262 : vector<32x1xf32>
    %264 = vector.broadcast %256 : vector<32x1xf32> to vector<32x128xf32>
    %265 = arith.subf %248, %264 : vector<32x128xf32>
    %cst_99 = arith.constant 9.99999974E-6 : f32
    %266 = vector.broadcast %cst_99 : f32 to vector<32x1xf32>
    %267 = arith.addf %263, %266 : vector<32x1xf32>
    %268 = math.rsqrt %267 : vector<32x1xf32>
    %269 = vector.broadcast %268 : vector<32x1xf32> to vector<32x128xf32>
    %270 = arith.mulf %265, %269 : vector<32x128xf32>
    %271 = vector.broadcast %250 : vector<1x128xf32> to vector<32x128xf32>
    %272 = arith.mulf %270, %271 : vector<32x128xf32>
    %273 = vector.broadcast %252 : vector<1x128xf32> to vector<32x128xf32>
    %274 = arith.addf %272, %273 : vector<32x128xf32>
    %c0_100 = arith.constant 0 : index
    %c0_101 = arith.constant 0 : index
    %275 = vector.load %arg18[%c0_100, %c0_101] : memref<32x128xf32, #tpu.memory_space<vmem>>, vector<32x128xf32>
    tpu.vector_store %arg18[%c0_100, %c0_101], %274 {strides = array<i32>} : memref<32x128xf32, #tpu.memory_space<vmem>>, vector<32x128xf32>,
    %c5_i32 = arith.constant 5 : i32
    %276 = arith.cmpi eq, %arg0, %c5_i32 : i32
    %277 = arith.extui %276 : i1 to i32
    %c0_i32_102 = arith.constant 0 : i32
    %278 = arith.cmpi ne, %277, %c0_i32_102 : i32
    scf.if %278 {
      %279 = vector.shape_cast %274 : vector<32x128xf32> to vector<2x16x128xf32>
      %c0_103 = arith.constant 0 : index
      %c0_104 = arith.constant 0 : index
      %c0_105 = arith.constant 0 : index
      %280 = vector.load %arg17[%c0_103, %c0_104, %c0_105] : memref<2x16x128xf32, #tpu.memory_space<vmem>>, vector<2x16x128xf32>
      tpu.vector_store %arg17[%c0_103, %c0_104, %c0_105], %279 {strides = array<i32>} : memref<2x16x128xf32, #tpu.memory_space<vmem>>, vector<2x16x128xf32>,
    } else {
    }
    return
  }
  func.func @transform_0(%arg0: i32) -> (i32, i32, i32) {
    %c0_i32 = arith.constant 0 : i32
    %c0_i32_0 = arith.constant 0 : i32
    %c0_i32_1 = arith.constant 0 : i32
    %c0_i32_2 = arith.constant 0 : i32
    return %c0_i32, %c0_i32_0, %c0_i32_1 : i32, i32, i32
  }
  func.func @transform_1(%arg0: i32) -> (i32, i32) {
    %c0_i32 = arith.constant 0 : i32
    %c0_i32_0 = arith.constant 0 : i32
    %c0_i32_1 = arith.constant 0 : i32
    return %c0_i32, %c0_i32_0 : i32, i32
  }
  func.func @transform_2(%arg0: i32) -> (i32, i32, i32) {
    %c0_i32 = arith.constant 0 : i32
    %c0_i32_0 = arith.constant 0 : i32
    %c0_i32_1 = arith.constant 0 : i32
    return %arg0, %c0_i32, %c0_i32_0 : i32, i32, i32
  }
  func.func @transform_3(%arg0: i32) -> (i32, i32, i32) {
    %c0_i32 = arith.constant 0 : i32
    %c0_i32_0 = arith.constant 0 : i32
    %c0_i32_1 = arith.constant 0 : i32
    return %arg0, %c0_i32, %c0_i32_0 : i32, i32, i32
  }
  func.func @transform_4(%arg0: i32) -> (i32, i32, i32) {
    %c0_i32 = arith.constant 0 : i32
    %c0_i32_0 = arith.constant 0 : i32
    %c0_i32_1 = arith.constant 0 : i32
    return %arg0, %c0_i32, %c0_i32_0 : i32, i32, i32
  }
  func.func @transform_5(%arg0: i32) -> (i32, i32, i32) {
    %c0_i32 = arith.constant 0 : i32
    %c0_i32_0 = arith.constant 0 : i32
    %c0_i32_1 = arith.constant 0 : i32
    return %arg0, %c0_i32, %c0_i32_0 : i32, i32, i32
  }
  func.func @transform_6(%arg0: i32) -> (i32, i32, i32) {
    %c0_i32 = arith.constant 0 : i32
    %c0_i32_0 = arith.constant 0 : i32
    %c0_i32_1 = arith.constant 0 : i32
    return %arg0, %c0_i32, %c0_i32_0 : i32, i32, i32
  }
  func.func @transform_7(%arg0: i32) -> (i32, i32, i32) {
    %c0_i32 = arith.constant 0 : i32
    %c0_i32_0 = arith.constant 0 : i32
    %c0_i32_1 = arith.constant 0 : i32
    return %arg0, %c0_i32, %c0_i32_0 : i32, i32, i32
  }
  func.func @transform_8(%arg0: i32) -> (i32, i32, i32) {
    %c0_i32 = arith.constant 0 : i32
    %c0_i32_0 = arith.constant 0 : i32
    %c0_i32_1 = arith.constant 0 : i32
    return %arg0, %c0_i32, %c0_i32_0 : i32, i32, i32
  }
  func.func @transform_9(%arg0: i32) -> (i32, i32, i32) {
    %c0_i32 = arith.constant 0 : i32
    %c0_i32_0 = arith.constant 0 : i32
    %c0_i32_1 = arith.constant 0 : i32
    return %arg0, %c0_i32, %c0_i32_0 : i32, i32, i32
  }
  func.func @transform_10(%arg0: i32) -> (i32, i32, i32) {
    %c0_i32 = arith.constant 0 : i32
    %c0_i32_0 = arith.constant 0 : i32
    %c0_i32_1 = arith.constant 0 : i32
    return %arg0, %c0_i32, %c0_i32_0 : i32, i32, i32
  }
  func.func @transform_11(%arg0: i32) -> (i32, i32, i32) {
    %c0_i32 = arith.constant 0 : i32
    %c0_i32_0 = arith.constant 0 : i32
    %c0_i32_1 = arith.constant 0 : i32
    return %arg0, %c0_i32, %c0_i32_0 : i32, i32, i32
  }
  func.func @transform_12(%arg0: i32) -> (i32, i32, i32) {
    %c0_i32 = arith.constant 0 : i32
    %c0_i32_0 = arith.constant 0 : i32
    %c0_i32_1 = arith.constant 0 : i32
    return %arg0, %c0_i32, %c0_i32_0 : i32, i32, i32
  }
  func.func @transform_13(%arg0: i32) -> (i32, i32, i32) {
    %c0_i32 = arith.constant 0 : i32
    %c0_i32_0 = arith.constant 0 : i32
    %c0_i32_1 = arith.constant 0 : i32
    return %arg0, %c0_i32, %c0_i32_0 : i32, i32, i32
  }
  func.func @transform_14(%arg0: i32) -> (i32, i32, i32) {
    %c0_i32 = arith.constant 0 : i32
    %c0_i32_0 = arith.constant 0 : i32
    %c0_i32_1 = arith.constant 0 : i32
    return %arg0, %c0_i32, %c0_i32_0 : i32, i32, i32
  }
  func.func @transform_15(%arg0: i32) -> (i32, i32, i32) {
    %c0_i32 = arith.constant 0 : i32
    %c0_i32_0 = arith.constant 0 : i32
    %c0_i32_1 = arith.constant 0 : i32
    return %arg0, %c0_i32, %c0_i32_0 : i32, i32, i32
  }
  func.func @transform_16(%arg0: i32) -> (i32, i32, i32) {
    %c0_i32 = arith.constant 0 : i32
    %c0_i32_0 = arith.constant 0 : i32
    %c0_i32_1 = arith.constant 0 : i32
    %c0_i32_2 = arith.constant 0 : i32
    return %c0_i32, %c0_i32_0, %c0_i32_1 : i32, i32, i32
  }
}

</mosaic_0001>

<bundles_post_ra>
// kernel: tpu_custom_call.1
= control target key start
LH: loop header
LB: loop body
LE: loop exit
PB: predicated region body
PF: predicated region fallthrough
CT: control target
= control target key end

     0   :  { %s10523_s0 = inlined_call_operand.hbm [shape: f32[2,16,128], index: 0, kind: input, shape index: {}]   ;;  %s10524_s1 = inlined_call_operand.hbm [shape: f32[32,128], index: 1, kind: input, shape index: {}]   ;;  %s10525_s2 = inlined_call_operand.hbm [shape: bf16[6,128,256], index: 2, kind: input, shape index: {}]   ;;  %s10526_s3 = inlined_call_operand.hbm [shape: f32[6,1,256], index: 3, kind: input, shape index: {}]   ;;  %s10527_s4 = inlined_call_operand.hbm [shape: bf16[6,128,128], index: 4, kind: input, shape index: {}]   ;;  %s10528_s5 = inlined_call_operand.hbm [shape: f32[6,1,128], index: 5, kind: input, shape index: {}]   ;;  %s10529_s6 = inlined_call_operand.hbm [shape: bf16[6,128,128], index: 6, kind: input, shape index: {}]   ;;  %s10530_s7 = inlined_call_operand.hbm [shape: f32[6,1,128], index: 7, kind: input, shape index: {}]   ;;  %s10531_s8 = inlined_call_operand.hbm [shape: f32[6,1,128], index: 8, kind: input, shape index: {}]   ;;  %s10532_s9 = inlined_call_operand.hbm [shape: f32[6,1,128], index: 9, kind: input, shape index: {}]   ;;  %s10533_s10 = inlined_call_operand.hbm [shape: bf16[6,128,2048], index: 10, kind: input, shape index: {}]   ;;  %s10534_s11 = inlined_call_operand.hbm [shape: f32[6,1,2048], index: 11, kind: input, shape index: {}]   ;;  %s10535_s12 = inlined_call_operand.hbm [shape: bf16[6,2048,128], index: 12, kind: input, shape index: {}]   ;;  %s10536_s13 = inlined_call_operand.hbm [shape: f32[6,1,128], index: 13, kind: input, shape index: {}]   ;;  %s10537_s14 = inlined_call_operand.hbm [shape: f32[6,1,128], index: 14, kind: input, shape index: {}]   ;;  %s10538_s15 = inlined_call_operand.hbm [shape: f32[6,1,128], index: 15, kind: input, shape index: {}]   ;;  %s10539_s16 = inlined_call_operand.hbm [shape: f32[2,16,128], index: 16, kind: output, shape index: {}]  }
   0x1   :  { %10560 = sst [smem:[#allocation34_spill]] %s10523_s0 }
   0x2   :  { %10561 = sst [smem:[#allocation35_spill]] %s10524_s1 }
   0x3   :  { %10562 = sst [smem:[#allocation36_spill]] %s10525_s2 }
   0x4   :  { %10563 = sst [smem:[#allocation37_spill]] %s10526_s3 }
   0x5   :  { %10564 = sst [smem:[#allocation38_spill]] %s10527_s4 }
   0x6   :  { %10565 = sst [smem:[#allocation39_spill]] %s10528_s5 }
   0x7   :  { %10566 = sst [smem:[#allocation40_spill]] %s10529_s6 }
   0x8   :  { %10567 = sst [smem:[#allocation41_spill]] %s10530_s7 }
   0x9   :  { %10568 = sst [smem:[#allocation42_spill]] %s10539_s16 }
   0xa   :  { %21 = vsyncpa [#allocation4], 0 }
   0xb   :  { %22 = vsyncpa [#allocation7], 0 }
   0xc   :  { %23 = vsyncpa [#allocation5], 0  ;;  %s9070_s21 = smov 0   ;;  %s9072_s22 = smov 0  }
   0xd   :  { %s9074_s23 = smov 0   ;;  %s9076_s24 = smov 0  }
   0xe LB: > { %10569 = sst [smem:[#allocation27_spill]] %s8939_s22  ;;  %s9089_s25 = sadd.s32 4294967295, %s8947_s24   ;;  %s8947_s24 = sphi %s9076_s24, %s10607_s24   ;;  %s8943_s23 = sphi %s9074_s23, %s10610_s23   ;;  %s8939_s22 = sphi %s9072_s22, %s10609_s22   ;;  %s8935_s21 = sphi %s9070_s21, %s10608_s21  }
   0xf   : > { %10570 = sst [smem:[#allocation28_spill]] %s8943_s23  ;;  %s9092_s26 = sadd.s32 1, %s8947_s24  }
  0x10   : > { %10571 = sst [smem:[#allocation29_spill]] %s9089_s25  ;;  %s75_s27 = ssub.s32 %s8947_s24, %s9092_s26 }
  0x11   : > { %10572 = sst [smem:[#allocation30_spill]] %s9092_s26  ;;  %s78_s28 = sadd.s32 1, %s8943_s23 }
  0x12   : > { %p76_p0 = scmp.eq.s32.totalorder %s75_s27, 0  ;;  %p85_p1 = scmp.ne.s32.totalorder %s8943_s23, %s8939_s22 }
  0x13   : > { %p86_p2 = scmp.eq.s32.totalorder %s8947_s24, 0  ;;  %p91_p3 = scmp.ne.s32.totalorder %s8939_s22, %s8935_s21 }
  0x14   : > { %s9102_s29 = scalar_select %p76_p0, %s8943_s23, %s78_s28  }
  0x15   : > { %p9104_p4 = por %p86_p2, %p85_p1  ;;  %p10544_p5 = scmp.eq.s32.totalorder %s9089_s25, 0 }
  0x16   : > { %10573 = sst [smem:[#allocation31_spill]] %s9102_s29  ;;  %p7058_p6 = scmp.ge.s32.totalorder %s8947_s24, 1 }
  0x17   : > { %p461_p7 = scmp.lt.s32.totalorder %s8947_s24, 7  ;;  %p9113_p8 = por %p10544_p5, %p91_p3 }
  0x18   : > { %s8949_s18 = smov [#allocation3]   ;;  %s8950_s21 = smov [#allocation6]  }
  0x19   : > { %s10575_s0 = scalar_select %p9113_p8, 1, 0 }
  0x1a   : > { %p9118_p10 = pnand %p7058_p6, %p461_p7  ;;  %s473_s19 = sshll.u32 %s8949_s18, 4  ;;  %s474_s19 = int_to_ptr.vmem [resolvable:$true] %s473_s19 }
  0x1b   : > { %10576 = sst [smem:[#allocation32_spill]] %s10575_s0  ;;  %s486_s27 = sshll.u32 %s8950_s21, 4  ;;  %s487_s27 = int_to_ptr.vmem [resolvable:$true] %s486_s27 }
  0x1c   : > { %p8078_p11 = pneg %p9118_p10  ;;  %s8472_s28 = scalar_lea.vmem %s474_s19, 512 }
  0x1d   : > { %p8473_p0 = scmp.ne.s32.totalorder %s474_s19, %s8472_s28  ;;  %p8480_p3 = scmp.lt.s32.totalorder %s474_s19, %s474_s19 }
  0x1e   : > { %p9126_p12 = pnand %p8078_p11, %p10544_p5  ;;  %p8481_p6 = scmp.lt.s32.totalorder %s8472_s28, %s8472_s28 }
  0x20   : > { %p8463_p13 = pneg %p9126_p12  ;;  %p8482_p7 = por %p8481_p6, %p8480_p3 }
  0x22   : > { %p8475_p1 = pnand %p8473_p0, %p8463_p13 }
  0x24   : > { %p8476_p2 = pneg %p8475_p1 }
  0x26   : > { %p8483_p11 = pnand %p8482_p7, %p8476_p2 }
  0x28   : > { %8486 = shalt.err (!%p8483_p11)
}
  0x29   : > { %s8951_s18 = smov 128   ;;  %s8952_s29 = smov 8  }
  0x2a   : > { %s10579_s16 = sld [smem:[#allocation34_spill]]  ;;  %s8498_s0 = scalar_lea.vmem %s487_s27, 512 }
  0x2b   : > { %p8499_p9 = scmp.ne.s32.totalorder %s487_s27, %s8498_s0  ;;  %p8506_p5 = scmp.lt.s32.totalorder %s487_s27, %s487_s27 }
  0x2c   : > { %p8507_p8 = scmp.lt.s32.totalorder %s8498_s0, %s8498_s0 }
  0x2d   : > { %p8501_p0 = pnand %p8499_p9, %p8463_p13 }
  0x2e   : > { %p8508_p3 = por %p8507_p8, %p8506_p5 }
  0x2f   : > { %p8502_p1 = pneg %p8501_p0 }
  0x30   : > { %8081 = dma.hbm_to_vmem [thread:$0]  (!%p9126_p12), %s10579_s16, 512, %s474_s19, [#allocation4], %s8951_s18, %s8951_s18, %s8952_s29  }
  0x31   : > { %p8509_p2 = pnand %p8508_p3, %p8502_p1 }
  0x33   : > { %8512 = shalt.err (!%p8509_p2)
}
  0x34   : > { %s10580_s1 = sld [smem:[#allocation35_spill]]  ;;  %p7061_p6 = scmp.ge.s32.totalorder %s8947_s24, 6 }
  0x35   : > { %s500_s16 = sand.u32 (!%p7061_p6), 1, %s8947_s24   ;;  %s9151_s26 = sand.u32 (!%p7061_p6), 1, %s8943_s23  }
  0x36   : > { %496 = sbr.rel (%p7061_p6) target bundleno = 400 (0x190), region = 24  ;;  %s7062_s0 = sshll.u32 (!%p7061_p6), %s9151_s26, 7 }
  0x37   : > { %s7449_s19 = sshll.u32 (!%p7061_p6), %s8947_s24, 11  ;;  %s10581_s2 = sld [smem:[#allocation36_spill]] (!%p7061_p6) }
  0x38   : > { %s504_s22 = scalar_lea.vmem (!%p7061_p6), [#allocation8], %s7062_s0 }
  0x3a   : > { %8084 = dma.hbm_to_vmem [thread:$0]  (!%p9126_p12), %s10580_s1, 512, %s487_s27, [#allocation7], %s8951_s18, %s8951_s18, %s8952_s29  }
  0x3b   : > { %s511_s29 = sshll.u32 %s504_s22, 4  ;;  %s7065_s27 = sshll.u32 %s9151_s26, 1  ;;  %s9160_s29 = int_to_ptr.vmem [resolvable:$true] %s511_s29 }
  0x3c   : > { %s9163_s18 = scalar_lea.sflag [#allocation4], %s500_s16 }
  0x3d   : > { %s9158_s25 = scalar_lea.hbm %s10581_s2, %s7449_s19  ;;  %s8517_s19 = scalar_lea.hbm %s10581_s2, 12288 }
  0x3e   : > { %s8513_s28 = scalar_lea.hbm %s9158_s25, 2048  ;;  %p8518_p12 = scmp.lt.s32.totalorder %s9158_s25, %s10581_s2 }
  0x3f   : > { %p8514_p5 = scmp.ne.s32.totalorder %s9158_s25, %s8513_s28  ;;  %p8519_p13 = scmp.lt.s32.totalorder %s8517_s19, %s8513_s28 }
  0x41   : > { %p8515_p8 = pnand %p8514_p5, %p9104_p4  ;;  %p8520_p7 = por %p8519_p13, %p8518_p12 }
  0x43   : > { %p8516_p9 = pneg %p8515_p8 }
  0x45   : > { %p8521_p11 = pnand %p8520_p7, %p8516_p9 }
  0x47   : > { %8524 = shalt.err (!%p8521_p11)
}
  0x48   : > { %s8525_s16 = scalar_lea.vmem %s9160_s29, 2048  ;;  %s8953_s0 = smov [#allocation8]  }
  0x49   : > { %p8526_p0 = scmp.ne.s32.totalorder %s9160_s29, %s8525_s16  ;;  %s8529_s1 = sshll.u32 %s8953_s0, 4  ;;  %s8530_s1 = int_to_ptr.vmem [resolvable:$false] %s8529_s1 }
  0x4a   : > { %s8531_s23 = scalar_lea.vmem %s8530_s1, 4096  ;;  %p8532_p2 = scmp.lt.s32.totalorder %s9160_s29, %s8530_s1 }
  0x4b   : > { %p8527_p1 = pnand %p8526_p0, %p9104_p4  ;;  %p8533_p6 = scmp.lt.s32.totalorder %s8531_s23, %s8525_s16 }
  0x4d   : > { %p8528_p3 = pneg %p8527_p1  ;;  %p8534_p5 = por %p8533_p6, %p8532_p2 }
  0x4f   : > { %p8535_p8 = pnand %p8534_p5, %p8528_p3 }
  0x51   : > { %8538 = shalt.err (!%p8535_p8)
}
  0x52   : > { %s8954_s22 = smov 128   ;;  %s8955_s28 = smov 8  }
  0x53   : > { %8042 = dma.hbm_to_vmem [thread:$0]  (%p9104_p4), %s9158_s25, 2048, %s9160_s29, %s9163_s18, %s8954_s22, %s8954_s22, %s8955_s28  }
  0x54   : > { %s7450_s19 = sshll.u32 %s8947_s24, 5  ;;  %s10582_s3 = sld [smem:[#allocation37_spill]] }
  0x55   : > { %s525_s0 = scalar_lea.vmem [#allocation9], %s7065_s27  ;;  %s10551_s23 = sshll.u32 %s9151_s26, 6 }
  0x56   : > { %s533_s1 = sshll.u32 %s525_s0, 4  ;;  %s534_s1 = int_to_ptr.vmem [resolvable:$true] %s533_s1 }
  0x5a   : > { %s9190_s16 = scalar_lea.hbm %s10582_s3, %s7450_s19  ;;  %s8543_s22 = scalar_lea.hbm %s10582_s3, 192 }
  0x5b   : > { %s8539_s2 = scalar_lea.hbm %s9190_s16, 32  ;;  %p8544_p7 = scmp.lt.s32.totalorder %s9190_s16, %s10582_s3 }
  0x5c   : > { %p8540_p9 = scmp.ne.s32.totalorder %s9190_s16, %s8539_s2  ;;  %p8545_p11 = scmp.lt.s32.totalorder %s8543_s22, %s8539_s2 }
  0x5e   : > { %p8541_p12 = pnand %p8540_p9, %p9104_p4  ;;  %p8546_p0 = por %p8545_p11, %p8544_p7 }
  0x60   : > { %p8542_p13 = pneg %p8541_p12 }
  0x62   : > { %p8547_p1 = pnand %p8546_p0, %p8542_p13 }
  0x64   : > { %8550 = shalt.err (!%p8547_p1)
}
  0x65   : > { %s8551_s27 = scalar_lea.vmem %s534_s1, 32  ;;  %s8956_s21 = smov [#allocation9]  }
  0x66   : > { %p8552_p3 = scmp.ne.s32.totalorder %s534_s1, %s8551_s27  ;;  %s8555_s20 = sshll.u32 %s8956_s21, 4  ;;  %s8556_s20 = int_to_ptr.vmem [resolvable:$false] %s8555_s20 }
  0x67   : > { %s8557_s0 = scalar_lea.vmem %s8556_s20, 64  ;;  %p8558_p5 = scmp.lt.s32.totalorder %s534_s1, %s8556_s20 }
  0x68   : > { %p8553_p2 = pnand %p8552_p3, %p9104_p4  ;;  %p8559_p8 = scmp.lt.s32.totalorder %s8557_s0, %s8551_s27 }
  0x6a   : > { %p8554_p6 = pneg %p8553_p2  ;;  %p8560_p9 = por %p8559_p8, %p8558_p5 }
  0x6c   : > { %p8561_p12 = pnand %p8560_p9, %p8554_p6 }
  0x6e   : > { %8564 = shalt.err (!%p8561_p12)
}
  0x6f   : > { %8043 = dma.hbm_to_vmem [thread:$0]  (%p9104_p4), %s9190_s16, 32, %s534_s1, %s9163_s18  }
  0x70   : > { %s10552_s2 = sshll.u32 %s8947_s24, 10  ;;  %s10583_s4 = sld [smem:[#allocation38_spill]] }
  0x71   : > { %s544_s28 = scalar_lea.vmem [#allocation10], %s10551_s23 }
  0x72   : > { %s551_s19 = sshll.u32 %s544_s28, 4  ;;  %s9222_s19 = int_to_ptr.vmem [resolvable:$true] %s551_s19 }
  0x76   : > { %s9218_s22 = scalar_lea.hbm %s10583_s4, %s10552_s2  ;;  %s8569_s21 = scalar_lea.hbm %s10583_s4, 6144 }
  0x77   : > { %s8565_s27 = scalar_lea.hbm %s9218_s22, 1024  ;;  %p8570_p0 = scmp.lt.s32.totalorder %s9218_s22, %s10583_s4 }
  0x78   : > { %p8566_p13 = scmp.ne.s32.totalorder %s9218_s22, %s8565_s27  ;;  %p8571_p1 = scmp.lt.s32.totalorder %s8569_s21, %s8565_s27 }
  0x7a   : > { %p8567_p7 = pnand %p8566_p13, %p9104_p4  ;;  %p8572_p3 = por %p8571_p1, %p8570_p0 }
  0x7c   : > { %p8568_p11 = pneg %p8567_p7 }
  0x7e   : > { %p8573_p2 = pnand %p8572_p3, %p8568_p11 }
  0x80   : > { %8576 = shalt.err (!%p8573_p2)
}
  0x81   : > { %s8577_s25 = scalar_lea.vmem %s9222_s19, 1024  ;;  %s8957_s29 = smov [#allocation10]  }
  0x82   : > { %p8578_p6 = scmp.ne.s32.totalorder %s9222_s19, %s8577_s25  ;;  %s8581_s28 = sshll.u32 %s8957_s29, 4  ;;  %s8582_s28 = int_to_ptr.vmem [resolvable:$false] %s8581_s28 }
  0x83   : > { %s8583_s16 = scalar_lea.vmem %s8582_s28, 2048  ;;  %p8584_p9 = scmp.lt.s32.totalorder %s9222_s19, %s8582_s28 }
  0x84   : > { %p8579_p5 = pnand %p8578_p6, %p9104_p4  ;;  %p8585_p12 = scmp.lt.s32.totalorder %s8583_s16, %s8577_s25 }
  0x86   : > { %p8580_p8 = pneg %p8579_p5  ;;  %p8586_p13 = por %p8585_p12, %p8584_p9 }
  0x88   : > { %p8587_p7 = pnand %p8586_p13, %p8580_p8 }
  0x8a   : > { %8590 = shalt.err (!%p8587_p7)
}
  0x8b   : > { %s10553_s27 = smov 64   ;;  %s10555_s1 = smov 4  }
  0x8c   : > { %8044 = dma.hbm_to_vmem [thread:$0]  (%p9104_p4), %s9218_s22, 1024, %s9222_s19, %s9163_s18, %s10553_s27, %s10553_s27, %s10555_s1  }
  0x8d   : > { %s9249_s21 = sshll.u32 %s8947_s24, 4  ;;  %s564_s20 = scalar_lea.vmem [#allocation11], %s9151_s26 }
  0x8e   : > { %s571_s0 = sshll.u32 %s564_s20, 4  ;;  %s10584_s5 = sld [smem:[#allocation39_spill]]  ;;  %s572_s0 = int_to_ptr.vmem [resolvable:$true] %s571_s0 }
  0x94   : > { %s569_s28 = scalar_lea.hbm %s10584_s5, %s9249_s21  ;;  %s8595_s3 = scalar_lea.hbm %s10584_s5, 96 }
  0x95   : > { %s8591_s16 = scalar_lea.hbm %s569_s28, 16  ;;  %p8596_p3 = scmp.lt.s32.totalorder %s569_s28, %s10584_s5 }
  0x96   : > { %p8592_p11 = scmp.ne.s32.totalorder %s569_s28, %s8591_s16  ;;  %p8597_p2 = scmp.lt.s32.totalorder %s8595_s3, %s8591_s16 }
  0x98   : > { %p8593_p0 = pnand %p8592_p11, %p9104_p4  ;;  %p8598_p6 = por %p8597_p2, %p8596_p3 }
  0x9a   : > { %p8594_p1 = pneg %p8593_p0 }
  0x9c   : > { %p8599_p5 = pnand %p8598_p6, %p8594_p1 }
  0x9e   : > { %8602 = shalt.err (!%p8599_p5)
}
  0x9f   : > { %s8603_s20 = scalar_lea.vmem %s572_s0, 16  ;;  %s8960_s25 = smov [#allocation11]  }
  0xa0   : > { %p8604_p8 = scmp.ne.s32.totalorder %s572_s0, %s8603_s20  ;;  %s8607_s29 = sshll.u32 %s8960_s25, 4  ;;  %s8608_s29 = int_to_ptr.vmem [resolvable:$false] %s8607_s29 }
  0xa1   : > { %s8609_s27 = scalar_lea.vmem %s8608_s29, 32  ;;  %p8610_p13 = scmp.lt.s32.totalorder %s572_s0, %s8608_s29 }
  0xa2   : > { %p8605_p9 = pnand %p8604_p8, %p9104_p4  ;;  %p8611_p7 = scmp.lt.s32.totalorder %s8609_s27, %s8603_s20 }
  0xa4   : > { %p8606_p12 = pneg %p8605_p9  ;;  %p8612_p11 = por %p8611_p7, %p8610_p13 }
  0xa6   : > { %p8613_p0 = pnand %p8612_p11, %p8606_p12 }
  0xa8   : > { %8616 = shalt.err (!%p8613_p0)
}
  0xa9   : > { %8045 = dma.hbm_to_vmem [thread:$0]  (%p9104_p4), %s569_s28, 16, %s572_s0, %s9163_s18  }
  0xaa   : > { %s10585_s3 = sshll.u32 %s8947_s24, 10  ;;  %s10586_s6 = sld [smem:[#allocation40_spill]] }
  0xab   : > { %s10587_s22 = sshll.u32 %s9151_s26, 6  ;;  %s10588_s7 = sld [smem:[#allocation41_spill]] }
  0xac   : > { %s582_s27 = scalar_lea.vmem [#allocation12], %s10587_s22 }
  0xad   : > { %s589_s19 = sshll.u32 %s582_s27, 4  ;;  %s9278_s19 = int_to_ptr.vmem [resolvable:$true] %s589_s19 }
  0xb0   : > { %s9274_s16 = scalar_lea.hbm %s10586_s6, %s10585_s3  ;;  %s8621_s23 = scalar_lea.hbm %s10586_s6, 6144 }
  0xb1   : > { %s9284_s29 = scalar_lea.hbm %s10588_s7, %s9249_s21  ;;  %s8617_s0 = scalar_lea.hbm %s9274_s16, 1024 }
  0xb2   : > { %p8618_p1 = scmp.ne.s32.totalorder %s9274_s16, %s8617_s0  ;;  %p8622_p6 = scmp.lt.s32.totalorder %s9274_s16, %s10586_s6 }
  0xb3   : > { %p8623_p5 = scmp.lt.s32.totalorder %s8621_s23, %s8617_s0 }
  0xb4   : > { %p8619_p3 = pnand %p8618_p1, %p9104_p4 }
  0xb5   : > { %p8624_p8 = por %p8623_p5, %p8622_p6 }
  0xb6   : > { %p8620_p2 = pneg %p8619_p3 }
  0xb8   : > { %p8625_p9 = pnand %p8624_p8, %p8620_p2 }
  0xba   : > { %8628 = shalt.err (!%p8625_p9)
}
  0xbb   : > { %s8629_s22 = scalar_lea.vmem %s9278_s19, 1024  ;;  %s8961_s27 = smov [#allocation12]  }
  0xbc   : > { %p8630_p12 = scmp.ne.s32.totalorder %s9278_s19, %s8629_s22  ;;  %s8633_s20 = sshll.u32 %s8961_s27, 4  ;;  %s8634_s20 = int_to_ptr.vmem [resolvable:$false] %s8633_s20 }
  0xbd   : > { %s8635_s25 = scalar_lea.vmem %s8634_s20, 2048  ;;  %p8636_p11 = scmp.lt.s32.totalorder %s9278_s19, %s8634_s20 }
  0xbe   : > { %p8631_p13 = pnand %p8630_p12, %p9104_p4  ;;  %p8637_p0 = scmp.lt.s32.totalorder %s8635_s25, %s8629_s22 }
  0xc0   : > { %p8632_p7 = pneg %p8631_p13  ;;  %p8638_p1 = por %p8637_p0, %p8636_p11 }
  0xc2   : > { %p8639_p3 = pnand %p8638_p1, %p8632_p7 }
  0xc4   : > { %8642 = shalt.err (!%p8639_p3)
}
  0xc5   : > { %s10589_s1 = smov 4   ;;  %s10590_s0 = smov 64  }
  0xc6   : > { %8046 = dma.hbm_to_vmem [thread:$0]  (%p9104_p4), %s9274_s16, 1024, %s9278_s19, %s9163_s18, %s10590_s0, %s10590_s0, %s10589_s1  }
  0xc7   : > { %s602_s28 = scalar_lea.vmem [#allocation13], %s9151_s26  ;;  %s9315_s22 = scalar_lea.hbm %s10531_s8, %s9249_s21 }
  0xc8   : > { %s609_s3 = sshll.u32 %s602_s28, 4  ;;  %s8643_s27 = scalar_lea.hbm %s9284_s29, 16  ;;  %s610_s3 = int_to_ptr.vmem [resolvable:$true] %s609_s3 }
  0xc9   : > { %p8644_p2 = scmp.ne.s32.totalorder %s9284_s29, %s8643_s27  ;;  %s8647_s4 = scalar_lea.hbm %s10588_s7, 96 }
  0xca   : > { %p8648_p8 = scmp.lt.s32.totalorder %s9284_s29, %s10588_s7  ;;  %p8649_p9 = scmp.lt.s32.totalorder %s8647_s4, %s8643_s27 }
  0xcb   : > { %p8645_p6 = pnand %p8644_p2, %p9104_p4 }
  0xcc   : > { %p8650_p12 = por %p8649_p9, %p8648_p8 }
  0xcd   : > { %p8646_p5 = pneg %p8645_p6 }
  0xcf   : > { %p8651_p13 = pnand %p8650_p12, %p8646_p5 }
  0xd1   : > { %8654 = shalt.err (!%p8651_p13)
}
  0xd2   : > { %s8655_s16 = scalar_lea.vmem %s610_s3, 16  ;;  %s8962_s19 = smov [#allocation13]  }
  0xd3   : > { %p8656_p7 = scmp.ne.s32.totalorder %s610_s3, %s8655_s16  ;;  %s8659_s28 = sshll.u32 %s8962_s19, 4  ;;  %s8660_s28 = int_to_ptr.vmem [resolvable:$false] %s8659_s28 }
  0xd4   : > { %s8661_s23 = scalar_lea.vmem %s8660_s28, 32  ;;  %p8662_p1 = scmp.lt.s32.totalorder %s610_s3, %s8660_s28 }
  0xd5   : > { %p8657_p11 = pnand %p8656_p7, %p9104_p4  ;;  %p8663_p3 = scmp.lt.s32.totalorder %s8661_s23, %s8655_s16 }
  0xd7   : > { %p8658_p0 = pneg %p8657_p11  ;;  %p8664_p2 = por %p8663_p3, %p8662_p1 }
  0xd9   : > { %p8665_p6 = pnand %p8664_p2, %p8658_p0 }
  0xdb   : > { %8668 = shalt.err (!%p8665_p6)
}
  0xdc   : > { %8047 = dma.hbm_to_vmem [thread:$0]  (%p9104_p4), %s9284_s29, 16, %s610_s3, %s9163_s18  }
  0xdd   : > { %s619_s4 = scalar_lea.vmem [#allocation14], %s9151_s26  ;;  %s9339_s27 = scalar_lea.hbm %s10532_s9, %s9249_s21 }
  0xde   : > { %s626_s5 = sshll.u32 %s619_s4, 4  ;;  %s8669_s20 = scalar_lea.hbm %s9315_s22, 16  ;;  %s627_s5 = int_to_ptr.vmem [resolvable:$true] %s626_s5 }
  0xdf   : > { %p8670_p5 = scmp.ne.s32.totalorder %s9315_s22, %s8669_s20  ;;  %s8673_s19 = scalar_lea.hbm %s10531_s8, 96 }
  0xe0   : > { %p8674_p12 = scmp.lt.s32.totalorder %s9315_s22, %s10531_s8  ;;  %p8675_p13 = scmp.lt.s32.totalorder %s8673_s19, %s8669_s20 }
  0xe1   : > { %p8671_p8 = pnand %p8670_p5, %p9104_p4 }
  0xe2   : > { %p8676_p7 = por %p8675_p13, %p8674_p12 }
  0xe3   : > { %p8672_p9 = pneg %p8671_p8 }
  0xe5   : > { %p8677_p11 = pnand %p8676_p7, %p8672_p9 }
  0xe7   : > { %8680 = shalt.err (!%p8677_p11)
}
  0xe8   : > { %s8681_s29 = scalar_lea.vmem %s627_s5, 16  ;;  %s8963_s3 = smov [#allocation14]  }
  0xe9   : > { %p8682_p0 = scmp.ne.s32.totalorder %s627_s5, %s8681_s29  ;;  %s8685_s4 = sshll.u32 %s8963_s3, 4  ;;  %s8686_s4 = int_to_ptr.vmem [resolvable:$false] %s8685_s4 }
  0xea   : > { %s8687_s6 = scalar_lea.vmem %s8686_s4, 32  ;;  %p8688_p2 = scmp.lt.s32.totalorder %s627_s5, %s8686_s4 }
  0xeb   : > { %p8683_p1 = pnand %p8682_p0, %p9104_p4  ;;  %p8689_p6 = scmp.lt.s32.totalorder %s8687_s6, %s8681_s29 }
  0xed   : > { %p8684_p3 = pneg %p8683_p1  ;;  %p8690_p5 = por %p8689_p6, %p8688_p2 }
  0xef   : > { %p8691_p8 = pnand %p8690_p5, %p8684_p3 }
  0xf1   : > { %8694 = shalt.err (!%p8691_p8)
}
  0xf2   : > { %8048 = dma.hbm_to_vmem [thread:$0]  (%p9104_p4), %s9315_s22, 16, %s627_s5, %s9163_s18  }
  0xf3   : > { %s636_s2 = scalar_lea.vmem [#allocation15], %s9151_s26  ;;  %s10557_s25 = sshll.u32 %s9151_s26, 10 }
  0xf4   : > { %s643_s20 = sshll.u32 %s636_s2, 4  ;;  %s8695_s16 = scalar_lea.hbm %s9339_s27, 16  ;;  %s644_s20 = int_to_ptr.vmem [resolvable:$true] %s643_s20 }
  0xf5   : > { %p8696_p9 = scmp.ne.s32.totalorder %s9339_s27, %s8695_s16  ;;  %s8699_s23 = scalar_lea.hbm %s10532_s9, 96 }
  0xf6   : > { %p8700_p7 = scmp.lt.s32.totalorder %s9339_s27, %s10532_s9  ;;  %p8701_p11 = scmp.lt.s32.totalorder %s8699_s23, %s8695_s16 }
  0xf7   : > { %p8697_p12 = pnand %p8696_p9, %p9104_p4 }
  0xf8   : > { %p8702_p0 = por %p8701_p11, %p8700_p7 }
  0xf9   : > { %p8698_p13 = pneg %p8697_p12 }
  0xfb   : > { %p8703_p1 = pnand %p8702_p0, %p8698_p13 }
  0xfd   : > { %8706 = shalt.err (!%p8703_p1)
}
  0xfe   : > { %s8707_s22 = scalar_lea.vmem %s644_s20, 16  ;;  %s8964_s5 = smov [#allocation15]  }
  0xff   : > { %p8708_p3 = scmp.ne.s32.totalorder %s644_s20, %s8707_s22  ;;  %s8711_s4 = sshll.u32 %s8964_s5, 4  ;;  %s8712_s4 = int_to_ptr.vmem [resolvable:$false] %s8711_s4 }
 0x100   : > { %s8713_s6 = scalar_lea.vmem %s8712_s4, 32  ;;  %p8714_p5 = scmp.lt.s32.totalorder %s644_s20, %s8712_s4 }
 0x101   : > { %p8709_p2 = pnand %p8708_p3, %p9104_p4  ;;  %p8715_p8 = scmp.lt.s32.totalorder %s8713_s6, %s8707_s22 }
 0x103   : > { %p8710_p6 = pneg %p8709_p2  ;;  %p8716_p9 = por %p8715_p8, %p8714_p5 }
 0x105   : > { %p8717_p12 = pnand %p8716_p9, %p8710_p6 }
 0x107   : > { %8720 = shalt.err (!%p8717_p12)
}
 0x108   : > { %8049 = dma.hbm_to_vmem [thread:$0]  (%p9104_p4), %s9339_s27, 16, %s644_s20, %s9163_s18  }
 0x109   : > { %s10558_s2 = sshll.u32 %s8947_s24, 14  ;;  %s654_s16 = scalar_lea.vmem [#allocation16], %s10557_s25 }
 0x10a   : > { %s661_s19 = sshll.u32 %s654_s16, 4  ;;  %s9385_s29 = scalar_lea.hbm %s10533_s10, %s10558_s2  ;;  %s9387_s19 = int_to_ptr.vmem [resolvable:$true] %s661_s19 }
 0x10b   : > { %s7081_s3 = sshll.u32 %s9151_s26, 4  ;;  %s8721_s22 = scalar_lea.hbm %s9385_s29, 16384 }
 0x10c   : > { %p8722_p13 = scmp.ne.s32.totalorder %s9385_s29, %s8721_s22  ;;  %s8725_s5 = scalar_lea.hbm %s10533_s10, 98304 }
 0x10d   : > { %p8726_p0 = scmp.lt.s32.totalorder %s9385_s29, %s10533_s10  ;;  %p8727_p1 = scmp.lt.s32.totalorder %s8725_s5, %s8721_s22 }
 0x10e   : > { %p8723_p7 = pnand %p8722_p13, %p9104_p4 }
 0x10f   : > { %p8728_p3 = por %p8727_p1, %p8726_p0 }
 0x110   : > { %p8724_p11 = pneg %p8723_p7 }
 0x112   : > { %p8729_p2 = pnand %p8728_p3, %p8724_p11 }
 0x114   : > { %8732 = shalt.err (!%p8729_p2)
}
 0x115   : > { %s8733_s16 = scalar_lea.vmem %s9387_s19, 16384  ;;  %s8965_s28 = smov [#allocation16]  }
 0x116   : > { %p8734_p6 = scmp.ne.s32.totalorder %s9387_s19, %s8733_s16  ;;  %s8737_s23 = sshll.u32 %s8965_s28, 4  ;;  %s8738_s23 = int_to_ptr.vmem [resolvable:$false] %s8737_s23 }
 0x117   : > { %s8739_s27 = scalar_lea.vmem %s8738_s23, 32768  ;;  %p8740_p9 = scmp.lt.s32.totalorder %s9387_s19, %s8738_s23 }
 0x118   : > { %p8735_p5 = pnand %p8734_p6, %p9104_p4  ;;  %p8741_p12 = scmp.lt.s32.totalorder %s8739_s27, %s8733_s16 }
 0x11a   : > { %p8736_p8 = pneg %p8735_p5  ;;  %p8742_p13 = por %p8741_p12, %p8740_p9 }
 0x11c   : > { %p8743_p7 = pnand %p8742_p13, %p8736_p8 }
 0x11e   : > { %8746 = shalt.err (!%p8743_p7)
}
 0x11f   : > { %s8966_s22 = smov 1024   ;;  %s7454_s20 = sshll.u32 %s8947_s24, 8 }
 0x120   : > { %8050 = dma.hbm_to_vmem [thread:$0]  (%p9104_p4), %s9385_s29, 16384, %s9387_s19, %s9163_s18, %s8966_s22, %s8966_s22, %s10590_s0  }
 0x121   : > { %s681_s6 = scalar_lea.hbm %s10534_s11, %s7454_s20  ;;  %s675_s16 = scalar_lea.vmem [#allocation17], %s7081_s3 }
 0x122   : > { %s683_s28 = sshll.u32 %s675_s16, 4  ;;  %s8747_s23 = scalar_lea.hbm %s681_s6, 256  ;;  %s684_s28 = int_to_ptr.vmem [resolvable:$true] %s683_s28 }
 0x123   : > { %p8748_p11 = scmp.ne.s32.totalorder %s681_s6, %s8747_s23  ;;  %s8751_s2 = scalar_lea.hbm %s10534_s11, 1536 }
 0x124   : > { %p8752_p3 = scmp.lt.s32.totalorder %s681_s6, %s10534_s11  ;;  %p8753_p2 = scmp.lt.s32.totalorder %s8751_s2, %s8747_s23 }
 0x125   : > { %p8749_p0 = pnand %p8748_p11, %p9104_p4 }
 0x126   : > { %p8754_p6 = por %p8753_p2, %p8752_p3 }
 0x127   : > { %p8750_p1 = pneg %p8749_p0 }
 0x129   : > { %p8755_p5 = pnand %p8754_p6, %p8750_p1 }
 0x12b   : > { %8758 = shalt.err (!%p8755_p5)
}
 0x12c   : > { %s8759_s29 = scalar_lea.vmem %s684_s28, 256  ;;  %s8967_s3 = smov [#allocation17]  }
 0x12d   : > { %p8760_p8 = scmp.ne.s32.totalorder %s684_s28, %s8759_s29  ;;  %s8763_s22 = sshll.u32 %s8967_s3, 4  ;;  %s8764_s22 = int_to_ptr.vmem [resolvable:$false] %s8763_s22 }
 0x12e   : > { %s8765_s20 = scalar_lea.vmem %s8764_s22, 512  ;;  %p8766_p13 = scmp.lt.s32.totalorder %s684_s28, %s8764_s22 }
 0x12f   : > { %p8761_p9 = pnand %p8760_p8, %p9104_p4  ;;  %p8767_p7 = scmp.lt.s32.totalorder %s8765_s20, %s8759_s29 }
 0x131   : > { %p8762_p12 = pneg %p8761_p9  ;;  %p8768_p11 = por %p8767_p7, %p8766_p13 }
 0x133   : > { %p8769_p0 = pnand %p8768_p11, %p8762_p12 }
 0x135   : > { %8772 = shalt.err (!%p8769_p0)
}
 0x136   : > { %8051 = dma.hbm_to_vmem [thread:$0]  (%p9104_p4), %s681_s6, 256, %s684_s28, %s9163_s18  }
 0x137   : > { %s10591_s7 = sshll.u32 %s8947_s24, 14  ;;  %s10592_s4 = sshll.u32 %s9151_s26, 10 }
 0x138   : > { %s9436_s5 = scalar_lea.hbm %s10535_s12, %s10591_s7  ;;  %s694_s16 = scalar_lea.vmem [#allocation18], %s10592_s4 }
 0x139   : > { %s701_s23 = sshll.u32 %s694_s16, 4  ;;  %s8773_s27 = scalar_lea.hbm %s9436_s5, 16384  ;;  %s702_s23 = int_to_ptr.vmem [resolvable:$true] %s701_s23 }
 0x13a   : > { %p8774_p1 = scmp.ne.s32.totalorder %s9436_s5, %s8773_s27  ;;  %s8777_s24 = scalar_lea.hbm %s10535_s12, 98304 }
 0x13b   : > { %p8778_p6 = scmp.lt.s32.totalorder %s9436_s5, %s10535_s12  ;;  %p8779_p5 = scmp.lt.s32.totalorder %s8777_s24, %s8773_s27 }
 0x13c   : > { %p8775_p3 = pnand %p8774_p1, %p9104_p4 }
 0x13d   : > { %p8780_p8 = por %p8779_p5, %p8778_p6 }
 0x13e   : > { %p8776_p2 = pneg %p8775_p3 }
 0x140   : > { %p8781_p9 = pnand %p8780_p8, %p8776_p2 }
 0x142   : > { %8784 = shalt.err (!%p8781_p9)
}
 0x143   : > { %s8785_s3 = scalar_lea.vmem %s702_s23, 16384  ;;  %s8968_s22 = smov [#allocation18]  }
 0x144   : > { %p8786_p12 = scmp.ne.s32.totalorder %s702_s23, %s8785_s3  ;;  %s8789_s20 = sshll.u32 %s8968_s22, 4  ;;  %s8790_s20 = int_to_ptr.vmem [resolvable:$false] %s8789_s20 }
 0x145   : > { %s8791_s7 = scalar_lea.vmem %s8790_s20, 32768  ;;  %p8792_p11 = scmp.lt.s32.totalorder %s702_s23, %s8790_s20 }
 0x146   : > { %p8787_p13 = pnand %p8786_p12, %p9104_p4  ;;  %p8793_p0 = scmp.lt.s32.totalorder %s8791_s7, %s8785_s3 }
 0x148   : > { %p8788_p7 = pneg %p8787_p13  ;;  %p8794_p1 = por %p8793_p0, %p8792_p11 }
 0x14a   : > { %p8795_p3 = pnand %p8794_p1, %p8788_p7 }
 0x14c   : > { %8798 = shalt.err (!%p8795_p3)
}
 0x14d   : > { %8052 = dma.hbm_to_vmem [thread:$0]  (%p9104_p4), %s9436_s5, 16384, %s702_s23, %s9163_s18, %s10590_s0, %s10590_s0, %s10589_s1  }
 0x14e   : > { %s719_s4 = scalar_lea.hbm %s10536_s13, %s9249_s21  ;;  %s714_s16 = scalar_lea.vmem [#allocation19], %s9151_s26 }
 0x14f   : > { %s721_s27 = sshll.u32 %s714_s16, 4  ;;  %s8799_s19 = scalar_lea.hbm %s719_s4, 16  ;;  %s722_s27 = int_to_ptr.vmem [resolvable:$true] %s721_s27 }
 0x150   : > { %p8800_p2 = scmp.ne.s32.totalorder %s719_s4, %s8799_s19  ;;  %s8803_s28 = scalar_lea.hbm %s10536_s13, 96 }
 0x151   : > { %p8804_p8 = scmp.lt.s32.totalorder %s719_s4, %s10536_s13  ;;  %p8805_p9 = scmp.lt.s32.totalorder %s8803_s28, %s8799_s19 }
 0x152   : > { %p8801_p6 = pnand %p8800_p2, %p9104_p4 }
 0x153   : > { %p8806_p12 = por %p8805_p9, %p8804_p8 }
 0x154   : > { %p8802_p5 = pneg %p8801_p6 }
 0x156   : > { %p8807_p13 = pnand %p8806_p12, %p8802_p5 }
 0x158   : > { %8810 = shalt.err (!%p8807_p13)
}
 0x159   : > { %s8811_s1 = scalar_lea.vmem %s722_s27, 16  ;;  %s8969_s0 = smov [#allocation19]  }
 0x15a   : > { %p8812_p7 = scmp.ne.s32.totalorder %s722_s27, %s8811_s1  ;;  %s8815_s5 = sshll.u32 %s8969_s0, 4  ;;  %s8816_s5 = int_to_ptr.vmem [resolvable:$false] %s8815_s5 }
 0x15b   : > { %s8817_s23 = scalar_lea.vmem %s8816_s5, 32  ;;  %p8818_p1 = scmp.lt.s32.totalorder %s722_s27, %s8816_s5 }
 0x15c   : > { %p8813_p11 = pnand %p8812_p7, %p9104_p4  ;;  %p8819_p3 = scmp.lt.s32.totalorder %s8817_s23, %s8811_s1 }
 0x15e   : > { %p8814_p0 = pneg %p8813_p11  ;;  %p8820_p2 = por %p8819_p3, %p8818_p1 }
 0x160   : > { %p8821_p6 = pnand %p8820_p2, %p8814_p0 }
 0x162   : > { %8824 = shalt.err (!%p8821_p6)
}
 0x163   : > { %8053 = dma.hbm_to_vmem [thread:$0]  (%p9104_p4), %s719_s4, 16, %s722_s27, %s9163_s18  }
 0x164   : > { %s736_s7 = scalar_lea.hbm %s10537_s14, %s9249_s21  ;;  %s731_s25 = scalar_lea.vmem [#allocation20], %s9151_s26 }
 0x165   : > { %s738_s2 = sshll.u32 %s731_s25, 4  ;;  %s8825_s16 = scalar_lea.hbm %s736_s7, 16  ;;  %s739_s2 = int_to_ptr.vmem [resolvable:$true] %s738_s2 }
 0x166   : > { %p8826_p5 = scmp.ne.s32.totalorder %s736_s7, %s8825_s16  ;;  %s8829_s24 = scalar_lea.hbm %s10537_s14, 96 }
 0x167   : > { %p8830_p12 = scmp.lt.s32.totalorder %s736_s7, %s10537_s14  ;;  %p8831_p13 = scmp.lt.s32.totalorder %s8829_s24, %s8825_s16 }
 0x168   : > { %p8827_p8 = pnand %p8826_p5, %p9104_p4 }
 0x169   : > { %p8832_p7 = por %p8831_p13, %p8830_p12 }
 0x16a   : > { %p8828_p9 = pneg %p8827_p8 }
 0x16c   : > { %p8833_p11 = pnand %p8832_p7, %p8828_p9 }
 0x16e   : > { %8836 = shalt.err (!%p8833_p11)
}
 0x16f   : > { %s8837_s4 = scalar_lea.vmem %s739_s2, 16  ;;  %s8970_s27 = smov [#allocation20]  }
 0x170   : > { %p8838_p0 = scmp.ne.s32.totalorder %s739_s2, %s8837_s4  ;;  %s8841_s3 = sshll.u32 %s8970_s27, 4  ;;  %s8842_s3 = int_to_ptr.vmem [resolvable:$false] %s8841_s3 }
 0x171   : > { %s8843_s1 = scalar_lea.vmem %s8842_s3, 32  ;;  %p8844_p2 = scmp.lt.s32.totalorder %s739_s2, %s8842_s3 }
 0x172   : > { %p8839_p1 = pnand %p8838_p0, %p9104_p4  ;;  %p8845_p6 = scmp.lt.s32.totalorder %s8843_s1, %s8837_s4 }
 0x174   : > { %p8840_p3 = pneg %p8839_p1  ;;  %p8846_p5 = por %p8845_p6, %p8844_p2 }
 0x176   : > { %p8847_p8 = pnand %p8846_p5, %p8840_p3 }
 0x178   : > { %8850 = shalt.err (!%p8847_p8)
}
 0x179   : > { %8054 = dma.hbm_to_vmem [thread:$0]  (%p9104_p4), %s736_s7, 16, %s739_s2, %s9163_s18  }
 0x17a   : > { %s753_s23 = scalar_lea.hbm %s10538_s15, %s9249_s21  ;;  %s748_s22 = scalar_lea.vmem [#allocation21], %s9151_s26 }
 0x17b   : > { %s755_s20 = sshll.u32 %s748_s22, 4  ;;  %s8851_s25 = scalar_lea.hbm %s753_s23, 16  ;;  %s756_s20 = int_to_ptr.vmem [resolvable:$true] %s755_s20 }
 0x17c   : > { %p8852_p9 = scmp.ne.s32.totalorder %s753_s23, %s8851_s25  ;;  %s8855_s6 = scalar_lea.hbm %s10538_s15, 96 }
 0x17d   : > { %p8856_p7 = scmp.lt.s32.totalorder %s753_s23, %s10538_s15  ;;  %p8857_p11 = scmp.lt.s32.totalorder %s8855_s6, %s8851_s25 }
 0x17e   : > { %p8853_p12 = pnand %p8852_p9, %p9104_p4 }
 0x17f   : > { %p8858_p0 = por %p8857_p11, %p8856_p7 }
 0x180   : > { %p8854_p13 = pneg %p8853_p12 }
 0x182   : > { %p8859_p1 = pnand %p8858_p0, %p8854_p13 }
 0x184   : > { %8862 = shalt.err (!%p8859_p1)
}
 0x185   : > { %s8863_s26 = scalar_lea.vmem %s756_s20, 16  ;;  %s8971_s21 = smov [#allocation21]  }
 0x186   : > { %p8864_p3 = scmp.ne.s32.totalorder %s756_s20, %s8863_s26  ;;  %s8867_s7 = sshll.u32 %s8971_s21, 4  ;;  %s8868_s7 = int_to_ptr.vmem [resolvable:$false] %s8867_s7 }
 0x187   : > { %s8869_s2 = scalar_lea.vmem %s8868_s7, 32  ;;  %p8870_p5 = scmp.lt.s32.totalorder %s756_s20, %s8868_s7 }
 0x188   : > { %p8865_p2 = pnand %p8864_p3, %p9104_p4  ;;  %p8871_p8 = scmp.lt.s32.totalorder %s8869_s2, %s8863_s26 }
 0x18a   : > { %p8866_p6 = pneg %p8865_p2  ;;  %p8872_p9 = por %p8871_p8, %p8870_p5 }
 0x18c   : > { %p8873_p12 = pnand %p8872_p9, %p8866_p6 }
 0x18e   : > { %8876 = shalt.err (!%p8873_p12)
}
 0x18f   : > { %8055 = dma.hbm_to_vmem [thread:$0]  (%p9104_p4), %s753_s23, 16, %s756_s20, %s9163_s18  }
 0x190 PF: > { %764 = sbr.rel (%p9118_p10) target bundleno = 7653 (0x1de5), region = 84 }
 0x195   : > { %s10593_s29 = sld [smem:[#allocation29_spill]] }
 0x19b   : > { %p10594_p13 = scmp.eq.s32.totalorder %s10593_s29, 0 }
 0x19d   : > { %8918 = dma.done.wait (%p10594_p13), [#allocation4], 512   ;;  %p10595_p7 = pmov %p10594_p13 }
 0x19f   : > { %8920 = vsyncadd (%p10595_p7), [#allocation4], 4294966784  ;;  %p10596_p11 = pmov %p10595_p7 }
 0x1a0   : > { %p10597_p0 = pmov %p10595_p7 }
 0x1a1   : > { %8922 = dma.done.wait (%p10596_p11), [#allocation7], 512  }
 0x1a2   : > { %8924 = vsyncadd (%p10597_p0), [#allocation7], 4294966784  ;;  %s10598_s30 = sld [smem:[#allocation27_spill]]  ;;  %s774_s18 = sand.u32 1, %s10593_s29  }
 0x1a3   : > { %s10599_s4 = sld [smem:[#allocation32_spill]]  ;;  %s775_s3 = scalar_lea.sflag [#allocation4], %s774_s18 }
 0x1a8   : > { %s9526_s27 = sand.u32 1, %s10598_s30  }
 0x1a9   : > { %s7093_s17 = sshll.u32 %s9526_s27, 7  ;;  %p10600_p4 = scmp.ne.s32.totalorder %s10599_s4, 0 }
 0x1aa   : > { %s9529_s1 = scalar_lea.vmem [#allocation8], %s7093_s17 }
 0x1ab   : > { %8926 = dma.done.wait (%p10600_p4), %s775_s3, 37264  }
 0x1ac   : > { %8928 = vsyncadd (%p10600_p4), %s775_s3, 4294930032  ;;  %s7094_s0 = sshll.u32 %s9526_s27, 1  ;;  %s7095_s5 = sshll.u32 %s9526_s27, 6 }
 0x1ad   : > { %s7097_s23 = sshll.u32 %s9526_s27, 10  ;;  %s7098_s22 = sshll.u32 %s9526_s27, 4 }
 0x1ae   : > { %s9539_s20 = scalar_lea.vmem [#allocation9], %s7094_s0  ;;  %s9541_s25 = scalar_lea.vmem [#allocation10], %s7095_s5 }
 0x1af   : > { %s804_s16 = scalar_lea.vmem [#allocation11], %s9526_s27  ;;  %s9544_s19 = scalar_lea.vmem [#allocation12], %s7095_s5 }
 0x1b0   : > { %s821_s6 = scalar_lea.vmem [#allocation13], %s9526_s27  ;;  %s829_s24 = scalar_lea.vmem [#allocation14], %s9526_s27 }
 0x1b1   : > { %s837_s28 = scalar_lea.vmem [#allocation15], %s9526_s27  ;;  %s9549_s26 = scalar_lea.vmem [#allocation16], %s7097_s23 }
 0x1b2   : > { %s9551_s21 = scalar_lea.vmem [#allocation17], %s7098_s22  ;;  %s9553_s7 = scalar_lea.vmem [#allocation18], %s7097_s23 }
 0x1b3   : > { %s872_s2 = scalar_lea.vmem [#allocation19], %s9526_s27  ;;  %s880_s30 = scalar_lea.vmem [#allocation20], %s9526_s27 }
 0x1b4   : > { %s888_s4 = scalar_lea.vmem [#allocation21], %s9526_s27  ;;  %p10601_p10 = scmp.ne.s32.totalorder %s10593_s29, 0 }
 0x1b6   : > { %994 = sbr.rel (%p10601_p10) target bundleno = 446 (0x1be), region = 152 }
 0x1bb   : > { %v995_v0 = vld [vmem:[#allocation3] sm:$0xff]  ;;  %v996_v1 = vld [vmem:[#allocation3 + $0x8] sm:$0xff]  ;;  %v997_v2 = vld [vmem:[#allocation3 + $0x10] sm:$0xff] }
 0x1bc   : > { %999 = vst [vmem:[#allocation2 + $0x10] sm:$0xff] %v995_v0  ;;  %1000 = vst [vmem:[#allocation2] sm:$0xff] %v996_v1  ;;  %v998_v3 = vld [vmem:[#allocation3 + $0x18] sm:$0xff] }
 0x1bd   : > { %1001 = vst [vmem:[#allocation2 + $0x18] sm:$0xff] %v997_v2  ;;  %1002 = vst [vmem:[#allocation2 + $0x8] sm:$0xff] %v998_v3 }
 0x1be PF: > { %v8145_v4 = vld [vmem:[%s9529_s1 + $0x74] ss:$8 sps:$4 sm:$0xff]   ;;  %v8147_v5 = vld [vmem:[%s9529_s1 + $0x70] ss:$8 sps:$4 sm:$0xff]   ;;  %v8972_v6 = vmov 0   ;;  %v8172_v21 = vld [vmem:[%s9541_s25 + $0x20] sm:$0xff]   ;;  %v1035_v46 = vlaneseq }
 0x1bf   : > { %1157 = vmatprep.mubr.bf16.mxu0 %v8972_v6  ;;  %1125 = vmatprep.subr.bf16.mxu0 %v8145_v4  ;;  %v8148_v7 = vld [vmem:[%s9529_s1 + $0x64] ss:$8 sps:$4 sm:$0xff]   ;;  %v8150_v8 = vld [vmem:[%s9529_s1 + $0x60] ss:$8 sps:$4 sm:$0xff]   ;;  %v8151_v9 = vld [vmem:[%s9529_s1 + $0x54] ss:$8 sps:$4 sm:$0xff]  }
 0x1c0   : > { %1126 = vmatpush1.bf16.msra.mxu0 %v8147_v5  ;;  %v8153_v10 = vld [vmem:[%s9529_s1 + $0x50] ss:$8 sps:$4 sm:$0xff]   ;;  %v8154_v11 = vld [vmem:[%s9529_s1 + $0x44] ss:$8 sps:$4 sm:$0xff]   ;;  %v8156_v12 = vld [vmem:[%s9529_s1 + $0x40] ss:$8 sps:$4 sm:$0xff]  }
 0x1c1   : > { %1127 = vmatprep.subr.bf16.mxu0 %v8148_v7  ;;  %v8157_v13 = vld [vmem:[%s9529_s1 + $0x34] ss:$8 sps:$4 sm:$0xff]   ;;  %v8159_v14 = vld [vmem:[%s9529_s1 + $0x30] ss:$8 sps:$4 sm:$0xff]   ;;  %v8160_v17 = vld [vmem:[%s9529_s1 + $0x24] ss:$8 sps:$4 sm:$0xff]  }
 0x1c2   : > { %v8169_v15 = vld [vmem:[%s9541_s25 + $0x38] sm:$0xff]   ;;  %v8170_v16 = vld [vmem:[%s9541_s25 + $0x30] sm:$0xff]   ;;  %v8171_v18 = vld [vmem:[%s9541_s25 + $0x28] sm:$0xff]   ;;  %v8973_v45 = vmov 0.0   ;;  %vm8974_vm0 = vmmov 0   ;;  %v9592_v47 = vshrl.u32 %v1035_v46, 7 }
 0x1c3   : > { %7778 = vmatprep.subr.bf16.mxu1 %v8169_v15  ;;  %v8162_v19 = vld [vmem:[%s9529_s1 + $0x20] ss:$8 sps:$4 sm:$0xff]   ;;  %v8163_v20 = vld [vmem:[%s9529_s1 + $0x14] ss:$8 sps:$4 sm:$0xff]   ;;  %v8165_v22 = vld [vmem:[%s9529_s1 + $0x10] ss:$8 sps:$4 sm:$0xff]  }
 0x1c4   : > { %1128 = vmatpush1.bf16.msra.mxu0 %v8150_v8  ;;  %7779 = vmatpush3.bf16.msra.mxu1 %v8169_v15  ;;  %v1003_v23 = vld [vmem:[#allocation2 + $0x10] sm:$0xff]  ;;  %v1004_v24 = vld [vmem:[#allocation2] sm:$0xff]  ;;  %v1008_v26 = vld [vmem:[#allocation6 + $0x8] sm:$0xff]  ;;  %v9595_v48 = vsub.s32 1, %v9592_v47  ;;  %v9600_v55 = vsub.s32 0, %v9592_v47  ;;  %vm1322_vm1 = vcmask 130048  }
 0x1c5   : > { %1129 = vmatprep.subr.bf16.mxu0 %v8151_v9  ;;  %7780 = vmatprep.subr.bf16.mxu1 %v8170_v16  ;;  %v1007_v25 = vld [vmem:[#allocation6] sm:$0xff]  ;;  %v1012_v31 = vadd.f32 %v1008_v26, %v1004_v24  ;;  %v8174_v32 = vld [vmem:[%s9541_s25 + $0x10] sm:$0xff]   ;;  %v1006_v34 = vld [vmem:[#allocation2 + $0x8] sm:$0xff]  ;;  %v1178_v43 = vpack.c.bf16 %v1004_v24, %v1003_v23  ;;  %s8975_s29 = smov 112   ;;  %s8976_s18 = smov 96  }
 0x1c6   : > { %v8166_v27 = vld [vmem:[%s9529_s1 + $0x4] ss:$8 sps:$4 sm:$0xff]   ;;  %v8173_v28 = vld [vmem:[%s9541_s25 + $0x18] sm:$0xff]   ;;  %v1011_v30 = vadd.f32 %v1007_v25, %v1003_v23  ;;  %v1009_v35 = vld [vmem:[#allocation6 + $0x10] sm:$0xff]  ;;  %s8977_s17 = smov 80   ;;  %s8978_s3 = smov 64  }
 0x1c7   : > { %v8168_v29 = vld [vmem:[%s9529_s1] ss:$8 sps:$4 sm:$0xff]   ;;  %v1005_v33 = vld [vmem:[#allocation2 + $0x18] sm:$0xff]  ;;  %v8175_v38 = vld [vmem:[%s9541_s25 + $0x8] sm:$0xff]   ;;  %7794 = vmatprep.mubr.bf16.mxu1 %v1178_v43  ;;  %s8979_s1 = smov 48   ;;  %s8980_s0 = smov 32  }
 0x1c8   : > { %1130 = vmatpush1.bf16.msra.mxu0 %v8153_v10  ;;  %7781 = vmatpush3.bf16.msra.mxu1 %v8170_v16  ;;  %v1010_v36 = vld [vmem:[#allocation6 + $0x18] sm:$0xff]  ;;  %v1015_v37 = vpack.c.bf16 %v1012_v31, %v1011_v30  ;;  %v1013_v39 = vadd.f32 %v1009_v35, %v1005_v33  ;;  %v8176_v42 = vld [vmem:[%s9541_s25] sm:$0xff]   ;;  %v1179_v44 = vpack.c.bf16 %v1006_v34, %v1005_v33  ;;  %v1033_v50 = vld [vmem:[%s9539_s20] sm:$0x3]  ;;  %s8981_s5 = smov 16   ;;  %s10604_s27 = sld [smem:[#allocation29_spill]] }
 0x1c9   : > { %1131 = vmatprep.subr.bf16.mxu0 %v8154_v11  ;;  %7782 = vmatprep.subr.bf16.mxu1 %v8171_v18  ;;  %v1014_v40 = vadd.f32 %v1010_v36, %v1006_v34  ;;  %v1042_v52 = vrot.slane %v1033_v50, %v9595_v48  ;;  %v1038_v61 = vrot.slane %v1033_v50, %v9600_v55 }
 0x1cb   : > { %v1016_v41 = vpack.c.bf16 %v1014_v40, %v1013_v39 }
 0x1cc   : > { %1132 = vmatpush1.bf16.msra.mxu0 %v8156_v12  ;;  %7783 = vmatpush3.bf16.msra.mxu1 %v8171_v18 }
 0x1cd   : > { %1133 = vmatprep.subr.bf16.mxu0 %v8157_v13  ;;  %7784 = vmatprep.subr.bf16.mxu1 %v8172_v21  ;;  %v7117_v13 = vld [vmem:[%s804_s16] ss:$0 sm:$0xff] }
 0x1ce   : > { %p7444_p1 = scmp.ne.s32.totalorder %s10604_s27, 5 }
 0x1d0   : > { %1134 = vmatpush1.bf16.msra.mxu0 %v8159_v14  ;;  %7785 = vmatpush3.bf16.msra.mxu1 %v8172_v21 }
 0x1d1   : > { %1135 = vmatprep.subr.bf16.mxu0 %v8160_v17  ;;  %7786 = vmatprep.subr.bf16.mxu1 %v8173_v28 }
 0x1d4   : > { %1136 = vmatpush1.bf16.msra.mxu0 %v8162_v19  ;;  %7787 = vmatpush3.bf16.msra.mxu1 %v8173_v28 }
 0x1d5   : > { %1137 = vmatprep.subr.bf16.mxu0 %v8163_v20  ;;  %7788 = vmatprep.subr.bf16.mxu1 %v8174_v32 }
 0x1d8   : > { %1138 = vmatpush1.bf16.msra.mxu0 %v8165_v22  ;;  %7789 = vmatpush3.bf16.msra.mxu1 %v8174_v32 }
 0x1d9   : > { %1139 = vmatprep.subr.bf16.mxu0 %v8166_v27  ;;  %7790 = vmatprep.subr.bf16.mxu1 %v8175_v38 }
 0x1dc   : > { %1140 = vmatpush1.bf16.msra.mxu0 %v8168_v29  ;;  %7791 = vmatpush3.bf16.msra.mxu1 %v8175_v38 }
 0x1dd   : > { %7792 = vmatprep.subr.bf16.mxu1 %v8176_v42  ;;  %7804 = vmatprep.subr.bf16.mxu0 %v8973_v45 }
 0x1df   : > { %1158 = vmatmul.mubr.bf16.vlgmr.msra.gmra.mxu0 %v1015_v37 }
 0x1e0   : > { %1167 = vmatprep.mubr.bf16.mxu0 %v8972_v6  ;;  %7793 = vmatpush3.bf16.msra.mxu1 %v8176_v42 }
 0x1e1   : > { %7798 = vmatprep.subr.bf16.mxu1 %v8973_v45 }
 0x1e3   : > { %7795 = vmatmul.mubr.bf16.vlgmr.msra.gmra.mxu1 %v1179_v44 }
 0x1e4   : > { %7800 = vmatprep.mubr.msk.bf16.mxu1 %vm8974_vm0, %v8973_v45 }
 0x1e7   : > { %1168 = vmatmul.mubr.bf16.gmra.mxu0 %v1016_v41 }
 0x1e8   : > { %7806 = vmatprep.mubr.msk.bf16.mxu0 %vm8974_vm0, %v8973_v45 }
 0x29f   : > { %v1159_v49 = vpop.f32.mrf.mxu0 }
 0x2a0   : > { %v1160_v3 = vadd.f32 %v1159_v49, %v1038_v61 }
 0x2a1   : > { %v1161_v51 = vpop.f32.mrf.mxu0 }
 0x2a2   : > { %v1162_v56 = vadd.f32 %v1161_v51, %v1042_v52 }
 0x2a3   : > { %v1163_v53 = vpop.f32.mrf.mxu0  ;;  %v7796_v12 = vpop.f32.mrf.mxu1 }
 0x2a4   : > { %v1164_v0 = vadd.f32 %v1163_v53, %v1038_v61  ;;  %v1294_v15 = vadd.f32 %v7796_v12, %v7117_v13 }
 0x2a5   : > { %v1165_v54 = vpop.f32.mrf.mxu0  ;;  %v1285_v14 = vpop.f32.mrf.mxu1 }
 0x2a6   : > { %v1166_v57 = vadd.f32 %v1165_v54, %v1042_v52  ;;  %v9608_v5 = vpack.c.bf16 %v1164_v0, %v1160_v3  ;;  %v1286_v17 = vadd.f32 %v7117_v13, %v1285_v14 }
 0x2a7   : > { %v1169_v58 = vpop.f32.mrf.mxu0  ;;  %v7797_v16 = vpop.f32.mrf.mxu1 }
 0x2a8   : > { %v9602_v59 = vpack.c.bf16 %v1166_v57, %v1162_v56  ;;  %v1170_v8 = vadd.f32 %v1169_v58, %v1038_v61  ;;  %v1297_v18 = vadd.f32 %v7797_v16, %v7117_v13 }
 0x2a9   : > { %v1171_v60 = vpop.f32.mrf.mxu0  ;;  %v1288_v19 = vpop.f32.mrf.mxu1 }
 0x2aa   : > { %v1327_v62 = vsel %vm1322_vm1, %v9602_v59, 0  ;;  %v1172_v1 = vadd.f32 %v1171_v60, %v1042_v52  ;;  %v9627_v20 = vpack.c.bf16 %v1297_v18, %v1294_v15  ;;  %v1289_v21 = vadd.f32 %v7117_v13, %v1288_v19 }
 0x2ab   : > { %v1173_v63 = vpop.f32.mrf.mxu0  ;;  %7799 = vmatpush3.bf16.xpose.msra.mxu1 %v1327_v62 }
 0x2ac   : > { %7810 = vmatprep.subr.bf16.mxu1 %v8973_v45  ;;  %v1174_v9 = vadd.f32 %v1173_v63, %v1038_v61  ;;  %v9629_v22 = vpack.c.bf16 %v1289_v21, %v1286_v17 }
 0x2ad   : > { %v1175_v2 = vpop.f32.mrf.mxu0 }
 0x2ae   : > { %v1176_v4 = vadd.f32 %v1175_v2, %v1042_v52  ;;  %v9619_v11 = vpack.c.bf16 %v1174_v9, %v1170_v8 }
 0x2b0   : > { %v9610_v7 = vpack.c.bf16 %v1176_v4, %v1172_v1 }
 0x2b2   : > { %7801 = vmatmul.mubr.msk.bf16.vlgmr.msra.gmra.mxu1 %vm1322_vm1, %v9608_v5  ;;  %v1374_v10 = vsel %vm1322_vm1, %v9610_v7, 0 }
 0x2b3   : > { %7805 = vmatpush3.bf16.xpose.msra.mxu0 %v1374_v10  ;;  %7812 = vmatprep.mubr.msk.bf16.mxu1 %vm8974_vm0, %v8973_v45 }
 0x2b4   : > { %7816 = vmatprep.subr.bf16.mxu0 %v8973_v45  ;;  %7811 = vmatpush3.bf16.msra.mxu1 %v9629_v22 }
 0x2b5   : > { %7822 = vmatprep.subr.bf16.mxu1 %v8973_v45 }
 0x2ba   : > { %7807 = vmatmul.mubr.msk.bf16.vlgmr.msra.gmra.mxu0 %vm1322_vm1, %v9619_v11 }
 0x2bb   : > { %7818 = vmatprep.mubr.msk.bf16.mxu0 %vm8974_vm0, %v8973_v45  ;;  %7817 = vmatpush3.bf16.msra.mxu0 %v9627_v20 }
 0x2bc   : > { %7828 = vmatprep.subr.bf16.mxu0 %v8973_v45 }
 0x372   : > { %v1363_v23 = vpop.f32.mrf.mxu1 }
 0x373   : > { %v1417_v24 = vsel %vm1322_vm1, %v1363_v23, -inf }
 0x374   : > { %1418 = vmax.xlane.f32.xlu0 %v1417_v24  ;;  %v7802_v25 = vpop.f32.mrf.mxu1 }
 0x376   : > { %v1366_v26 = vpop.f32.mrf.mxu1 }
 0x377   : > { %v1420_v27 = vsel %vm1322_vm1, %v1366_v26, -inf }
 0x378   : > { %1421 = vmax.xlane.f32.xlu0 %v1420_v27  ;;  %v7803_v28 = vpop.f32.mrf.mxu1 }
 0x37a   : > { %v1410_v29 = vpop.f32.mrf.mxu0 }
 0x37b   : > { %v1423_v30 = vsel %vm1322_vm1, %v1410_v29, -inf }
 0x37c   : > { %1424 = vmax.xlane.f32.xlu1 %v1423_v30  ;;  %v7808_v31 = vpop.f32.mrf.mxu0 }
 0x37e   : > { %v1413_v32 = vpop.f32.mrf.mxu0 }
 0x37f   : > { %v1426_v33 = vsel %vm1322_vm1, %v1413_v32, -inf }
 0x380   : > { %1427 = vmax.xlane.f32.xlu1 %v1426_v33  ;;  %v7809_v34 = vpop.f32.mrf.mxu0 }
 0x3fd   : > { %v1419_v35 = vpop.xlane.xlu0 %1418 }
 0x3fe   : > { %v1429_v36 = vsub.f32 %v1363_v23, %v1419_v35 }
 0x400   : > { %v1433_v37 = vmul.f32 1.442695, %v1429_v36 }
 0x401   : > { %v1422_v38 = vpop.xlane.xlu0 %1421 }
 0x402   : > { %8313 = vpow2.f32 %v1433_v37  ;;  %v1430_v39 = vsub.f32 %v1366_v26, %v1422_v38 }
 0x404   : > { %v1435_v40 = vmul.f32 1.442695, %v1430_v39 }
 0x405   : > { %v1425_v41 = vpop.xlane.xlu1 %1424 }
 0x406   : > { %8315 = vpow2.f32 %v1435_v40  ;;  %v1431_v42 = vsub.f32 %v1410_v29, %v1425_v41 }
 0x408   : > { %v1437_v43 = vmul.f32 1.442695, %v1431_v42 }
 0x409   : > { %v1428_v53 = vpop.xlane.xlu1 %1427 }
 0x40a   : > { %8317 = vpow2.f32 %v1437_v43  ;;  %v1432_v54 = vsub.f32 %v1413_v32, %v1428_v53 }
 0x40c   : > { %v1439_v56 = vmul.f32 1.442695, %v1432_v54 }
 0x40e   : > { %8319 = vpow2.f32 %v1439_v56 }
 0x40f   : > { %v8314_v44 = vpop.eup %8313 }
 0x410   : > { %v1441_v46 = vsel %vm1322_vm1, %v8314_v44, 0.0 }
 0x411   : > { %1442 = vadd.xlane.f32.xlu0 %v1441_v46 }
 0x413   : > { %v8316_v49 = vpop.eup %8315 }
 0x414   : > { %v1444_v50 = vsel %vm1322_vm1, %v8316_v49, 0.0 }
 0x415   : > { %1445 = vadd.xlane.f32.xlu1 %v1444_v50 }
 0x417   : > { %v8318_v51 = vpop.eup %8317 }
 0x418   : > { %v1447_v52 = vsel %vm1322_vm1, %v8318_v51, 0.0 }
 0x419   : > { %1448 = vadd.xlane.f32.xlu0 %v1447_v52 }
 0x41b   : > { %v8320_v57 = vpop.eup %8319 }
 0x41c   : > { %v1450_v58 = vsel %vm1322_vm1, %v8320_v57, 0.0 }
 0x426   : > { %1610 = vrot.lane.b32.xlu1 %v9610_v7, %s8975_s29 }
 0x42f   : > { %1557 = vrot.lane.b32.xlu0 %v9602_v59, %s8975_s29 }
 0x44a   : > { %1451 = vadd.xlane.f32.xlu1 %v1450_v58 }
 0x45b   : > { %1554 = vrot.lane.b32.xlu1 %v9608_v5, %s8975_s29 }
 0x45f   : > { %1607 = vrot.lane.b32.xlu1 %v9619_v11, %s8975_s29 }
 0x49a   : > { %v1443_v60 = vpop.xlane.xlu0 %1442 }
 0x49b   : > { %8321 = vrcp.f32 %v1443_v60 }
 0x49e   : > { %v1446_v61 = vpop.xlane.xlu1 %1445 }
 0x49f   : > { %8323 = vrcp.f32 %v1446_v61 }
 0x4a2   : > { %v1449_v62 = vpop.xlane.xlu0 %1448  ;;  %v1611_v9 = vpop.permute.xlu1 %1610 }
 0x4a3   : > { %8325 = vrcp.f32 %v1449_v62  ;;  %v1616_v18 = vsel %vm1322_vm1, %v1611_v9, 0 }
 0x4a6   : > { %v1558_v3 = vpop.permute.xlu0 %1557 }
 0x4a7   : > { %v1563_v8 = vsel %vm1322_vm1, %v1558_v3, 0 }
 0x4a8   : > { %v8322_v63 = vpop.eup %8321 }
 0x4a9   : > { %v1457_v1 = vmul.f32 %v8322_v63, %v8314_v44 }
 0x4ac   : > { %v8324_v0 = vpop.eup %8323 }
 0x4ad   : > { %v1458_v2 = vmul.f32 %v8324_v0, %v8316_v49 }
 0x4af   : > { %v1461_v4 = vpack.c.bf16 %v1458_v2, %v1457_v1 }
 0x4b0   : > { %v8326_v13 = vpop.eup %8325 }
 0x4b1   : > { %7813 = vmatmul.mubr.msk.bf16.vlgmr.msra.gmra.mxu1 %vm1322_vm1, %v1461_v4  ;;  %v1459_v15 = vmul.f32 %v8326_v13, %v8318_v51 }
 0x4b2   : > { %7823 = vmatpush3.bf16.xpose.msra.mxu1 %v1563_v8  ;;  %7824 = vmatprep.mubr.msk.bf16.mxu1 %vm8974_vm0, %v8973_v45 }
 0x4b3   : > { %7834 = vmatprep.subr.bf16.mxu1 %v8973_v45 }
 0x4d3   : > { %v1452_v10 = vpop.xlane.xlu1 %1451 }
 0x4d4   : > { %8327 = vrcp.f32 %v1452_v10 }
 0x4d7   : > { %v1555_v12 = vpop.permute.xlu1 %1554 }
 0x4d8   : > { %7825 = vmatmul.mubr.msk.bf16.vlgmr.msra.gmra.mxu1 %vm1322_vm1, %v1555_v12 }
 0x4d9   : > { %7836 = vmatprep.mubr.msk.bf16.mxu1 %vm8974_vm0, %v8973_v45 }
 0x4db   : > { %v1608_v19 = vpop.permute.xlu1 %1607 }
 0x4e1   : > { %v8328_v14 = vpop.eup %8327 }
 0x4e2   : > { %v1460_v16 = vmul.f32 %v8328_v14, %v8320_v57 }
 0x4e4   : > { %v1462_v17 = vpack.c.bf16 %v1460_v16, %v1459_v15 }
 0x4e6   : > { %7819 = vmatmul.mubr.msk.bf16.vlgmr.msra.gmra.mxu0 %vm1322_vm1, %v1462_v17 }
 0x4e7   : > { %7829 = vmatpush3.bf16.xpose.msra.mxu0 %v1616_v18  ;;  %7830 = vmatprep.mubr.msk.bf16.mxu0 %vm8974_vm0, %v8973_v45 }
 0x4e8   : > { %7840 = vmatprep.subr.bf16.mxu0 %v8973_v45 }
 0x4ee   : > { %7831 = vmatmul.mubr.msk.bf16.vlgmr.msra.gmra.mxu0 %vm1322_vm1, %v1608_v19  ;;  %v8177_v19 = vld [vmem:[%s9544_s19] sm:$0xff]  }
 0x4ef   : > { %7842 = vmatprep.mubr.msk.bf16.mxu0 %vm8974_vm0, %v8973_v45 }
 0x571   : > { %v9667_v21 = vpop.f32.mrf.mxu1 }
 0x573   : > { %v7814_v23 = vpop.f32.mrf.mxu1 }
 0x575   : > { %v9669_v24 = vpop.f32.mrf.mxu1 }
 0x576   : > { %v1551_v25 = vpack.c.bf16 %v9669_v24, %v9667_v21  ;;  %v8178_v24 = vld [vmem:[%s9544_s19 + $0x8] sm:$0xff]  }
 0x577   : > { %v7815_v26 = vpop.f32.mrf.mxu1 }
 0x598   : > { %v1599_v27 = vpop.f32.mrf.mxu1 }
 0x599   : > { %v1659_v28 = vsel %vm1322_vm1, %v1599_v27, -inf }
 0x59a   : > { %1660 = vmax.xlane.f32.xlu0 %v1659_v28  ;;  %v7826_v29 = vpop.f32.mrf.mxu1 }
 0x59c   : > { %v1602_v30 = vpop.f32.mrf.mxu1 }
 0x59d   : > { %v1662_v31 = vsel %vm1322_vm1, %v1602_v30, -inf }
 0x59e   : > { %1663 = vmax.xlane.f32.xlu1 %v1662_v31  ;;  %v7827_v32 = vpop.f32.mrf.mxu1 }
 0x5a6   : > { %v9675_v33 = vpop.f32.mrf.mxu0 }
 0x5a8   : > { %v7820_v34 = vpop.f32.mrf.mxu0 }
 0x5aa   : > { %v9677_v35 = vpop.f32.mrf.mxu0 }
 0x5ab   : > { %v1552_v36 = vpack.c.bf16 %v9677_v35, %v9675_v33 }
 0x5ac   : > { %v7821_v37 = vpop.f32.mrf.mxu0 }
 0x5ae   : > { %v1652_v38 = vpop.f32.mrf.mxu0 }
 0x5af   : > { %v1665_v39 = vsel %vm1322_vm1, %v1652_v38, -inf }
 0x5b0   : > { %v7832_v40 = vpop.f32.mrf.mxu0  ;;  %1666 = vmax.xlane.f32.xlu0 %v1665_v39 }
 0x5b2   : > { %v1655_v41 = vpop.f32.mrf.mxu0 }
 0x5b3   : > { %v1668_v42 = vsel %vm1322_vm1, %v1655_v41, -inf }
 0x5b4   : > { %v7833_v43 = vpop.f32.mrf.mxu0  ;;  %1669 = vmax.xlane.f32.xlu0 %v1668_v42 }
 0x623   : > { %v1661_v44 = vpop.xlane.xlu0 %1660 }
 0x624   : > { %v1671_v46 = vsub.f32 %v1599_v27, %v1661_v44 }
 0x626   : > { %v1675_v49 = vmul.f32 1.442695, %v1671_v46 }
 0x627   : > { %v1664_v50 = vpop.xlane.xlu1 %1663 }
 0x628   : > { %8329 = vpow2.f32 %v1675_v49  ;;  %v1672_v51 = vsub.f32 %v1602_v30, %v1664_v50 }
 0x62a   : > { %v1677_v52 = vmul.f32 1.442695, %v1672_v51 }
 0x62c   : > { %8331 = vpow2.f32 %v1677_v52 }
 0x635   : > { %v8330_v53 = vpop.eup %8329 }
 0x636   : > { %v1683_v54 = vsel %vm1322_vm1, %v8330_v53, 0.0 }
 0x637   : > { %1684 = vadd.xlane.f32.xlu0 %v1683_v54 }
 0x639   : > { %v8332_v56 = vpop.eup %8331  ;;  %v1667_v57 = vpop.xlane.xlu0 %1666 }
 0x63a   : > { %v1673_v58 = vsub.f32 %v1652_v38, %v1667_v57  ;;  %v1686_v60 = vsel %vm1322_vm1, %v8332_v56, 0.0 }
 0x63b   : > { %1687 = vadd.xlane.f32.xlu1 %v1686_v60 }
 0x63c   : > { %v1679_v61 = vmul.f32 1.442695, %v1673_v58 }
 0x63d   : > { %v1670_v62 = vpop.xlane.xlu0 %1669 }
 0x63e   : > { %8333 = vpow2.f32 %v1679_v61  ;;  %v1674_v63 = vsub.f32 %v1655_v41, %v1670_v62 }
 0x640   : > { %v1681_v0 = vmul.f32 1.442695, %v1674_v63 }
 0x642   : > { %8335 = vpow2.f32 %v1681_v0 }
 0x64b   : > { %v8334_v1 = vpop.eup %8333 }
 0x64c   : > { %v1689_v2 = vsel %vm1322_vm1, %v8334_v1, 0.0 }
 0x64d   : > { %1690 = vadd.xlane.f32.xlu0 %v1689_v2 }
 0x64f   : > { %v8336_v3 = vpop.eup %8335 }
 0x650   : > { %v1692_v4 = vsel %vm1322_vm1, %v8336_v3, 0.0 }
 0x651   : > { %1693 = vadd.xlane.f32.xlu1 %v1692_v4 }
 0x662   : > { %1754 = vrot.lane.b32.xlu1 %v9627_v20, %s8975_s29 }
 0x663   : > { %1706 = vrot.lane.b32.xlu0 %v9629_v22, %s8975_s29 }
 0x666   : > { %1927 = vrot.lane.b32.xlu1 %v9602_v59, %s8976_s18 }
 0x667   : > { %1925 = vrot.lane.b32.xlu0 %v9608_v5, %s8976_s18 }
 0x66a   : > { %1978 = vrot.lane.b32.xlu1 %v9610_v7, %s8976_s18 }
 0x66e   : > { %1976 = vrot.lane.b32.xlu1 %v9619_v11, %s8976_s18 }
 0x6c0   : > { %v1685_v9 = vpop.xlane.xlu0 %1684 }
 0x6c4   : > { %v1688_v8 = vpop.xlane.xlu1 %1687 }
 0x6c5   : > { %8337 = vrcp.f32 %v1688_v8 }
 0x6c6   : > { %8339 = vrcp.f32 %v1685_v9 }
 0x6d2   : > { %v8338_v10 = vpop.eup %8337 }
 0x6d3   : > { %v8340_v13 = vpop.eup %8339  ;;  %v1700_v14 = vmul.f32 %v8338_v10, %v8332_v56 }
 0x6d4   : > { %v1699_v17 = vmul.f32 %v8340_v13, %v8330_v53 }
 0x6d6   : > { %v1691_v12 = vpop.xlane.xlu0 %1690  ;;  %v1703_v18 = vpack.c.bf16 %v1700_v14, %v1699_v17 }
 0x6d7   : > { %8341 = vrcp.f32 %v1691_v12 }
 0x6da   : > { %v1707_v15 = vpop.permute.xlu0 %1706  ;;  %v1694_v16 = vpop.xlane.xlu1 %1693 }
 0x6db   : > { %8343 = vrcp.f32 %v1694_v16  ;;  %7835 = vmatpush3.bf16.msra.mxu1 %v1707_v15 }
 0x6dc   : > { %7846 = vmatprep.subr.bf16.mxu1 %v8178_v24 }
 0x6de   : > { %7837 = vmatmul.mubr.msk.bf16.vlgmr.msra.gmra.mxu1 %vm1322_vm1, %v1703_v18  ;;  %v1755_v23 = vpop.permute.xlu1 %1754  ;;  %v1926_v50 = vpop.permute.xlu0 %1925 }
 0x6df   : > { %7841 = vmatpush3.bf16.msra.mxu0 %v1755_v23  ;;  %7847 = vmatpush3.bf16.msra.mxu1 %v8178_v24 }
 0x6e0   : > { %7852 = vmatprep.subr.bf16.mxu0 %v8177_v19  ;;  %7858 = vmatprep.subr.bf16.mxu1 %v8973_v45 }
 0x6e2   : > { %v1928_v31 = vpop.permute.xlu1 %1927 }
 0x6e3   : > { %v1933_v43 = vsel %vm1322_vm1, %v1928_v31, 0 }
 0x6e4   : > { %v8342_v26 = vpop.eup %8341 }
 0x6e5   : > { %v1701_v28 = vmul.f32 %v8342_v26, %v8334_v1 }
 0x6e6   : > { %v1979_v32 = vpop.permute.xlu1 %1978 }
 0x6e7   : > { %v1984_v34 = vsel %vm1322_vm1, %v1979_v32, 0 }
 0x6e8   : > { %v8344_v27 = vpop.eup %8343 }
 0x6e9   : > { %v1702_v29 = vmul.f32 %v8344_v27, %v8336_v3 }
 0x6ea   : > { %v1977_v21 = vpop.permute.xlu1 %1976 }
 0x6eb   : > { %v1704_v30 = vpack.c.bf16 %v1702_v29, %v1701_v28 }
 0x6ed   : > { %7843 = vmatmul.mubr.msk.bf16.vlgmr.msra.gmra.mxu0 %vm1322_vm1, %v1704_v30 }
 0x6ee   : > { %7854 = vmatprep.mubr.msk.bf16.mxu0 %vm1322_vm1, %v1551_v25  ;;  %7853 = vmatpush3.bf16.msra.mxu0 %v8177_v19 }
 0x6ef   : > { %7864 = vmatprep.subr.bf16.mxu0 %v8973_v45 }
 0x6f5   : > { %7855 = vmatmul.mubr.msk.bf16.vlgmr.msra.gmra.mxu0 %vm1322_vm1, %v1552_v36 }
 0x6f6   : > { %7865 = vmatpush3.bf16.xpose.msra.mxu0 %v1984_v34  ;;  %7866 = vmatprep.mubr.msk.bf16.mxu0 %vm8974_vm0, %v8973_v45 }
 0x6f7   : > { %7876 = vmatprep.subr.bf16.mxu0 %v8973_v45 }
 0x6fd   : > { %7867 = vmatmul.mubr.msk.bf16.vlgmr.msra.gmra.mxu0 %vm1322_vm1, %v1977_v21 }
 0x6fe   : > { %7878 = vmatprep.mubr.msk.bf16.mxu0 %vm8974_vm0, %v8973_v45 }
 0x79e   : > { %v1746_v25 = vpop.f32.mrf.mxu1 }
 0x7a0   : > { %v7838_v33 = vpop.f32.mrf.mxu1 }
 0x7a2   : > { %v1749_v35 = vpop.f32.mrf.mxu1 }
 0x7a3   : > { %v1801_v36 = vpack.c.bf16 %v1749_v35, %v1746_v25 }
 0x7a4   : > { %v7839_v37 = vpop.f32.mrf.mxu1 }
 0x7a5   : > { %7848 = vmatprep.mubr.msk.bf16.mxu1 %vm1322_vm1, %v1801_v36 }
 0x7ad   : > { %v1794_v38 = vpop.f32.mrf.mxu0 }
 0x7af   : > { %v7844_v39 = vpop.f32.mrf.mxu0 }
 0x7b1   : > { %v1797_v40 = vpop.f32.mrf.mxu0 }
 0x7b2   : > { %v1802_v41 = vpack.c.bf16 %v1797_v40, %v1794_v38 }
 0x7b3   : > { %v7845_v42 = vpop.f32.mrf.mxu0 }
 0x7b4   : > { %7849 = vmatmul.mubr.msk.bf16.vlgmr.msra.gmra.mxu1 %vm1322_vm1, %v1802_v41 }
 0x7b5   : > { %7859 = vmatpush3.bf16.xpose.msra.mxu1 %v1933_v43  ;;  %v9723_v44 = vpop.f32.mrf.mxu0  ;;  %7860 = vmatprep.mubr.msk.bf16.mxu1 %vm8974_vm0, %v8973_v45 }
 0x7b6   : > { %7870 = vmatprep.subr.bf16.mxu1 %v8973_v45 }
 0x7b7   : > { %v9728_v46 = vpop.f32.mrf.mxu0 }
 0x7b9   : > { %v9730_v49 = vpop.f32.mrf.mxu0 }
 0x7bb   : > { %v9732_v51 = vpop.f32.mrf.mxu0 }
 0x7bc   : > { %7861 = vmatmul.mubr.msk.bf16.vlgmr.msra.gmra.mxu1 %vm1322_vm1, %v1926_v50 }
 0x7bd   : > { %v2020_v52 = vpop.f32.mrf.mxu0  ;;  %7872 = vmatprep.mubr.msk.bf16.mxu1 %vm8974_vm0, %v8973_v45 }
 0x7be   : > { %v2033_v2 = vsel %vm1322_vm1, %v2020_v52, -inf }
 0x7bf   : > { %v7868_v53 = vpop.f32.mrf.mxu0 }
 0x7c1   : > { %v2023_v54 = vpop.f32.mrf.mxu0 }
 0x7c2   : > { %v2036_v8 = vsel %vm1322_vm1, %v2023_v54, -inf }
 0x7c3   : > { %v7869_v56 = vpop.f32.mrf.mxu0 }
 0x874   : > { %v9737_v57 = vpop.f32.mrf.mxu1 }
 0x876   : > { %v9739_v58 = vpop.f32.mrf.mxu1 }
 0x878   : > { %v9741_v60 = vpop.f32.mrf.mxu1 }
 0x87a   : > { %v9743_v61 = vpop.f32.mrf.mxu1 }
 0x87c   : > { %v1969_v62 = vpop.f32.mrf.mxu1 }
 0x87d   : > { %v2027_v63 = vsel %vm1322_vm1, %v1969_v62, -inf }
 0x87e   : > { %2028 = vmax.xlane.f32.xlu0 %v2027_v63  ;;  %v7862_v0 = vpop.f32.mrf.mxu1 }
 0x87f   : > { %v8179_v0 = vld [vmem:[%s9544_s19 + $0x10] sm:$0xff]  }
 0x880   : > { %v1972_v1 = vpop.f32.mrf.mxu1 }
 0x881   : > { %v2030_v3 = vsel %vm1322_vm1, %v1972_v1, -inf }
 0x882   : > { %2034 = vmax.xlane.f32.xlu0 %v2033_v2  ;;  %2031 = vmax.xlane.f32.xlu1 %v2030_v3  ;;  %v7863_v4 = vpop.f32.mrf.mxu1 }
 0x886   : > { %2037 = vmax.xlane.f32.xlu0 %v2036_v8 }
 0x907   : > { %v2029_v9 = vpop.xlane.xlu0 %2028 }
 0x908   : > { %v2039_v10 = vsub.f32 %v1969_v62, %v2029_v9 }
 0x90a   : > { %v2043_v15 = vmul.f32 1.442695, %v2039_v10 }
 0x90b   : > { %v2035_v12 = vpop.xlane.xlu0 %2034  ;;  %v2032_v13 = vpop.xlane.xlu1 %2031 }
 0x90c   : > { %v2041_v14 = vsub.f32 %v2020_v52, %v2035_v12  ;;  %v2040_v17 = vsub.f32 %v1972_v1, %v2032_v13 }
 0x90e   : > { %v2047_v16 = vmul.f32 1.442695, %v2041_v14  ;;  %v2045_v23 = vmul.f32 1.442695, %v2040_v17 }
 0x90f   : > { %v2038_v18 = vpop.xlane.xlu0 %2037 }
 0x910   : > { %8345 = vpow2.f32 %v2047_v16  ;;  %v2042_v19 = vsub.f32 %v2023_v54, %v2038_v18 }
 0x911   : > { %8347 = vpow2.f32 %v2043_v15 }
 0x912   : > { %v2049_v26 = vmul.f32 1.442695, %v2042_v19 }
 0x914   : > { %8349 = vpow2.f32 %v2049_v26 }
 0x915   : > { %8351 = vpow2.f32 %v2045_v23 }
 0x91d   : > { %v8346_v27 = vpop.eup %8345 }
 0x91e   : > { %v2057_v28 = vsel %vm1322_vm1, %v8346_v27, 0.0  ;;  %v8348_v29 = vpop.eup %8347 }
 0x91f   : > { %2058 = vadd.xlane.f32.xlu0 %v2057_v28  ;;  %v2051_v31 = vsel %vm1322_vm1, %v8348_v29, 0.0 }
 0x921   : > { %v8350_v30 = vpop.eup %8349 }
 0x922   : > { %v2060_v32 = vsel %vm1322_vm1, %v8350_v30, 0.0  ;;  %v8352_v34 = vpop.eup %8351 }
 0x923   : > { %2052 = vadd.xlane.f32.xlu0 %v2051_v31  ;;  %2061 = vadd.xlane.f32.xlu1 %v2060_v32  ;;  %v2054_v21 = vsel %vm1322_vm1, %v8352_v34, 0.0 }
 0x927   : > { %2055 = vadd.xlane.f32.xlu1 %v2054_v21 }
 0x938   : > { %2120 = vrot.lane.b32.xlu1 %v9627_v20, %s8976_s18 }
 0x939   : > { %2073 = vrot.lane.b32.xlu0 %v9629_v22, %s8976_s18 }
 0x93c   : > { %2236 = vrot.lane.b32.xlu1 %v9602_v59, %s8977_s17 }
 0x93d   : > { %2234 = vrot.lane.b32.xlu0 %v9608_v5, %s8977_s17 }
 0x940   : > { %2287 = vrot.lane.b32.xlu1 %v9610_v7, %s8977_s17 }
 0x944   : > { %2285 = vrot.lane.b32.xlu1 %v9619_v11, %s8977_s17 }
 0x9a8   : > { %v2059_v24 = vpop.xlane.xlu0 %2058 }
 0x9a9   : > { %8353 = vrcp.f32 %v2059_v24 }
 0x9ac   : > { %v2053_v25 = vpop.xlane.xlu0 %2052  ;;  %v2062_v33 = vpop.xlane.xlu1 %2061 }
 0x9ad   : > { %8355 = vrcp.f32 %v2062_v33  ;;  %v1919_v33 = vadd.f32 %v9723_v44, %v9737_v57 }
 0x9ae   : > { %8357 = vrcp.f32 %v2053_v25 }
 0x9b0   : > { %v2074_v35 = vpop.permute.xlu0 %2073  ;;  %v2056_v36 = vpop.xlane.xlu1 %2055 }
 0x9b1   : > { %8359 = vrcp.f32 %v2056_v36  ;;  %7871 = vmatpush3.bf16.msra.mxu1 %v2074_v35  ;;  %v1911_v36 = vadd.f32 %v9728_v46, %v9739_v58 }
 0x9b2   : > { %7882 = vmatprep.subr.bf16.mxu1 %v8179_v0 }
 0x9b4   : > { %v2121_v37 = vpop.permute.xlu1 %2120  ;;  %v2235_v63 = vpop.permute.xlu0 %2234 }
 0x9b5   : > { %7877 = vmatpush3.bf16.msra.mxu0 %v2121_v37 }
 0x9b6   : > { %7888 = vmatprep.subr.bf16.mxu0 %v8973_v45  ;;  %v8354_v38 = vpop.eup %8353 }
 0x9b7   : > { %v2069_v41 = vmul.f32 %v8354_v38, %v8346_v27 }
 0x9b8   : > { %v2237_v43 = vpop.permute.xlu1 %2236 }
 0x9b9   : > { %v2242_v56 = vsel %vm1322_vm1, %v2237_v43, 0 }
 0x9ba   : > { %v8356_v39 = vpop.eup %8355 }
 0x9bb   : > { %v8358_v40 = vpop.eup %8357  ;;  %v2070_v42 = vmul.f32 %v8356_v39, %v8350_v30  ;;  %v1922_v39 = vadd.f32 %v9730_v49, %v9741_v60 }
 0x9bc   : > { %v2067_v53 = vmul.f32 %v8358_v40, %v8348_v29  ;;  %v2288_v12 = vpop.permute.xlu1 %2287 }
 0x9bd   : > { %v2072_v52 = vpack.c.bf16 %v2070_v42, %v2069_v41  ;;  %v2293_v19 = vsel %vm1322_vm1, %v2288_v12, 0 }
 0x9be   : > { %v8360_v50 = vpop.eup %8359 }
 0x9bf   : > { %v2068_v54 = vmul.f32 %v8360_v50, %v8352_v34  ;;  %7879 = vmatmul.mubr.msk.bf16.vlgmr.msra.gmra.mxu0 %vm1322_vm1, %v2072_v52 }
 0x9c0   : > { %7889 = vmatpush3.bf16.xpose.msra.mxu0 %v2242_v56  ;;  %7890 = vmatprep.mubr.msk.bf16.mxu0 %vm8974_vm0, %v8973_v45  ;;  %v2286_v28 = vpop.permute.xlu1 %2285 }
 0x9c1   : > { %v2071_v62 = vpack.c.bf16 %v2068_v54, %v2067_v53  ;;  %7900 = vmatprep.subr.bf16.mxu0 %v8973_v45 }
 0x9c3   : > { %7873 = vmatmul.mubr.msk.bf16.vlgmr.msra.gmra.mxu1 %vm1322_vm1, %v2071_v62 }
 0x9c4   : > { %7883 = vmatpush3.bf16.msra.mxu1 %v8179_v0 }
 0x9c5   : > { %7894 = vmatprep.subr.bf16.mxu1 %v8973_v45 }
 0x9c7   : > { %7891 = vmatmul.mubr.msk.bf16.vlgmr.msra.gmra.mxu0 %vm1322_vm1, %v2235_v63 }
 0x9c8   : > { %7902 = vmatprep.mubr.msk.bf16.mxu0 %vm8974_vm0, %v8973_v45 }
 0xa7f   : > { %v2160_v1 = vpop.f32.mrf.mxu0 }
 0xa81   : > { %v7880_v2 = vpop.f32.mrf.mxu0 }
 0xa83   : > { %v2113_v3 = vpop.f32.mrf.mxu1  ;;  %v2163_v4 = vpop.f32.mrf.mxu0 }
 0xa84   : > { %v2168_v15 = vpack.c.bf16 %v2163_v4, %v2160_v1 }
 0xa85   : > { %v7874_v8 = vpop.f32.mrf.mxu1  ;;  %v7881_v9 = vpop.f32.mrf.mxu0 }
 0xa87   : > { %v2116_v10 = vpop.f32.mrf.mxu1  ;;  %v2278_v14 = vpop.f32.mrf.mxu0 }
 0xa88   : > { %v2167_v13 = vpack.c.bf16 %v2116_v10, %v2113_v3  ;;  %v2336_v16 = vsel %vm1322_vm1, %v2278_v14, -inf }
 0xa89   : > { %v7875_v17 = vpop.f32.mrf.mxu1  ;;  %2337 = vmax.xlane.f32.xlu0 %v2336_v16  ;;  %v7892_v18 = vpop.f32.mrf.mxu0 }
 0xa8a   : > { %7884 = vmatprep.mubr.msk.bf16.mxu1 %vm1322_vm1, %v2167_v13 }
 0xa8b   : > { %7885 = vmatmul.mubr.msk.bf16.vlgmr.msra.gmra.mxu1 %vm1322_vm1, %v2168_v15  ;;  %v2281_v23 = vpop.f32.mrf.mxu0 }
 0xa8c   : > { %7895 = vmatpush3.bf16.xpose.msra.mxu1 %v2293_v19  ;;  %7896 = vmatprep.mubr.msk.bf16.mxu1 %vm8974_vm0, %v8973_v45  ;;  %v2339_v26 = vsel %vm1322_vm1, %v2281_v23, -inf }
 0xa8d   : > { %7906 = vmatprep.subr.bf16.mxu1 %v8973_v45  ;;  %2340 = vmax.xlane.f32.xlu1 %v2339_v26  ;;  %v7893_v27 = vpop.f32.mrf.mxu0 }
 0xa93   : > { %7897 = vmatmul.mubr.msk.bf16.vlgmr.msra.gmra.mxu1 %vm1322_vm1, %v2286_v28 }
 0xa94   : > { %7908 = vmatprep.mubr.msk.bf16.mxu1 %vm8974_vm0, %v8973_v45 }
 0xb12   : > { %v2338_v21 = vpop.xlane.xlu0 %2337 }
 0xb13   : > { %v2348_v24 = vsub.f32 %v2278_v14, %v2338_v21 }
 0xb15   : > { %v2352_v25 = vmul.f32 1.442695, %v2348_v24 }
 0xb16   : > { %v2341_v29 = vpop.xlane.xlu1 %2340 }
 0xb17   : > { %v2349_v30 = vsub.f32 %v2281_v23, %v2341_v29 }
 0xb19   : > { %v2354_v31 = vmul.f32 1.442695, %v2349_v30 }
 0xb1b   : > { %8361 = vpow2.f32 %v2354_v31 }
 0xb1c   : > { %8363 = vpow2.f32 %v2352_v25 }
 0xb28   : > { %v8362_v32 = vpop.eup %8361 }
 0xb29   : > { %v2363_v34 = vsel %vm1322_vm1, %v8362_v32, 0.0  ;;  %v8364_v52 = vpop.eup %8363 }
 0xb2a   : > { %2364 = vadd.xlane.f32.xlu1 %v2363_v34  ;;  %v2360_v49 = vsel %vm1322_vm1, %v8364_v52, 0.0  ;;  %v8180_v34 = vld [vmem:[%s9544_s19 + $0x18] sm:$0xff]  }
 0xb4b   : > { %v7886_v35 = vpop.f32.mrf.mxu1 }
 0xb4c   : > { %v9793_v37 = vadd.f32 %v7886_v35, %v1919_v33 }
 0xb4d   : > { %v2215_v38 = vpop.f32.mrf.mxu1 }
 0xb4e   : > { %v9797_v40 = vadd.f32 %v2215_v38, %v1911_v36 }
 0xb4f   : > { %v7887_v41 = vpop.f32.mrf.mxu1 }
 0xb50   : > { %v9799_v42 = vadd.f32 %v7887_v41, %v1922_v39 }
 0xb51   : > { %v9801_v43 = vpop.f32.mrf.mxu1 }
 0xb53   : > { %v2329_v50 = vpop.f32.mrf.mxu1 }
 0xb54   : > { %v2342_v44 = vsel %vm1322_vm1, %v2329_v50, -inf }
 0xb55   : > { %2343 = vmax.xlane.f32.xlu0 %v2342_v44  ;;  %v7898_v57 = vpop.f32.mrf.mxu1 }
 0xb57   : > { %v2332_v46 = vpop.f32.mrf.mxu1 }
 0xb58   : > { %v2345_v58 = vsel %vm1322_vm1, %v2332_v46, -inf }
 0xb59   : > { %2346 = vmax.xlane.f32.xlu0 %v2345_v58  ;;  %v7899_v53 = vpop.f32.mrf.mxu1 }
 0xb5d   : > { %2361 = vadd.xlane.f32.xlu0 %v2360_v49 }
 0xbb3   : > { %v2365_v9 = vpop.xlane.xlu1 %2364 }
 0xbde   : > { %v2344_v60 = vpop.xlane.xlu0 %2343 }
 0xbdf   : > { %v2350_v54 = vsub.f32 %v2329_v50, %v2344_v60 }
 0xbe1   : > { %v2356_v56 = vmul.f32 1.442695, %v2350_v54 }
 0xbe2   : > { %v2347_v62 = vpop.xlane.xlu0 %2346 }
 0xbe3   : > { %8365 = vpow2.f32 %v2356_v56  ;;  %v2351_v63 = vsub.f32 %v2332_v46, %v2347_v62 }
 0xbe5   : > { %v2358_v0 = vmul.f32 1.442695, %v2351_v63 }
 0xbe6   : > { %v2362_v8 = vpop.xlane.xlu0 %2361 }
 0xbe7   : > { %8367 = vpow2.f32 %v2358_v0 }
 0xbe8   : > { %8369 = vrcp.f32 %v2362_v8 }
 0xbe9   : > { %8371 = vrcp.f32 %v2365_v9 }
 0xbf0   : > { %v8366_v1 = vpop.eup %8365 }
 0xbf1   : > { %v2366_v2 = vsel %vm1322_vm1, %v8366_v1, 0.0 }
 0xbf2   : > { %2367 = vadd.xlane.f32.xlu0 %v2366_v2 }
 0xbf4   : > { %v8368_v3 = vpop.eup %8367 }
 0xbf5   : > { %v2369_v4 = vsel %vm1322_vm1, %v8368_v3, 0.0  ;;  %v8370_v10 = vpop.eup %8369 }
 0xbf6   : > { %2370 = vadd.xlane.f32.xlu1 %v2369_v4  ;;  %v8372_v13 = vpop.eup %8371  ;;  %v2376_v14 = vmul.f32 %v8370_v10, %v8364_v52 }
 0xbf7   : > { %v2377_v17 = vmul.f32 %v8372_v13, %v8362_v32 }
 0xbf9   : > { %v2380_v18 = vpack.c.bf16 %v2377_v17, %v2376_v14 }
 0xc07   : > { %2429 = vrot.lane.b32.xlu1 %v9627_v20, %s8977_s17 }
 0xc08   : > { %2382 = vrot.lane.b32.xlu0 %v9629_v22, %s8977_s17 }
 0xc0b   : > { %2545 = vrot.lane.b32.xlu1 %v9602_v59, %s8978_s3 }
 0xc0c   : > { %2543 = vrot.lane.b32.xlu0 %v9608_v5, %s8978_s3 }
 0xc0f   : > { %2596 = vrot.lane.b32.xlu1 %v9610_v7, %s8978_s3 }
 0xc13   : > { %2594 = vrot.lane.b32.xlu1 %v9619_v11, %s8978_s3 }
 0xc7b   : > { %v2368_v12 = vpop.xlane.xlu0 %2367 }
 0xc7c   : > { %8373 = vrcp.f32 %v2368_v12 }
 0xc7f   : > { %v2371_v15 = vpop.xlane.xlu1 %2370  ;;  %v2383_v16 = vpop.permute.xlu0 %2382 }
 0xc80   : > { %8375 = vrcp.f32 %v2371_v15  ;;  %7901 = vmatpush3.bf16.msra.mxu0 %v2383_v16 }
 0xc81   : > { %7912 = vmatprep.subr.bf16.mxu0 %v8180_v34 }
 0xc83   : > { %v2430_v19 = vpop.permute.xlu1 %2429  ;;  %7903 = vmatmul.mubr.msk.bf16.vlgmr.msra.gmra.mxu0 %vm1322_vm1, %v2380_v18  ;;  %v2544_v32 = vpop.permute.xlu0 %2543 }
 0xc84   : > { %7907 = vmatpush3.bf16.msra.mxu1 %v2430_v19  ;;  %7913 = vmatpush3.bf16.msra.mxu0 %v8180_v34 }
 0xc85   : > { %7918 = vmatprep.subr.bf16.mxu1 %v8973_v45  ;;  %7924 = vmatprep.subr.bf16.mxu0 %v8973_v45 }
 0xc87   : > { %v2546_v29 = vpop.permute.xlu1 %2545 }
 0xc88   : > { %v2551_v31 = vsel %vm1322_vm1, %v2546_v29, 0 }
 0xc89   : > { %v8374_v23 = vpop.eup %8373 }
 0xc8a   : > { %v2378_v27 = vmul.f32 %v8374_v23, %v8366_v1 }
 0xc8b   : > { %v2597_v39 = vpop.permute.xlu1 %2596 }
 0xc8c   : > { %v2602_v57 = vsel %vm1322_vm1, %v2597_v39, 0 }
 0xc8d   : > { %v8376_v26 = vpop.eup %8375 }
 0xc8e   : > { %v2379_v28 = vmul.f32 %v8376_v26, %v8368_v3 }
 0xc8f   : > { %v2595_v60 = vpop.permute.xlu1 %2594 }
 0xc90   : > { %v2381_v30 = vpack.c.bf16 %v2379_v28, %v2378_v27 }
 0xc92   : > { %7909 = vmatmul.mubr.msk.bf16.vlgmr.msra.gmra.mxu1 %vm1322_vm1, %v2381_v30 }
 0xc93   : > { %7919 = vmatpush3.bf16.xpose.msra.mxu1 %v2551_v31  ;;  %7920 = vmatprep.mubr.msk.bf16.mxu1 %vm8974_vm0, %v8973_v45 }
 0xc94   : > { %7930 = vmatprep.subr.bf16.mxu1 %v8973_v45 }
 0xc9a   : > { %7921 = vmatmul.mubr.msk.bf16.vlgmr.msra.gmra.mxu1 %vm1322_vm1, %v2544_v32 }
 0xc9b   : > { %7932 = vmatprep.mubr.msk.bf16.mxu1 %vm8974_vm0, %v8973_v45 }
 0xd43   : > { %v2422_v21 = vpop.f32.mrf.mxu0 }
 0xd45   : > { %v7904_v24 = vpop.f32.mrf.mxu0 }
 0xd47   : > { %v2425_v25 = vpop.f32.mrf.mxu0 }
 0xd48   : > { %v2476_v33 = vpack.c.bf16 %v2425_v25, %v2422_v21 }
 0xd49   : > { %v7905_v35 = vpop.f32.mrf.mxu0 }
 0xd4a   : > { %7914 = vmatprep.mubr.msk.bf16.mxu0 %vm1322_vm1, %v2476_v33 }
 0xd52   : > { %v2469_v36 = vpop.f32.mrf.mxu1 }
 0xd54   : > { %v7910_v38 = vpop.f32.mrf.mxu1 }
 0xd56   : > { %v2472_v41 = vpop.f32.mrf.mxu1 }
 0xd57   : > { %v2477_v50 = vpack.c.bf16 %v2472_v41, %v2469_v36 }
 0xd58   : > { %v7911_v44 = vpop.f32.mrf.mxu1 }
 0xd59   : > { %7915 = vmatmul.mubr.msk.bf16.vlgmr.msra.gmra.mxu0 %vm1322_vm1, %v2477_v50 }
 0xd5a   : > { %7925 = vmatpush3.bf16.xpose.msra.mxu0 %v2602_v57  ;;  %v2587_v46 = vpop.f32.mrf.mxu1  ;;  %7926 = vmatprep.mubr.msk.bf16.mxu0 %vm8974_vm0, %v8973_v45 }
 0xd5b   : > { %v2645_v58 = vsel %vm1322_vm1, %v2587_v46, -inf  ;;  %7936 = vmatprep.subr.bf16.mxu0 %v8973_v45 }
 0xd5c   : > { %2646 = vmax.xlane.f32.xlu0 %v2645_v58  ;;  %v7922_v52 = vpop.f32.mrf.mxu1 }
 0xd5e   : > { %v2590_v53 = vpop.f32.mrf.mxu1 }
 0xd5f   : > { %v2648_v49 = vsel %vm1322_vm1, %v2590_v53, -inf }
 0xd60   : > { %2649 = vmax.xlane.f32.xlu1 %v2648_v49  ;;  %v7923_v54 = vpop.f32.mrf.mxu1 }
 0xd61   : > { %7927 = vmatmul.mubr.msk.bf16.vlgmr.msra.gmra.mxu0 %vm1322_vm1, %v2595_v60 }
 0xd62   : > { %7938 = vmatprep.mubr.msk.bf16.mxu0 %vm8974_vm0, %v8973_v45 }
 0xde5   : > { %v2647_v2 = vpop.xlane.xlu0 %2646 }
 0xde6   : > { %v2657_v3 = vsub.f32 %v2587_v46, %v2647_v2 }
 0xde8   : > { %v2661_v4 = vmul.f32 1.442695, %v2657_v3 }
 0xde9   : > { %v2650_v56 = vpop.xlane.xlu1 %2649 }
 0xdea   : > { %v2658_v62 = vsub.f32 %v2590_v53, %v2650_v56 }
 0xdec   : > { %v2663_v63 = vmul.f32 1.442695, %v2658_v62 }
 0xdee   : > { %8377 = vpow2.f32 %v2663_v63  ;;  %v8181_v63 = vld [vmem:[%s9544_s19 + $0x20] sm:$0xff]  }
 0xdef   : > { %8379 = vpow2.f32 %v2661_v4 }
 0xdfb   : > { %v8378_v0 = vpop.eup %8377 }
 0xdfc   : > { %v2672_v1 = vsel %vm1322_vm1, %v8378_v0, 0.0 }
 0xdfd   : > { %2673 = vadd.xlane.f32.xlu1 %v2672_v1 }
 0xe19   : > { %v7916_v8 = vpop.f32.mrf.mxu0 }
 0xe1a   : > { %v9845_v9 = vadd.f32 %v7916_v8, %v9793_v37  ;;  %v8380_v37 = vpop.eup %8379 }
 0xe1b   : > { %v2524_v10 = vpop.f32.mrf.mxu0 }
 0xe1c   : > { %v9848_v12 = vadd.f32 %v2524_v10, %v9797_v40  ;;  %v2669_v40 = vsel %vm1322_vm1, %v8380_v37, 0.0 }
 0xe1d   : > { %v7917_v13 = vpop.f32.mrf.mxu0 }
 0xe1e   : > { %v9851_v14 = vadd.f32 %v7917_v13, %v9799_v42 }
 0xe1f   : > { %v9853_v15 = vpop.f32.mrf.mxu0 }
 0xe21   : > { %v2638_v16 = vpop.f32.mrf.mxu0 }
 0xe22   : > { %v2651_v17 = vsel %vm1322_vm1, %v2638_v16, -inf }
 0xe23   : > { %v7928_v18 = vpop.f32.mrf.mxu0  ;;  %2652 = vmax.xlane.f32.xlu0 %v2651_v17 }
 0xe25   : > { %v2641_v19 = vpop.f32.mrf.mxu0 }
 0xe26   : > { %v2654_v23 = vsel %vm1322_vm1, %v2641_v19, -inf }
 0xe27   : > { %v7929_v26 = vpop.f32.mrf.mxu0  ;;  %2655 = vmax.xlane.f32.xlu0 %v2654_v23 }
 0xe2b   : > { %2670 = vadd.xlane.f32.xlu0 %v2669_v40 }
 0xe86   : > { %v2674_v33 = vpop.xlane.xlu1 %2673 }
 0xeac   : > { %v2653_v27 = vpop.xlane.xlu0 %2652 }
 0xead   : > { %v2659_v28 = vsub.f32 %v2638_v16, %v2653_v27 }
 0xeaf   : > { %v2665_v42 = vmul.f32 1.442695, %v2659_v28 }
 0xeb0   : > { %v2656_v29 = vpop.xlane.xlu0 %2655 }
 0xeb1   : > { %8381 = vpow2.f32 %v2665_v42  ;;  %v2660_v30 = vsub.f32 %v2641_v19, %v2656_v29 }
 0xeb3   : > { %v2667_v31 = vmul.f32 1.442695, %v2660_v30 }
 0xeb4   : > { %v2671_v25 = vpop.xlane.xlu0 %2670 }
 0xeb5   : > { %8383 = vpow2.f32 %v2667_v31 }
 0xeb6   : > { %8385 = vrcp.f32 %v2671_v25 }
 0xeb7   : > { %8387 = vrcp.f32 %v2674_v33 }
 0xebe   : > { %v8382_v32 = vpop.eup %8381 }
 0xebf   : > { %v2675_v34 = vsel %vm1322_vm1, %v8382_v32, 0.0 }
 0xec0   : > { %2676 = vadd.xlane.f32.xlu0 %v2675_v34 }
 0xec2   : > { %v8384_v21 = vpop.eup %8383 }
 0xec3   : > { %v2678_v24 = vsel %vm1322_vm1, %v8384_v21, 0.0  ;;  %v8386_v35 = vpop.eup %8385 }
 0xec4   : > { %2679 = vadd.xlane.f32.xlu1 %v2678_v24  ;;  %v8388_v38 = vpop.eup %8387  ;;  %v2685_v39 = vmul.f32 %v8386_v35, %v8380_v37  ;;  %v1914_v35 = vadd.f32 %v9732_v51, %v9743_v61 }
 0xec5   : > { %v2686_v44 = vmul.f32 %v8388_v38, %v8378_v0 }
 0xec7   : > { %v2689_v57 = vpack.c.bf16 %v2686_v44, %v2685_v39  ;;  %v2231_v39 = vadd.f32 %v9801_v43, %v1914_v35 }
 0xec9   : > { %v2540_v44 = vadd.f32 %v9853_v15, %v2231_v39 }
 0xed5   : > { %2738 = vrot.lane.b32.xlu1 %v9627_v20, %s8978_s3 }
 0xed6   : > { %2691 = vrot.lane.b32.xlu0 %v9629_v22, %s8978_s3 }
 0xed9   : > { %2854 = vrot.lane.b32.xlu1 %v9602_v59, %s8979_s1 }
 0xeda   : > { %2852 = vrot.lane.b32.xlu0 %v9608_v5, %s8979_s1 }
 0xedd   : > { %2905 = vrot.lane.b32.xlu1 %v9610_v7, %s8979_s1 }
 0xee1   : > { %2903 = vrot.lane.b32.xlu1 %v9619_v11, %s8979_s1 }
 0xf49   : > { %v2677_v36 = vpop.xlane.xlu0 %2676 }
 0xf4a   : > { %8389 = vrcp.f32 %v2677_v36 }
 0xf4d   : > { %v2692_v41 = vpop.permute.xlu0 %2691  ;;  %v2680_v50 = vpop.xlane.xlu1 %2679 }
 0xf4e   : > { %8391 = vrcp.f32 %v2680_v50  ;;  %7931 = vmatpush3.bf16.msra.mxu1 %v2692_v41 }
 0xf4f   : > { %7942 = vmatprep.subr.bf16.mxu1 %v8181_v63 }
 0xf51   : > { %7933 = vmatmul.mubr.msk.bf16.vlgmr.msra.gmra.mxu1 %vm1322_vm1, %v2689_v57  ;;  %v2739_v46 = vpop.permute.xlu1 %2738  ;;  %v2853_v62 = vpop.permute.xlu0 %2852 }
 0xf52   : > { %7937 = vmatpush3.bf16.msra.mxu0 %v2739_v46  ;;  %7943 = vmatpush3.bf16.msra.mxu1 %v8181_v63 }
 0xf53   : > { %7948 = vmatprep.subr.bf16.mxu0 %v8973_v45  ;;  %7954 = vmatprep.subr.bf16.mxu1 %v8973_v45 }
 0xf55   : > { %v2855_v60 = vpop.permute.xlu1 %2854 }
 0xf56   : > { %v2860_v56 = vsel %vm1322_vm1, %v2855_v60, 0 }
 0xf57   : > { %v8390_v58 = vpop.eup %8389 }
 0xf58   : > { %v2687_v53 = vmul.f32 %v8390_v58, %v8382_v32 }
 0xf59   : > { %v2906_v13 = vpop.permute.xlu1 %2905 }
 0xf5a   : > { %v2911_v19 = vsel %vm1322_vm1, %v2906_v13, 0 }
 0xf5b   : > { %v8392_v52 = vpop.eup %8391 }
 0xf5c   : > { %v2688_v49 = vmul.f32 %v8392_v52, %v8384_v21 }
 0xf5d   : > { %v2904_v28 = vpop.permute.xlu1 %2903 }
 0xf5e   : > { %v2690_v54 = vpack.c.bf16 %v2688_v49, %v2687_v53 }
 0xf60   : > { %7939 = vmatmul.mubr.msk.bf16.vlgmr.msra.gmra.mxu0 %vm1322_vm1, %v2690_v54 }
 0xf61   : > { %7949 = vmatpush3.bf16.xpose.msra.mxu0 %v2860_v56  ;;  %7950 = vmatprep.mubr.msk.bf16.mxu0 %vm8974_vm0, %v8973_v45 }
 0xf62   : > { %7960 = vmatprep.subr.bf16.mxu0 %v8973_v45 }
 0xf68   : > { %7951 = vmatmul.mubr.msk.bf16.vlgmr.msra.gmra.mxu0 %vm1322_vm1, %v2853_v62 }
 0xf69   : > { %7962 = vmatprep.mubr.msk.bf16.mxu0 %vm8974_vm0, %v8973_v45 }
0x1011   : > { %v2731_v0 = vpop.f32.mrf.mxu1 }
0x1013   : > { %v7934_v1 = vpop.f32.mrf.mxu1 }
0x1015   : > { %v2734_v2 = vpop.f32.mrf.mxu1 }
0x1016   : > { %v2785_v3 = vpack.c.bf16 %v2734_v2, %v2731_v0 }
0x1017   : > { %v7935_v4 = vpop.f32.mrf.mxu1 }
0x1018   : > { %7944 = vmatprep.mubr.msk.bf16.mxu1 %vm1322_vm1, %v2785_v3 }
0x1020   : > { %v2778_v8 = vpop.f32.mrf.mxu0 }
0x1022   : > { %v7940_v10 = vpop.f32.mrf.mxu0 }
0x1024   : > { %v2781_v16 = vpop.f32.mrf.mxu0 }
0x1025   : > { %v2786_v17 = vpack.c.bf16 %v2781_v16, %v2778_v8 }
0x1026   : > { %v7941_v18 = vpop.f32.mrf.mxu0 }
0x1027   : > { %7945 = vmatmul.mubr.msk.bf16.vlgmr.msra.gmra.mxu1 %vm1322_vm1, %v2786_v17 }
0x1028   : > { %7955 = vmatpush3.bf16.xpose.msra.mxu1 %v2911_v19  ;;  %v2896_v23 = vpop.f32.mrf.mxu0  ;;  %7956 = vmatprep.mubr.msk.bf16.mxu1 %vm8974_vm0, %v8973_v45 }
0x1029   : > { %v2954_v37 = vsel %vm1322_vm1, %v2896_v23, -inf  ;;  %7966 = vmatprep.subr.bf16.mxu1 %v8973_v45 }
0x102a   : > { %2955 = vmax.xlane.f32.xlu0 %v2954_v37  ;;  %v7952_v26 = vpop.f32.mrf.mxu0 }
0x102c   : > { %v2899_v40 = vpop.f32.mrf.mxu0 }
0x102d   : > { %v2957_v27 = vsel %vm1322_vm1, %v2899_v40, -inf }
0x102e   : > { %2958 = vmax.xlane.f32.xlu1 %v2957_v27  ;;  %v7953_v42 = vpop.f32.mrf.mxu0 }
0x102f   : > { %7957 = vmatmul.mubr.msk.bf16.vlgmr.msra.gmra.mxu1 %vm1322_vm1, %v2904_v28 }
0x1030   : > { %7968 = vmatprep.mubr.msk.bf16.mxu1 %vm8974_vm0, %v8973_v45 }
0x10b3   : > { %v2956_v21 = vpop.xlane.xlu0 %2955 }
0x10b4   : > { %v2966_v24 = vsub.f32 %v2896_v23, %v2956_v21 }
0x10b6   : > { %v2970_v25 = vmul.f32 1.442695, %v2966_v24 }
0x10b7   : > { %v2959_v29 = vpop.xlane.xlu1 %2958 }
0x10b8   : > { %v2967_v30 = vsub.f32 %v2899_v40, %v2959_v29 }
0x10ba   : > { %v2972_v31 = vmul.f32 1.442695, %v2967_v30 }
0x10bc   : > { %8393 = vpow2.f32 %v2972_v31 }
0x10bd   : > { %8395 = vpow2.f32 %v2970_v25 }
0x10c9   : > { %v8394_v32 = vpop.eup %8393 }
0x10ca   : > { %v2981_v34 = vsel %vm1322_vm1, %v8394_v32, 0.0  ;;  %v8396_v53 = vpop.eup %8395 }
0x10cb   : > { %2982 = vadd.xlane.f32.xlu1 %v2981_v34  ;;  %v2978_v49 = vsel %vm1322_vm1, %v8396_v53, 0.0 }
0x10e7   : > { %v7946_v33 = vpop.f32.mrf.mxu1 }
0x10e8   : > { %v9899_v36 = vadd.f32 %v7946_v33, %v9845_v9 }
0x10e9   : > { %v2833_v38 = vpop.f32.mrf.mxu1 }
0x10ea   : > { %v9903_v41 = vadd.f32 %v2833_v38, %v9848_v12 }
0x10eb   : > { %v7947_v50 = vpop.f32.mrf.mxu1 }
0x10ec   : > { %v9907_v57 = vadd.f32 %v7947_v50, %v9851_v14 }
0x10ed   : > { %v2836_v46 = vpop.f32.mrf.mxu1 }
0x10ee   : > { %v9909_v58 = vadd.f32 %v2836_v46, %v2540_v44 }
0x10ef   : > { %v2947_v51 = vpop.f32.mrf.mxu1 }
0x10f0   : > { %v2960_v61 = vsel %vm1322_vm1, %v2947_v51, -inf }
0x10f1   : > { %2961 = vmax.xlane.f32.xlu0 %v2960_v61  ;;  %v7958_v9 = vpop.f32.mrf.mxu1 }
0x10f3   : > { %v2950_v52 = vpop.f32.mrf.mxu1 }
0x10f4   : > { %v2963_v43 = vsel %vm1322_vm1, %v2950_v52, -inf }
0x10f5   : > { %2964 = vmax.xlane.f32.xlu0 %v2963_v43  ;;  %v7959_v12 = vpop.f32.mrf.mxu1 }
0x10f9   : > { %2979 = vadd.xlane.f32.xlu0 %v2978_v49 }
0x1154   : > { %v2983_v4 = vpop.xlane.xlu1 %2982 }
0x117a   : > { %v2962_v15 = vpop.xlane.xlu0 %2961 }
0x117b   : > { %v2968_v14 = vsub.f32 %v2947_v51, %v2962_v15 }
0x117d   : > { %v2974_v60 = vmul.f32 1.442695, %v2968_v14 }
0x117e   : > { %v2965_v54 = vpop.xlane.xlu0 %2964 }
0x117f   : > { %8397 = vpow2.f32 %v2974_v60  ;;  %v2969_v56 = vsub.f32 %v2950_v52, %v2965_v54 }
0x1181   : > { %v2976_v62 = vmul.f32 1.442695, %v2969_v56 }
0x1182   : > { %v2980_v3 = vpop.xlane.xlu0 %2979 }
0x1183   : > { %8399 = vpow2.f32 %v2976_v62 }
0x1184   : > { %8401 = vrcp.f32 %v2980_v3 }
0x1185   : > { %8403 = vrcp.f32 %v2983_v4 }
0x118c   : > { %v8398_v63 = vpop.eup %8397 }
0x118d   : > { %v2984_v0 = vsel %vm1322_vm1, %v8398_v63, 0.0 }
0x118e   : > { %2985 = vadd.xlane.f32.xlu0 %v2984_v0 }
0x1190   : > { %v8400_v1 = vpop.eup %8399 }
0x1191   : > { %v2987_v2 = vsel %vm1322_vm1, %v8400_v1, 0.0  ;;  %v8402_v8 = vpop.eup %8401 }
0x1192   : > { %2988 = vadd.xlane.f32.xlu1 %v2987_v2  ;;  %v8404_v13 = vpop.eup %8403  ;;  %v2994_v16 = vmul.f32 %v8402_v8, %v8396_v53 }
0x1193   : > { %v2995_v19 = vmul.f32 %v8404_v13, %v8394_v32  ;;  %v8182_v32 = vld [vmem:[%s9544_s19 + $0x28] sm:$0xff]  }
0x1195   : > { %v2998_v23 = vpack.c.bf16 %v2995_v19, %v2994_v16 }
0x11a3   : > { %3047 = vrot.lane.b32.xlu1 %v9627_v20, %s8979_s1 }
0x11a4   : > { %3000 = vrot.lane.b32.xlu0 %v9629_v22, %s8979_s1 }
0x11a7   : > { %3163 = vrot.lane.b32.xlu1 %v9602_v59, %s8980_s0 }
0x11a8   : > { %3161 = vrot.lane.b32.xlu0 %v9608_v5, %s8980_s0 }
0x11ab   : > { %3214 = vrot.lane.b32.xlu1 %v9610_v7, %s8980_s0 }
0x11af   : > { %3212 = vrot.lane.b32.xlu1 %v9619_v11, %s8980_s0 }
0x1217   : > { %v2986_v10 = vpop.xlane.xlu0 %2985 }
0x1218   : > { %8405 = vrcp.f32 %v2986_v10 }
0x121b   : > { %v2989_v17 = vpop.xlane.xlu1 %2988  ;;  %v3001_v18 = vpop.permute.xlu0 %3000 }
0x121c   : > { %8407 = vrcp.f32 %v2989_v17  ;;  %7961 = vmatpush3.bf16.msra.mxu0 %v3001_v18 }
0x121d   : > { %7972 = vmatprep.subr.bf16.mxu0 %v8182_v32 }
0x121f   : > { %v3048_v37 = vpop.permute.xlu1 %3047  ;;  %7963 = vmatmul.mubr.msk.bf16.vlgmr.msra.gmra.mxu0 %vm1322_vm1, %v2998_v23  ;;  %v3162_v31 = vpop.permute.xlu0 %3161 }
0x1220   : > { %7967 = vmatpush3.bf16.msra.mxu1 %v3048_v37  ;;  %7973 = vmatpush3.bf16.msra.mxu0 %v8182_v32 }
0x1221   : > { %7978 = vmatprep.subr.bf16.mxu1 %v8973_v45  ;;  %7984 = vmatprep.subr.bf16.mxu0 %v8973_v45 }
0x1223   : > { %v3164_v42 = vpop.permute.xlu1 %3163 }
0x1224   : > { %v3169_v30 = vsel %vm1322_vm1, %v3164_v42, 0 }
0x1225   : > { %v8406_v26 = vpop.eup %8405 }
0x1226   : > { %v2996_v27 = vmul.f32 %v8406_v26, %v8398_v63 }
0x1227   : > { %v3215_v39 = vpop.permute.xlu1 %3214 }
0x1228   : > { %v3220_v51 = vsel %vm1322_vm1, %v3215_v39, 0 }
0x1229   : > { %v8408_v40 = vpop.eup %8407 }
0x122a   : > { %v2997_v28 = vmul.f32 %v8408_v40, %v8400_v1 }
0x122b   : > { %v3213_v12 = vpop.permute.xlu1 %3212 }
0x122c   : > { %v2999_v29 = vpack.c.bf16 %v2997_v28, %v2996_v27 }
0x122e   : > { %7969 = vmatmul.mubr.msk.bf16.vlgmr.msra.gmra.mxu1 %vm1322_vm1, %v2999_v29 }
0x122f   : > { %7979 = vmatpush3.bf16.xpose.msra.mxu1 %v3169_v30  ;;  %7980 = vmatprep.mubr.msk.bf16.mxu1 %vm8974_vm0, %v8973_v45 }
0x1230   : > { %7990 = vmatprep.subr.bf16.mxu1 %v8973_v45 }
0x1236   : > { %7981 = vmatmul.mubr.msk.bf16.vlgmr.msra.gmra.mxu1 %vm1322_vm1, %v3162_v31 }
0x1237   : > { %7992 = vmatprep.mubr.msk.bf16.mxu1 %vm8974_vm0, %v8973_v45 }
0x12df   : > { %v3040_v34 = vpop.f32.mrf.mxu0 }
0x12e1   : > { %v7964_v21 = vpop.f32.mrf.mxu0 }
0x12e3   : > { %v3043_v24 = vpop.f32.mrf.mxu0 }
0x12e4   : > { %v3094_v25 = vpack.c.bf16 %v3043_v24, %v3040_v34 }
0x12e5   : > { %v7965_v33 = vpop.f32.mrf.mxu0 }
0x12e6   : > { %7974 = vmatprep.mubr.msk.bf16.mxu0 %vm1322_vm1, %v3094_v25 }
0x12ee   : > { %v3087_v35 = vpop.f32.mrf.mxu1 }
0x12f0   : > { %v7970_v38 = vpop.f32.mrf.mxu1 }
0x12f2   : > { %v3090_v50 = vpop.f32.mrf.mxu1 }
0x12f3   : > { %v3095_v44 = vpack.c.bf16 %v3090_v50, %v3087_v35 }
0x12f4   : > { %v7971_v46 = vpop.f32.mrf.mxu1 }
0x12f5   : > { %7975 = vmatmul.mubr.msk.bf16.vlgmr.msra.gmra.mxu0 %vm1322_vm1, %v3095_v44 }
0x12f6   : > { %7985 = vmatpush3.bf16.xpose.msra.mxu0 %v3220_v51  ;;  %v3205_v61 = vpop.f32.mrf.mxu1  ;;  %7986 = vmatprep.mubr.msk.bf16.mxu0 %vm8974_vm0, %v8973_v45 }
0x12f7   : > { %v3263_v9 = vsel %vm1322_vm1, %v3205_v61, -inf  ;;  %7996 = vmatprep.subr.bf16.mxu0 %v8973_v45 }
0x12f8   : > { %3264 = vmax.xlane.f32.xlu0 %v3263_v9  ;;  %v7982_v52 = vpop.f32.mrf.mxu1 }
0x12fa   : > { %v3208_v43 = vpop.f32.mrf.mxu1 }
0x12fb   : > { %v3266_v53 = vsel %vm1322_vm1, %v3208_v43, -inf }
0x12fc   : > { %3267 = vmax.xlane.f32.xlu1 %v3266_v53  ;;  %v7983_v49 = vpop.f32.mrf.mxu1 }
0x12fd   : > { %7987 = vmatmul.mubr.msk.bf16.vlgmr.msra.gmra.mxu0 %vm1322_vm1, %v3213_v12 }
0x12fe   : > { %7998 = vmatprep.mubr.msk.bf16.mxu0 %vm8974_vm0, %v8973_v45 }
0x1381   : > { %v3265_v62 = vpop.xlane.xlu0 %3264 }
0x1382   : > { %v3275_v63 = vsub.f32 %v3205_v61, %v3265_v62 }
0x1384   : > { %v3279_v0 = vmul.f32 1.442695, %v3275_v63 }
0x1385   : > { %v3268_v15 = vpop.xlane.xlu1 %3267 }
0x1386   : > { %v3276_v14 = vsub.f32 %v3208_v43, %v3268_v15  ;;  %v8183_v43 = vld [vmem:[%s9544_s19 + $0x30] sm:$0xff]  }
0x1388   : > { %v3281_v60 = vmul.f32 1.442695, %v3276_v14 }
0x138a   : > { %8409 = vpow2.f32 %v3281_v60 }
0x138b   : > { %8411 = vpow2.f32 %v3279_v0 }
0x1397   : > { %v8410_v54 = vpop.eup %8409 }
0x1398   : > { %v3290_v56 = vsel %vm1322_vm1, %v8410_v54, 0.0  ;;  %v8412_v37 = vpop.eup %8411 }
0x1399   : > { %3291 = vadd.xlane.f32.xlu1 %v3290_v56 }
0x13b5   : > { %v7976_v1 = vpop.f32.mrf.mxu0 }
0x13b6   : > { %v9953_v2 = vadd.f32 %v7976_v1, %v9899_v36 }
0x13b7   : > { %v3142_v3 = vpop.f32.mrf.mxu0 }
0x13b8   : > { %v9956_v4 = vadd.f32 %v3142_v3, %v9903_v41  ;;  %v3287_v41 = vsel %vm1322_vm1, %v8412_v37, 0.0 }
0x13b9   : > { %v7977_v8 = vpop.f32.mrf.mxu0 }
0x13ba   : > { %v9959_v10 = vadd.f32 %v7977_v8, %v9907_v57 }
0x13bb   : > { %v3145_v13 = vpop.f32.mrf.mxu0 }
0x13bc   : > { %v9962_v16 = vadd.f32 %v3145_v13, %v9909_v58 }
0x13bd   : > { %v3256_v17 = vpop.f32.mrf.mxu0 }
0x13be   : > { %v3269_v18 = vsel %vm1322_vm1, %v3256_v17, -inf }
0x13bf   : > { %v7988_v19 = vpop.f32.mrf.mxu0  ;;  %3270 = vmax.xlane.f32.xlu0 %v3269_v18 }
0x13c1   : > { %v3259_v23 = vpop.f32.mrf.mxu0 }
0x13c2   : > { %v3272_v36 = vsel %vm1322_vm1, %v3259_v23, -inf }
0x13c3   : > { %v7989_v26 = vpop.f32.mrf.mxu0  ;;  %3273 = vmax.xlane.f32.xlu0 %v3272_v36 }
0x13c7   : > { %3288 = vadd.xlane.f32.xlu0 %v3287_v41 }
0x1422   : > { %v3292_v21 = vpop.xlane.xlu1 %3291 }
0x1448   : > { %v3271_v57 = vpop.xlane.xlu0 %3270 }
0x1449   : > { %v3277_v40 = vsub.f32 %v3256_v17, %v3271_v57 }
0x144b   : > { %v3283_v27 = vmul.f32 1.442695, %v3277_v40 }
0x144c   : > { %v3274_v28 = vpop.xlane.xlu0 %3273 }
0x144d   : > { %8413 = vpow2.f32 %v3283_v27  ;;  %v3278_v58 = vsub.f32 %v3259_v23, %v3274_v28 }
0x144f   : > { %v3285_v42 = vmul.f32 1.442695, %v3278_v58 }
0x1450   : > { %v3289_v34 = vpop.xlane.xlu0 %3288 }
0x1451   : > { %8415 = vpow2.f32 %v3285_v42 }
0x1452   : > { %8417 = vrcp.f32 %v3289_v34 }
0x1453   : > { %8419 = vrcp.f32 %v3292_v21 }
0x145a   : > { %v8414_v29 = vpop.eup %8413 }
0x145b   : > { %v3293_v30 = vsel %vm1322_vm1, %v8414_v29, 0.0 }
0x145c   : > { %3294 = vadd.xlane.f32.xlu0 %v3293_v30 }
0x145e   : > { %v8416_v31 = vpop.eup %8415 }
0x145f   : > { %v3296_v32 = vsel %vm1322_vm1, %v8416_v31, 0.0  ;;  %v8418_v24 = vpop.eup %8417 }
0x1460   : > { %3297 = vadd.xlane.f32.xlu1 %v3296_v32  ;;  %v8420_v33 = vpop.eup %8419  ;;  %v3303_v35 = vmul.f32 %v8418_v24, %v8412_v37 }
0x1461   : > { %v3304_v39 = vmul.f32 %v8420_v33, %v8410_v54 }
0x1471   : > { %3356 = vrot.lane.b32.xlu1 %v9627_v20, %s8980_s0 }
0x1472   : > { %3309 = vrot.lane.b32.xlu0 %v9629_v22, %s8980_s0 }
0x1475   : > { %3472 = vrot.lane.b32.xlu1 %v9602_v59, %s8981_s5 }
0x1476   : > { %3470 = vrot.lane.b32.xlu0 %v9608_v5, %s8981_s5  ;;  %v3307_v5 = vpack.c.bf16 %v3304_v39, %v3303_v35 }
0x1479   : > { %3523 = vrot.lane.b32.xlu1 %v9610_v7, %s8981_s5 }
0x147d   : > { %3521 = vrot.lane.b32.xlu1 %v9619_v11, %s8981_s5 }
0x14e5   : > { %v3295_v25 = vpop.xlane.xlu0 %3294 }
0x14e6   : > { %8421 = vrcp.f32 %v3295_v25 }
0x14e9   : > { %v3310_v38 = vpop.permute.xlu0 %3309  ;;  %v3298_v59 = vpop.xlane.xlu1 %3297 }
0x14ea   : > { %8423 = vrcp.f32 %v3298_v59  ;;  %7991 = vmatpush3.bf16.msra.mxu1 %v3310_v38 }
0x14eb   : > { %8002 = vmatprep.subr.bf16.mxu1 %v8183_v43 }
0x14ed   : > { %7993 = vmatmul.mubr.msk.bf16.vlgmr.msra.gmra.mxu1 %vm1322_vm1, %v3307_v5  ;;  %v3357_v7 = vpop.permute.xlu1 %3356  ;;  %v3471_v52 = vpop.permute.xlu0 %3470 }
0x14ee   : > { %7997 = vmatpush3.bf16.msra.mxu0 %v3357_v7  ;;  %8003 = vmatpush3.bf16.msra.mxu1 %v8183_v43 }
0x14ef   : > { %8008 = vmatprep.subr.bf16.mxu0 %v8973_v45  ;;  %8014 = vmatprep.subr.bf16.mxu1 %v8973_v45 }
0x14f1   : > { %v3473_v51 = vpop.permute.xlu1 %3472 }
0x14f2   : > { %v3478_v9 = vsel %vm1322_vm1, %v3473_v51, 0 }
0x14f3   : > { %v8422_v11 = vpop.eup %8421 }
0x14f4   : > { %v3305_v44 = vmul.f32 %v8422_v11, %v8414_v29 }
0x14f5   : > { %v3524_v56 = vpop.permute.xlu1 %3523 }
0x14f6   : > { %v3529_v1 = vsel %vm1322_vm1, %v3524_v56, 0 }
0x14f7   : > { %v8424_v50 = vpop.eup %8423 }
0x14f8   : > { %v3306_v46 = vmul.f32 %v8424_v50, %v8416_v31 }
0x14f9   : > { %v3522_v19 = vpop.permute.xlu1 %3521 }
0x14fa   : > { %v3308_v61 = vpack.c.bf16 %v3306_v46, %v3305_v44 }
0x14fc   : > { %7999 = vmatmul.mubr.msk.bf16.vlgmr.msra.gmra.mxu0 %vm1322_vm1, %v3308_v61 }
0x14fd   : > { %8009 = vmatpush3.bf16.xpose.msra.mxu0 %v3478_v9  ;;  %8010 = vmatprep.mubr.msk.bf16.mxu0 %vm8974_vm0, %v8973_v45 }
0x14fe   : > { %8020 = vmatprep.subr.bf16.mxu0 %v8973_v45 }
0x1504   : > { %8011 = vmatmul.mubr.msk.bf16.vlgmr.msra.gmra.mxu0 %vm1322_vm1, %v3471_v52 }
0x1505   : > { %8022 = vmatprep.mubr.msk.bf16.mxu0 %vm8974_vm0, %v8973_v45 }
0x15ad   : > { %v3349_v53 = vpop.f32.mrf.mxu1 }
0x15af   : > { %v7994_v12 = vpop.f32.mrf.mxu1 }
0x15b1   : > { %v3352_v49 = vpop.f32.mrf.mxu1 }
0x15b2   : > { %v3403_v15 = vpack.c.bf16 %v3352_v49, %v3349_v53 }
0x15b3   : > { %v7995_v14 = vpop.f32.mrf.mxu1 }
0x15b4   : > { %8004 = vmatprep.mubr.msk.bf16.mxu1 %vm1322_vm1, %v3403_v15 }
0x15bc   : > { %v3396_v60 = vpop.f32.mrf.mxu0 }
0x15be   : > { %v8000_v54 = vpop.f32.mrf.mxu0 }
0x15c0   : > { %v3399_v62 = vpop.f32.mrf.mxu0 }
0x15c1   : > { %v3404_v63 = vpack.c.bf16 %v3399_v62, %v3396_v60 }
0x15c2   : > { %v8001_v0 = vpop.f32.mrf.mxu0 }
0x15c3   : > { %8005 = vmatmul.mubr.msk.bf16.vlgmr.msra.gmra.mxu1 %vm1322_vm1, %v3404_v63  ;;  %v8184_v63 = vld [vmem:[%s9544_s19 + $0x38] sm:$0xff]  }
0x15c4   : > { %8015 = vmatpush3.bf16.xpose.msra.mxu1 %v3529_v1  ;;  %v3514_v3 = vpop.f32.mrf.mxu0  ;;  %8016 = vmatprep.mubr.msk.bf16.mxu1 %vm8974_vm0, %v8973_v45 }
0x15c5   : > { %v3572_v8 = vsel %vm1322_vm1, %v3514_v3, -inf  ;;  %8026 = vmatprep.subr.bf16.mxu1 %v8973_v45 }
0x15c6   : > { %3573 = vmax.xlane.f32.xlu0 %v3572_v8  ;;  %v8012_v13 = vpop.f32.mrf.mxu0 }
0x15c8   : > { %v3517_v17 = vpop.f32.mrf.mxu0 }
0x15c9   : > { %v3575_v18 = vsel %vm1322_vm1, %v3517_v17, -inf }
0x15ca   : > { %3576 = vmax.xlane.f32.xlu1 %v3575_v18  ;;  %v8013_v23 = vpop.f32.mrf.mxu0 }
0x15cb   : > { %8017 = vmatmul.mubr.msk.bf16.vlgmr.msra.gmra.mxu1 %vm1322_vm1, %v3522_v19 }
0x15cc   : > { %8028 = vmatprep.mubr.msk.bf16.mxu1 %vm8974_vm0, %v8973_v45 }
0x164f   : > { %v3574_v40 = vpop.xlane.xlu0 %3573 }
0x1650   : > { %v3584_v27 = vsub.f32 %v3514_v3, %v3574_v40 }
0x1652   : > { %v3588_v28 = vmul.f32 1.442695, %v3584_v27 }
0x1653   : > { %v3577_v36 = vpop.xlane.xlu1 %3576 }
0x1654   : > { %v3585_v37 = vsub.f32 %v3517_v17, %v3577_v36 }
0x1656   : > { %v3590_v26 = vmul.f32 1.442695, %v3585_v37 }
0x1658   : > { %8425 = vpow2.f32 %v3590_v26 }
0x1659   : > { %8427 = vpow2.f32 %v3588_v28 }
0x1665   : > { %v8426_v41 = vpop.eup %8425 }
0x1666   : > { %v3599_v57 = vsel %vm1322_vm1, %v8426_v41, 0.0  ;;  %v8428_v35 = vpop.eup %8427 }
0x1667   : > { %3600 = vadd.xlane.f32.xlu1 %v3599_v57  ;;  %v3596_v38 = vsel %vm1322_vm1, %v8428_v35, 0.0  ;;  %v7182_v57 = vld [vmem:[%s821_s6] ss:$0 sm:$0xff] }
0x1683   : > { %v8006_v58 = vpop.f32.mrf.mxu1 }
0x1684   : > { %v10006_v42 = vadd.f32 %v8006_v58, %v9953_v2 }
0x1685   : > { %v3451_v29 = vpop.f32.mrf.mxu1 }
0x1686   : > { %v10009_v30 = vadd.f32 %v3451_v29, %v9956_v4 }
0x1687   : > { %v8007_v45 = vpop.f32.mrf.mxu1 }
0x1688   : > { %v10012_v31 = vadd.f32 %v8007_v45, %v9959_v10 }
0x1689   : > { %v3454_v32 = vpop.f32.mrf.mxu1 }
0x168a   : > { %v10015_v34 = vadd.f32 %v3454_v32, %v9962_v16 }
0x168b   : > { %v3565_v21 = vpop.f32.mrf.mxu1 }
0x168c   : > { %v3578_v24 = vsel %vm1322_vm1, %v3565_v21, -inf }
0x168d   : > { %3579 = vmax.xlane.f32.xlu0 %v3578_v24  ;;  %v8018_v25 = vpop.f32.mrf.mxu1 }
0x168f   : > { %v3568_v33 = vpop.f32.mrf.mxu1 }
0x1690   : > { %v3581_v2 = vsel %vm1322_vm1, %v3568_v33, -inf }
0x1691   : > { %3582 = vmax.xlane.f32.xlu0 %v3581_v2  ;;  %v8019_v4 = vpop.f32.mrf.mxu1 }
0x1695   : > { %3597 = vadd.xlane.f32.xlu0 %v3596_v38  ;;  %v3975_v38 = vld [vmem:[%s9549_s26 + $0x380] sm:$0xff] }
0x16f0   : > { %v3601_v61 = vpop.xlane.xlu1 %3600 }
0x1716   : > { %v3580_v10 = vpop.xlane.xlu0 %3579 }
0x1717   : > { %v3586_v59 = vsub.f32 %v3565_v21, %v3580_v10  ;;  %v8457_v21 = vld [vmem:[#allocation2 + $0x10] sm:$0xff] }
0x1718   : > { %v3983_v10 = vld [vmem:[%s9549_s26 + $0x3c0] sm:$0xff] }
0x1719   : > { %v3592_v39 = vmul.f32 1.442695, %v3586_v59  ;;  %v7297_v59 = vcombine.low %v3975_v38, %v3983_v10 }
0x171a   : > { %v3583_v5 = vpop.xlane.xlu0 %3582 }
0x171b   : > { %8429 = vpow2.f32 %v3592_v39  ;;  %v3587_v16 = vsub.f32 %v3568_v33, %v3583_v5  ;;  %v8458_v33 = vld [vmem:[#allocation2 + $0x8] sm:$0xff]  ;;  %v7298_v39 = vcombine.high %v3975_v38, %v3983_v10  ;;  %v3984_v5 = vld [vmem:[%s9549_s26 + $0x3c8] sm:$0xff] }
0x171c   : > { %v3904_v38 = vld [vmem:[%s9549_s26 + $0x148] sm:$0xff] }
0x171d   : > { %v3594_v7 = vmul.f32 1.442695, %v3587_v16 }
0x171e   : > { %v3598_v51 = vpop.xlane.xlu0 %3597 }
0x171f   : > { %8431 = vpow2.f32 %v3594_v7 }
0x1720   : > { %8433 = vrcp.f32 %v3598_v51 }
0x1721   : > { %8435 = vrcp.f32 %v3601_v61 }
0x1728   : > { %v8430_v11 = vpop.eup %8429 }
0x1729   : > { %v3602_v50 = vsel %vm1322_vm1, %v8430_v11, 0.0 }
0x172a   : > { %3603 = vadd.xlane.f32.xlu0 %v3602_v50 }
0x172c   : > { %v8432_v44 = vpop.eup %8431 }
0x172d   : > { %v3605_v46 = vsel %vm1322_vm1, %v8432_v44, 0.0  ;;  %v8434_v9 = vpop.eup %8433 }
0x172e   : > { %3606 = vadd.xlane.f32.xlu1 %v3605_v46  ;;  %v8436_v43 = vpop.eup %8435  ;;  %v3612_v53 = vmul.f32 %v8434_v9, %v8428_v35  ;;  %v8459_v35 = vld [vmem:[#allocation2] sm:$0xff] }
0x172f   : > { %v3613_v15 = vmul.f32 %v8436_v43, %v8426_v41 }
0x1731   : > { %v3616_v14 = vpack.c.bf16 %v3613_v15, %v3612_v53 }
0x173f   : > { %3665 = vrot.lane.b32.xlu1 %v9627_v20, %s8981_s5 }
0x1740   : > { %3618 = vrot.lane.b32.xlu0 %v9629_v22, %s8981_s5 }
0x17b3   : > { %v3604_v52 = vpop.xlane.xlu0 %3603 }
0x17b4   : > { %8437 = vrcp.f32 %v3604_v52 }
0x17b7   : > { %v3607_v12 = vpop.xlane.xlu1 %3606  ;;  %v3619_v49 = vpop.permute.xlu0 %3618 }
0x17b8   : > { %8439 = vrcp.f32 %v3607_v12  ;;  %8021 = vmatpush3.bf16.msra.mxu0 %v3619_v49 }
0x17b9   : > { %8032 = vmatprep.subr.bf16.mxu0 %v8184_v63 }
0x17bb   : > { %v3666_v20 = vpop.permute.xlu1 %3665  ;;  %8023 = vmatmul.mubr.msk.bf16.vlgmr.msra.gmra.mxu0 %vm1322_vm1, %v3616_v14 }
0x17bc   : > { %8027 = vmatpush3.bf16.msra.mxu1 %v3666_v20  ;;  %8033 = vmatpush3.bf16.msra.mxu0 %v8184_v63  ;;  %v3968_v63 = vld [vmem:[%s9549_s26 + $0x348] sm:$0xff] }
0x17bd   : > { %4715 = vmatprep.subr.bf16.mxu1 %v7298_v39  ;;  %v3879_v39 = vld [vmem:[%s9549_s26 + $0x80] sm:$0xff] }
0x17c1   : > { %v8438_v22 = vpop.eup %8437 }
0x17c2   : > { %v3614_v54 = vmul.f32 %v8438_v22, %v8430_v11 }
0x17c5   : > { %v8440_v60 = vpop.eup %8439 }
0x17c6   : > { %v3615_v56 = vmul.f32 %v8440_v60, %v8432_v44  ;;  %v3959_v60 = vld [vmem:[%s9549_s26 + $0x300] sm:$0xff] }
0x17c8   : > { %v3617_v62 = vpack.c.bf16 %v3615_v56, %v3614_v54  ;;  %v3967_v54 = vld [vmem:[%s9549_s26 + $0x340] sm:$0xff]  ;;  %v3960_v56 = vld [vmem:[%s9549_s26 + $0x308] sm:$0xff] }
0x17ca   : > { %8029 = vmatmul.mubr.msk.bf16.vlgmr.msra.gmra.mxu1 %vm1322_vm1, %v3617_v62  ;;  %v7282_v62 = vcombine.high %v3959_v60, %v3967_v54 }
0x17cb   : > { %4747 = vmatprep.mubr.bf16.mxu1 %v8972_v6  ;;  %4716 = vmatpush1.bf16.msra.mxu1 %v7297_v59 }
0x17cc   : > { %4717 = vmatprep.subr.bf16.mxu1 %v7282_v62 }
0x187b   : > { %v3658_v0 = vpop.f32.mrf.mxu0 }
0x187d   : > { %v8024_v1 = vpop.f32.mrf.mxu0 }
0x187e   : > { %v7283_v1 = vcombine.low %v3960_v56, %v3968_v63 }
0x187f   : > { %v3661_v3 = vpop.f32.mrf.mxu0 }
0x1880   : > { %v3712_v8 = vpack.c.bf16 %v3661_v3, %v3658_v0  ;;  %v7281_v0 = vcombine.low %v3959_v60, %v3967_v54  ;;  %v7284_v3 = vcombine.high %v3960_v56, %v3968_v63  ;;  %v3977_v60 = vld [vmem:[%s9549_s26 + $0x390] sm:$0xff]  ;;  %v3978_v56 = vld [vmem:[%s9549_s26 + $0x398] sm:$0xff] }
0x1881   : > { %v8025_v13 = vpop.f32.mrf.mxu0  ;;  %v3985_v54 = vld [vmem:[%s9549_s26 + $0x3d0] sm:$0xff]  ;;  %v3986_v63 = vld [vmem:[%s9549_s26 + $0x3d8] sm:$0xff] }
0x1882   : > { %8034 = vmatprep.mubr.msk.bf16.mxu0 %vm1322_vm1, %v3712_v8  ;;  %4718 = vmatpush1.bf16.msra.mxu1 %v7281_v0  ;;  %v3943_v8 = vld [vmem:[%s9549_s26 + $0x280] sm:$0xff]  ;;  %v7302_v62 = vcombine.high %v3977_v60, %v3985_v54  ;;  %v7301_v0 = vcombine.low %v3977_v60, %v3985_v54 }
0x1883   : > { %v3951_v13 = vld [vmem:[%s9549_s26 + $0x2c0] sm:$0xff] }
0x188a   : > { %v3705_v17 = vpop.f32.mrf.mxu1 }
0x188c   : > { %v8030_v18 = vpop.f32.mrf.mxu1 }
0x188d   : > { %v7266_v18 = vcombine.high %v3943_v8, %v3951_v13 }
0x188e   : > { %v3708_v19 = vpop.f32.mrf.mxu1 }
0x188f   : > { %v3713_v23 = vpack.c.bf16 %v3708_v19, %v3705_v17  ;;  %v3944_v17 = vld [vmem:[%s9549_s26 + $0x288] sm:$0xff]  ;;  %4719 = vmatprep.subr.bf16.mxu1 %v7266_v18 }
0x1890   : > { %v8031_v36 = vpop.f32.mrf.mxu1  ;;  %v3952_v19 = vld [vmem:[%s9549_s26 + $0x2c8] sm:$0xff] }
0x1891   : > { %8035 = vmatmul.mubr.msk.bf16.vlgmr.msra.gmra.mxu0 %vm1322_vm1, %v3713_v23  ;;  %v7265_v23 = vcombine.low %v3943_v8, %v3951_v13  ;;  %v7267_v36 = vcombine.low %v3944_v17, %v3952_v19 }
0x1892   : > { %4800 = vmatprep.mubr.bf16.mxu0 %v8972_v6 }
0x1893   : > { %4720 = vmatpush1.bf16.msra.mxu1 %v7265_v23 }
0x1951   : > { %v8036_v37 = vpop.f32.mrf.mxu0 }
0x1952   : > { %v3777_v29 = vadd.f32 %v8036_v37, %v10006_v42  ;;  %v7268_v37 = vcombine.high %v3944_v17, %v3952_v19 }
0x1953   : > { %v3760_v26 = vpop.f32.mrf.mxu0 }
0x1954   : > { %v3775_v41 = vadd.f32 %v3760_v26, %v10009_v30  ;;  %v3788_v30 = vadd.f32 %v7182_v57, %v3777_v29  ;;  %v3927_v26 = vld [vmem:[%s9549_s26 + $0x200] sm:$0xff] }
0x1955   : > { %v8037_v40 = vpop.f32.mrf.mxu0 }
0x1956   : > { %v3786_v27 = vadd.f32 %v7182_v57, %v3775_v41  ;;  %v3778_v28 = vadd.f32 %v8037_v40, %v10012_v31  ;;  %v8460_v31 = vld [vmem:[#allocation2 + $0x18] sm:$0xff]  ;;  %v3935_v41 = vld [vmem:[%s9549_s26 + $0x240] sm:$0xff] }
0x1957   : > { %v3763_v58 = vpop.f32.mrf.mxu0  ;;  %v3792_v42 = vadd.f32 %v8460_v31, %v3788_v30  ;;  %v7250_v40 = vcombine.high %v3927_v26, %v3935_v41  ;;  %v3896_v31 = vld [vmem:[%s9549_s26 + $0x108] sm:$0xff] }
0x1958   : > { %v3789_v45 = vadd.f32 %v7182_v57, %v3778_v28  ;;  %v3776_v32 = vadd.f32 %v3763_v58, %v10015_v34  ;;  %v3790_v24 = vadd.f32 %v8457_v21, %v3786_v27  ;;  %v3976_v34 = vld [vmem:[%s9549_s26 + $0x388] sm:$0xff]  ;;  %v7249_v28 = vcombine.low %v3927_v26, %v3935_v41 }
0x1959   : > { %v7299_v16 = vcombine.low %v3976_v34, %v3984_v5  ;;  %v7300_v7 = vcombine.high %v3976_v34, %v3984_v5  ;;  %v3936_v27 = vld [vmem:[%s9549_s26 + $0x248] sm:$0xff]  ;;  %4721 = vmatprep.subr.bf16.mxu1 %v7250_v40  ;;  %v7219_v34 = vcombine.low %v3896_v31, %v3904_v38  ;;  %v7220_v59 = vcombine.high %v3896_v31, %v3904_v38  ;;  %v3887_v5 = vld [vmem:[%s9549_s26 + $0xc0] sm:$0xff] }
0x195a   : > { %v3787_v25 = vadd.f32 %v7182_v57, %v3776_v32  ;;  %3796 = vadd.xlane.f32.xlu1 %v3790_v24  ;;  %v3793_v2 = vadd.f32 %v8458_v33, %v3789_v45  ;;  %v3928_v57 = vld [vmem:[%s9549_s26 + $0x208] sm:$0xff]  ;;  %4722 = vmatpush1.bf16.msra.mxu1 %v7249_v28  ;;  %v3911_v45 = vld [vmem:[%s9549_s26 + $0x180] sm:$0xff] }
0x195b   : > { %4768 = vmatprep.subr.bf16.mxu0 %v7300_v7  ;;  %v7251_v58 = vcombine.low %v3928_v57, %v3936_v27  ;;  %v7252_v29 = vcombine.high %v3928_v57, %v3936_v27  ;;  %v3919_v32 = vld [vmem:[%s9549_s26 + $0x1c0] sm:$0xff]  ;;  %v3912_v21 = vld [vmem:[%s9549_s26 + $0x188] sm:$0xff]  ;;  %v7202_v7 = vcombine.high %v3879_v39, %v3887_v5 }
0x195c   : > { %v3791_v4 = vadd.f32 %v8459_v35, %v3787_v25  ;;  %4769 = vmatpush1.bf16.msra.mxu0 %v7299_v16  ;;  %v3920_v25 = vld [vmem:[%s9549_s26 + $0x1c8] sm:$0xff]  ;;  %v7233_v30 = vcombine.low %v3911_v45, %v3919_v32  ;;  %v3895_v35 = vld [vmem:[%s9549_s26 + $0x100] sm:$0xff] }
0x195d   : > { %4770 = vmatprep.subr.bf16.mxu0 %v7284_v3  ;;  %v7235_v33 = vcombine.low %v3912_v21, %v3920_v25  ;;  %v3880_v16 = vld [vmem:[%s9549_s26 + $0x88] sm:$0xff]  ;;  %v7304_v3 = vcombine.high %v3978_v56, %v3986_v63 }
0x195e   : > { %3802 = vadd.xlane.f32.xlu1 %v3793_v2  ;;  %3798 = vadd.xlane.f32.xlu0 %v3791_v4 }
0x1960   : > { %4771 = vmatpush1.bf16.msra.mxu0 %v7283_v1  ;;  %v7303_v1 = vcombine.low %v3978_v56, %v3986_v63  ;;  %v3913_v56 = vld [vmem:[%s9549_s26 + $0x190] sm:$0xff]  ;;  %v3914_v63 = vld [vmem:[%s9549_s26 + $0x198] sm:$0xff] }
0x1961   : > { %4772 = vmatprep.subr.bf16.mxu0 %v7268_v37 }
0x1962   : > { %3800 = vadd.xlane.f32.xlu0 %v3792_v42 }
0x1964   : > { %4773 = vmatpush1.bf16.msra.mxu0 %v7267_v36 }
0x1965   : > { %4774 = vmatprep.subr.bf16.mxu0 %v7252_v29 }
0x1968   : > { %4775 = vmatpush1.bf16.msra.mxu0 %v7251_v58  ;;  %v7183_v58 = vld [vmem:[%s829_s24] ss:$0 sm:$0xff] }
0x19e3   : > { %v3797_v11 = vpop.xlane.xlu1 %3796 }
0x19e4   : > { %v3805_v50 = vmul.f32 0.0078125, %v3797_v11  ;;  %v3888_v11 = vld [vmem:[%s9549_s26 + $0xc8] sm:$0xff] }
0x19e6   : > { %v10043_v44 = vsub.f32 %v3790_v24, %v3805_v50  ;;  %v7234_v24 = vcombine.high %v3911_v45, %v3919_v32  ;;  %v7201_v50 = vcombine.low %v3879_v39, %v3887_v5  ;;  %v3945_v39 = vld [vmem:[%s9549_s26 + $0x290] sm:$0xff] }
0x19e7   : > { %v3803_v46 = vpop.xlane.xlu1 %3802  ;;  %v3799_v51 = vpop.xlane.xlu0 %3798  ;;  %v3953_v5 = vld [vmem:[%s9549_s26 + $0x2d0] sm:$0xff] }
0x19e8   : > { %v3808_v61 = vmul.f32 0.0078125, %v3803_v46  ;;  %v3806_v9 = vmul.f32 0.0078125, %v3799_v51  ;;  %v3813_v52 = vmul.f32 %v10043_v44, %v10043_v44  ;;  %4723 = vmatprep.subr.bf16.mxu1 %v7234_v24  ;;  %v7203_v46 = vcombine.low %v3880_v16, %v3888_v11 }
0x19e9   : > { %4724 = vmatpush1.bf16.msra.mxu1 %v7233_v30  ;;  %v7204_v51 = vcombine.high %v3880_v16, %v3888_v11  ;;  %v3954_v11 = vld [vmem:[%s9549_s26 + $0x2d8] sm:$0xff] }
0x19ea   : > { %v10047_v43 = vsub.f32 %v3791_v4, %v3806_v9  ;;  %3817 = vadd.xlane.f32.xlu0 %v3813_v52  ;;  %v10049_v12 = vsub.f32 %v3793_v2, %v3808_v61  ;;  %v7236_v2 = vcombine.high %v3912_v21, %v3920_v25  ;;  %v3903_v4 = vld [vmem:[%s9549_s26 + $0x140] sm:$0xff]  ;;  %v3864_v52 = vld [vmem:[%s9549_s26 + $0x8] sm:$0xff]  ;;  %v7184_v21 = vld [vmem:[%s837_s28] ss:$0 sm:$0xff] }
0x19eb   : > { %v3801_v53 = vpop.xlane.xlu0 %3800  ;;  %v7217_v10 = vcombine.low %v3895_v35, %v3903_v4  ;;  %v3863_v61 = vld [vmem:[%s9549_s26] sm:$0xff]  ;;  %v3961_v25 = vld [vmem:[%s9549_s26 + $0x310] sm:$0xff] }
0x19ec   : > { %v3807_v49 = vmul.f32 0.0078125, %v3801_v53  ;;  %v3814_v15 = vmul.f32 %v10047_v43, %v10047_v43  ;;  %v3816_v20 = vmul.f32 %v10049_v12, %v10049_v12  ;;  %4776 = vmatprep.subr.bf16.mxu0 %v7236_v2  ;;  %v3871_v9 = vld [vmem:[%s9549_s26 + $0x40] sm:$0xff]  ;;  %v3962_v2 = vld [vmem:[%s9549_s26 + $0x318] sm:$0xff] }
0x19ed   : > { %4777 = vmatpush1.bf16.msra.mxu0 %v7235_v33  ;;  %v7186_v53 = vcombine.high %v3863_v61, %v3871_v9  ;;  %v3969_v33 = vld [vmem:[%s9549_s26 + $0x350] sm:$0xff] }
0x19ee   : > { %v10053_v14 = vsub.f32 %v3792_v42, %v3807_v49  ;;  %3819 = vadd.xlane.f32.xlu1 %v3814_v15  ;;  %v7218_v42 = vcombine.high %v3895_v35, %v3903_v4  ;;  %4778 = vmatprep.subr.bf16.mxu0 %v7220_v59  ;;  %v3872_v49 = vld [vmem:[%s9549_s26 + $0x48] sm:$0xff]  ;;  %v7185_v15 = vcombine.low %v3863_v61, %v3871_v9  ;;  %v3970_v35 = vld [vmem:[%s9549_s26 + $0x358] sm:$0xff]  ;;  %v3929_v9 = vld [vmem:[%s9549_s26 + $0x210] sm:$0xff] }
0x19ef   : > { %v7288_v59 = vcombine.high %v3962_v2, %v3970_v35 }
0x19f0   : > { %v3815_v22 = vmul.f32 %v10053_v14, %v10053_v14  ;;  %4725 = vmatprep.subr.bf16.mxu1 %v7218_v42 }
0x19f1   : > { %4726 = vmatpush1.bf16.msra.mxu1 %v7217_v10  ;;  %4779 = vmatpush1.bf16.msra.mxu0 %v7219_v34  ;;  %v7286_v34 = vcombine.high %v3961_v25, %v3969_v33 }
0x19f2   : > { %3823 = vadd.xlane.f32.xlu1 %v3816_v20  ;;  %3821 = vadd.xlane.f32.xlu0 %v3815_v22  ;;  %v7187_v20 = vcombine.low %v3864_v52, %v3872_v49  ;;  %v7188_v22 = vcombine.high %v3864_v52, %v3872_v49  ;;  %v3937_v52 = vld [vmem:[%s9549_s26 + $0x250] sm:$0xff]  ;;  %v3938_v49 = vld [vmem:[%s9549_s26 + $0x258] sm:$0xff] }
0x19f3   : > { %4727 = vmatprep.subr.bf16.mxu1 %v7202_v7  ;;  %4780 = vmatprep.subr.bf16.mxu0 %v7204_v51  ;;  %v3946_v7 = vld [vmem:[%s9549_s26 + $0x298] sm:$0xff]  ;;  %v7254_v60 = vcombine.high %v3929_v9, %v3937_v52 }
0x19f4   : > { %v7272_v61 = vcombine.high %v3946_v7, %v3954_v11 }
0x19f5   : > { %4728 = vmatpush1.bf16.msra.mxu1 %v7201_v50  ;;  %4781 = vmatpush1.bf16.msra.mxu0 %v7203_v46  ;;  %v7270_v50 = vcombine.high %v3945_v39, %v3953_v5 }
0x19f6   : > { %4729 = vmatprep.subr.bf16.mxu1 %v7186_v53  ;;  %4782 = vmatprep.subr.bf16.mxu0 %v7188_v22  ;;  %v3930_v53 = vld [vmem:[%s9549_s26 + $0x218] sm:$0xff] }
0x19f7   : > { %v7256_v54 = vcombine.high %v3930_v53, %v3938_v49 }
0x19f9   : > { %4730 = vmatpush1.bf16.msra.mxu1 %v7185_v15  ;;  %4783 = vmatpush1.bf16.msra.mxu0 %v7187_v20  ;;  %v7269_v15 = vcombine.low %v3945_v39, %v3953_v5  ;;  %v7271_v20 = vcombine.low %v3946_v7, %v3954_v11  ;;  %v3963_v7 = vld [vmem:[%s9549_s26 + $0x320] sm:$0xff] }
0x19fa   : > { %4821 = vmatprep.subr.bf16.mxu1 %v7302_v62  ;;  %4874 = vmatprep.subr.bf16.mxu0 %v7304_v3  ;;  %v3921_v62 = vld [vmem:[%s9549_s26 + $0x1d0] sm:$0xff]  ;;  %v7255_v3 = vcombine.low %v3930_v53, %v3938_v49  ;;  %v3971_v11 = vld [vmem:[%s9549_s26 + $0x360] sm:$0xff] }
0x19fb   : > { %v3947_v53 = vld [vmem:[%s9549_s26 + $0x2a0] sm:$0xff] }
0x19fc   : > { %v3955_v49 = vld [vmem:[%s9549_s26 + $0x2e0] sm:$0xff] }
0x1a73   : > { %v3818_v8 = vpop.xlane.xlu0 %3817 }
0x1a74   : > { %v3825_v13 = vmul.f32 0.0078125, %v3818_v8  ;;  %v7238_v8 = vcombine.high %v3913_v56, %v3921_v62 }
0x1a76   : > { %v3829_v17 = vadd.f32 1e-05, %v3825_v13 }
0x1a77   : > { %v3820_v18 = vpop.xlane.xlu1 %3819 }
0x1a78   : > { %8441 = vrsqrt.f32 %v3829_v17  ;;  %v3826_v19 = vmul.f32 0.0078125, %v3820_v18  ;;  %v3897_v17 = vld [vmem:[%s9549_s26 + $0x110] sm:$0xff] }
0x1a79   : > { %v3905_v18 = vld [vmem:[%s9549_s26 + $0x150] sm:$0xff] }
0x1a7a   : > { %v3830_v23 = vadd.f32 1e-05, %v3826_v19  ;;  %v3898_v19 = vld [vmem:[%s9549_s26 + $0x118] sm:$0xff] }
0x1a7b   : > { %v3824_v36 = vpop.xlane.xlu1 %3823  ;;  %v3822_v37 = vpop.xlane.xlu0 %3821 }
0x1a7c   : > { %8443 = vrsqrt.f32 %v3830_v23  ;;  %v3828_v26 = vmul.f32 0.0078125, %v3824_v36  ;;  %v3827_v41 = vmul.f32 0.0078125, %v3822_v37  ;;  %v3906_v23 = vld [vmem:[%s9549_s26 + $0x158] sm:$0xff]  ;;  %v7237_v36 = vcombine.low %v3913_v56, %v3921_v62 }
0x1a7d   : > { %v7274_v56 = vcombine.high %v3947_v53, %v3955_v49 }
0x1a7e   : > { %v3832_v57 = vadd.f32 1e-05, %v3828_v26  ;;  %v3831_v40 = vadd.f32 1e-05, %v3827_v41  ;;  %v7222_v26 = vcombine.high %v3897_v17, %v3905_v18  ;;  %v7224_v41 = vcombine.high %v3898_v19, %v3906_v23 }
0x1a80   : > { %8445 = vrsqrt.f32 %v3832_v57  ;;  %v3881_v57 = vld [vmem:[%s9549_s26 + $0x90] sm:$0xff] }
0x1a81   : > { %8447 = vrsqrt.f32 %v3831_v40  ;;  %v3889_v40 = vld [vmem:[%s9549_s26 + $0xd0] sm:$0xff] }
0x1a85   : > { %v8442_v27 = vpop.eup %8441 }
0x1a86   : > { %v3837_v28 = vmul.f32 %v8442_v27, %v10043_v44  ;;  %v3882_v27 = vld [vmem:[%s9549_s26 + $0x98] sm:$0xff] }
0x1a88   : > { %v3847_v45 = vmul.f32 %v7183_v58, %v3837_v28  ;;  %v3890_v28 = vld [vmem:[%s9549_s26 + $0xd8] sm:$0xff] }
0x1a89   : > { %v8444_v29 = vpop.eup %8443 }
0x1a8a   : > { %v3838_v32 = vmul.f32 %v8444_v29, %v10047_v43  ;;  %v10101_v44 = vadd.f32 %v7184_v21, %v3847_v45  ;;  %v7223_v29 = vcombine.low %v3898_v19, %v3906_v23  ;;  %v7206_v45 = vcombine.high %v3881_v57, %v3889_v40  ;;  %v3915_v19 = vld [vmem:[%s9549_s26 + $0x1a0] sm:$0xff] }
0x1a8b   : > { %v3923_v23 = vld [vmem:[%s9549_s26 + $0x1e0] sm:$0xff] }
0x1a8c   : > { %v3848_v24 = vmul.f32 %v7183_v58, %v3838_v32  ;;  %v7208_v32 = vcombine.high %v3882_v27, %v3890_v28 }
0x1a8d   : > { %v8446_v30 = vpop.eup %8445 }
0x1a8e   : > { %v8448_v4 = vpop.eup %8447  ;;  %v10103_v31 = vadd.f32 %v7184_v21, %v3848_v24  ;;  %v3840_v42 = vmul.f32 %v8446_v30, %v10049_v12  ;;  %v7285_v12 = vcombine.low %v3961_v25, %v3969_v33  ;;  %v3873_v24 = vld [vmem:[%s9549_s26 + $0x50] sm:$0xff]  ;;  %v3866_v25 = vld [vmem:[%s9549_s26 + $0x18] sm:$0xff]  ;;  %v7205_v33 = vcombine.low %v3881_v57, %v3889_v40 }
0x1a8f   : > { %v3839_v43 = vmul.f32 %v8448_v4, %v10053_v14  ;;  %v7287_v14 = vcombine.low %v3962_v2, %v3970_v35  ;;  %v3874_v30 = vld [vmem:[%s9549_s26 + $0x58] sm:$0xff]  ;;  %v7207_v2 = vcombine.low %v3882_v27, %v3890_v28  ;;  %v7242_v57 = vcombine.high %v3915_v19, %v3923_v23  ;;  %v3899_v27 = vld [vmem:[%s9549_s26 + $0x120] sm:$0xff] }
0x1a90   : > { %v10109_v38 = vpack.c.bf16 %v10103_v31, %v10101_v44  ;;  %v3850_v10 = vmul.f32 %v7183_v58, %v3840_v42  ;;  %v7192_v4 = vcombine.high %v3866_v25, %v3874_v30  ;;  %v3979_v42 = vld [vmem:[%s9549_s26 + $0x3a0] sm:$0xff]  ;;  %v7191_v39 = vcombine.low %v3866_v25, %v3874_v30 }
0x1a91   : > { %v3849_v16 = vmul.f32 %v7183_v58, %v3839_v43  ;;  %v7221_v58 = vcombine.low %v3897_v17, %v3905_v18  ;;  %v3987_v43 = vld [vmem:[%s9549_s26 + $0x3e0] sm:$0xff] }
0x1a92   : > { %4748 = vmatmul.mubr.bf16.vlgmr.msra.gmra.mxu1 %v10109_v38  ;;  %4801 = vmatmul.mubr.bf16.vlgmr.msra.gmra.mxu0 %v10109_v38  ;;  %v10117_v46 = vadd.f32 %v7184_v21, %v3850_v10  ;;  %v3980_v10 = vld [vmem:[%s9549_s26 + $0x3a8] sm:$0xff]  ;;  %v7306_v5 = vcombine.high %v3979_v42, %v3987_v43  ;;  %v3907_v28 = vld [vmem:[%s9549_s26 + $0x160] sm:$0xff] }
0x1a93   : > { %4822 = vmatpush1.bf16.msra.mxu1 %v7301_v0  ;;  %4875 = vmatpush1.bf16.msra.mxu0 %v7303_v1  ;;  %v10119_v51 = vadd.f32 %v7184_v21, %v3849_v16  ;;  %v3922_v0 = vld [vmem:[%s9549_s26 + $0x1d8] sm:$0xff]  ;;  %v7253_v1 = vcombine.low %v3929_v9, %v3937_v52  ;;  %v3865_v21 = vld [vmem:[%s9549_s26 + $0x10] sm:$0xff]  ;;  %v7290_v9 = vcombine.high %v3963_v7, %v3971_v11  ;;  %v3883_v25 = vld [vmem:[%s9549_s26 + $0xa0] sm:$0xff] }
0x1a94   : > { %10602 = vst [vmem:[#allocation33_spill] sm:$0xff] %v10117_v46  ;;  %4823 = vmatprep.subr.bf16.mxu1 %v7286_v34  ;;  %4876 = vmatprep.subr.bf16.mxu0 %v7288_v59  ;;  %v7240_v13 = vcombine.high %v3914_v63, %v3922_v0  ;;  %v7239_v37 = vcombine.low %v3914_v63, %v3922_v0  ;;  %v3988_v34 = vld [vmem:[%s9549_s26 + $0x3e8] sm:$0xff]  ;;  %v3931_v63 = vld [vmem:[%s9549_s26 + $0x220] sm:$0xff] }
0x1a95   : > { %4757 = vmatprep.mubr.bf16.mxu1 %v8972_v6  ;;  %4810 = vmatprep.mubr.bf16.mxu0 %v8972_v6  ;;  %v10129_v22 = vpack.c.bf16 %v10117_v46, %v10119_v51  ;;  %v7190_v35 = vcombine.high %v3865_v21, %v3873_v24  ;;  %v7189_v59 = vcombine.low %v3865_v21, %v3873_v24  ;;  %v3939_v0 = vld [vmem:[%s9549_s26 + $0x260] sm:$0xff] }
0x1a96   : > { %v7308_v16 = vcombine.high %v3980_v10, %v3988_v34  ;;  %v7258_v17 = vcombine.high %v3931_v63, %v3939_v0  ;;  %v7226_v21 = vcombine.high %v3899_v27, %v3907_v28  ;;  %v3891_v30 = vld [vmem:[%s9549_s26 + $0xe0] sm:$0xff] }
0x1a97   : > { %4824 = vmatpush1.bf16.msra.mxu1 %v7285_v12  ;;  %4877 = vmatpush1.bf16.msra.mxu0 %v7287_v14  ;;  %v3964_v12 = vld [vmem:[%s9549_s26 + $0x328] sm:$0xff] }
0x1a98   : > { %4825 = vmatprep.subr.bf16.mxu1 %v7270_v50  ;;  %4878 = vmatprep.subr.bf16.mxu0 %v7272_v61  ;;  %v3972_v14 = vld [vmem:[%s9549_s26 + $0x368] sm:$0xff]  ;;  %v7305_v50 = vcombine.low %v3979_v42, %v3987_v43  ;;  %v7307_v61 = vcombine.low %v3980_v10, %v3988_v34  ;;  %v7210_v42 = vcombine.high %v3883_v25, %v3891_v30  ;;  %v3867_v10 = vld [vmem:[%s9549_s26 + $0x20] sm:$0xff] }
0x1a99   : > { %v7292_v52 = vcombine.high %v3964_v12, %v3972_v14  ;;  %v3875_v34 = vld [vmem:[%s9549_s26 + $0x60] sm:$0xff] }
0x1a9a   : > { %4758 = vmatmul.mubr.bf16.gmra.mxu1 %v10129_v22  ;;  %4811 = vmatmul.mubr.bf16.gmra.mxu0 %v10129_v22 }
0x1a9b   : > { %4826 = vmatpush1.bf16.msra.mxu1 %v7269_v15  ;;  %4879 = vmatpush1.bf16.msra.mxu0 %v7271_v20  ;;  %v3948_v15 = vld [vmem:[%s9549_s26 + $0x2a8] sm:$0xff] }
0x1a9c   : > { %4827 = vmatprep.subr.bf16.mxu1 %v7254_v60  ;;  %4880 = vmatprep.subr.bf16.mxu0 %v7256_v54  ;;  %v3956_v20 = vld [vmem:[%s9549_s26 + $0x2e8] sm:$0xff]  ;;  %v7289_v60 = vcombine.low %v3963_v7, %v3971_v11  ;;  %v7291_v54 = vcombine.low %v3964_v12, %v3972_v14  ;;  %v7194_v7 = vcombine.high %v3867_v10, %v3875_v34  ;;  %v3981_v12 = vld [vmem:[%s9549_s26 + $0x3b0] sm:$0xff] }
0x1a9d   : > { %4853 = vmatprep.mubr.bf16.mxu1 %v8972_v6  ;;  %4906 = vmatprep.mubr.bf16.mxu0 %v8972_v6  ;;  %v7276_v62 = vcombine.high %v3948_v15, %v3956_v20  ;;  %v3989_v14 = vld [vmem:[%s9549_s26 + $0x3f0] sm:$0xff] }
0x1a9f   : > { %4828 = vmatpush1.bf16.msra.mxu1 %v7253_v1  ;;  %4881 = vmatpush1.bf16.msra.mxu0 %v7255_v3  ;;  %v3932_v1 = vld [vmem:[%s9549_s26 + $0x228] sm:$0xff] }
0x1aa0   : > { %4829 = vmatprep.subr.bf16.mxu1 %v7238_v8  ;;  %4882 = vmatprep.subr.bf16.mxu0 %v7240_v13  ;;  %v3940_v3 = vld [vmem:[%s9549_s26 + $0x268] sm:$0xff]  ;;  %v7273_v8 = vcombine.low %v3947_v53, %v3955_v49  ;;  %v7275_v13 = vcombine.low %v3948_v15, %v3956_v20  ;;  %v7310_v53 = vcombine.high %v3981_v12, %v3989_v14  ;;  %v3965_v15 = vld [vmem:[%s9549_s26 + $0x330] sm:$0xff] }
0x1aa1   : > { %v7260_v18 = vcombine.high %v3932_v1, %v3940_v3  ;;  %v3973_v20 = vld [vmem:[%s9549_s26 + $0x370] sm:$0xff] }
0x1aa3   : > { %4830 = vmatpush1.bf16.msra.mxu1 %v7237_v36  ;;  %4883 = vmatpush1.bf16.msra.mxu0 %v7239_v37  ;;  %v3916_v36 = vld [vmem:[%s9549_s26 + $0x1a8] sm:$0xff] }
0x1aa4   : > { %4831 = vmatprep.subr.bf16.mxu1 %v7222_v26  ;;  %4884 = vmatprep.subr.bf16.mxu0 %v7224_v41  ;;  %v3924_v37 = vld [vmem:[%s9549_s26 + $0x1e8] sm:$0xff]  ;;  %v7257_v26 = vcombine.low %v3931_v63, %v3939_v0  ;;  %v7259_v41 = vcombine.low %v3932_v1, %v3940_v3  ;;  %v7294_v63 = vcombine.high %v3965_v15, %v3973_v20  ;;  %v3949_v1 = vld [vmem:[%s9549_s26 + $0x2b0] sm:$0xff] }
0x1aa5   : > { %v7244_v40 = vcombine.high %v3916_v36, %v3924_v37  ;;  %v3957_v3 = vld [vmem:[%s9549_s26 + $0x2f0] sm:$0xff] }
0x1aa7   : > { %4832 = vmatpush1.bf16.msra.mxu1 %v7221_v58  ;;  %4885 = vmatpush1.bf16.msra.mxu0 %v7223_v29  ;;  %v3900_v58 = vld [vmem:[%s9549_s26 + $0x128] sm:$0xff] }
0x1aa8   : > { %4833 = vmatprep.subr.bf16.mxu1 %v7206_v45  ;;  %4886 = vmatprep.subr.bf16.mxu0 %v7208_v32  ;;  %v3908_v29 = vld [vmem:[%s9549_s26 + $0x168] sm:$0xff]  ;;  %v7241_v45 = vcombine.low %v3915_v19, %v3923_v23  ;;  %v7243_v32 = vcombine.low %v3916_v36, %v3924_v37  ;;  %v7278_v19 = vcombine.high %v3949_v1, %v3957_v3  ;;  %v3933_v36 = vld [vmem:[%s9549_s26 + $0x230] sm:$0xff] }
0x1aa9   : > { %v7228_v24 = vcombine.high %v3900_v58, %v3908_v29  ;;  %v3941_v37 = vld [vmem:[%s9549_s26 + $0x270] sm:$0xff] }
0x1aab   : > { %4834 = vmatpush1.bf16.msra.mxu1 %v7205_v33  ;;  %4887 = vmatpush1.bf16.msra.mxu0 %v7207_v2  ;;  %v3884_v33 = vld [vmem:[%s9549_s26 + $0xa8] sm:$0xff] }
0x1aac   : > { %4835 = vmatprep.subr.bf16.mxu1 %v7190_v35  ;;  %4888 = vmatprep.subr.bf16.mxu0 %v7192_v4  ;;  %v3892_v2 = vld [vmem:[%s9549_s26 + $0xe8] sm:$0xff]  ;;  %v7225_v35 = vcombine.low %v3899_v27, %v3907_v28  ;;  %v7227_v4 = vcombine.low %v3900_v58, %v3908_v29  ;;  %v7262_v27 = vcombine.high %v3933_v36, %v3941_v37  ;;  %v3917_v58 = vld [vmem:[%s9549_s26 + $0x1b0] sm:$0xff] }
0x1aad   : > { %v7212_v43 = vcombine.high %v3884_v33, %v3892_v2  ;;  %v3925_v29 = vld [vmem:[%s9549_s26 + $0x1f0] sm:$0xff] }
0x1aaf   : > { %4836 = vmatpush1.bf16.msra.mxu1 %v7189_v59  ;;  %4889 = vmatpush1.bf16.msra.mxu0 %v7191_v39  ;;  %v3868_v59 = vld [vmem:[%s9549_s26 + $0x28] sm:$0xff] }
0x1ab0   : > { %4927 = vmatprep.subr.bf16.mxu1 %v7306_v5  ;;  %4980 = vmatprep.subr.bf16.mxu0 %v7308_v16  ;;  %v3876_v39 = vld [vmem:[%s9549_s26 + $0x68] sm:$0xff]  ;;  %v7209_v5 = vcombine.low %v3883_v25, %v3891_v30  ;;  %v7211_v16 = vcombine.low %v3884_v33, %v3892_v2  ;;  %v7246_v25 = vcombine.high %v3917_v58, %v3925_v29  ;;  %v3901_v33 = vld [vmem:[%s9549_s26 + $0x130] sm:$0xff] }
0x1ab1   : > { %v7196_v11 = vcombine.high %v3868_v59, %v3876_v39  ;;  %v3909_v2 = vld [vmem:[%s9549_s26 + $0x170] sm:$0xff] }
0x1ab2   : > { %4854 = vmatmul.mubr.bf16.vlgmr.msra.gmra.mxu1 %v10109_v38  ;;  %4907 = vmatmul.mubr.bf16.vlgmr.msra.gmra.mxu0 %v10109_v38 }
0x1ab3   : > { %4928 = vmatpush1.bf16.msra.mxu1 %v7305_v50  ;;  %4981 = vmatpush1.bf16.msra.mxu0 %v7307_v61  ;;  %v3982_v50 = vld [vmem:[%s9549_s26 + $0x3b8] sm:$0xff] }
0x1ab4   : > { %4929 = vmatprep.subr.bf16.mxu1 %v7290_v9  ;;  %4982 = vmatprep.subr.bf16.mxu0 %v7292_v52  ;;  %v3990_v61 = vld [vmem:[%s9549_s26 + $0x3f8] sm:$0xff]  ;;  %v7193_v9 = vcombine.low %v3867_v10, %v3875_v34  ;;  %v7195_v52 = vcombine.low %v3868_v59, %v3876_v39  ;;  %v7230_v10 = vcombine.high %v3901_v33, %v3909_v2  ;;  %v3885_v59 = vld [vmem:[%s9549_s26 + $0xb0] sm:$0xff] }
0x1ab5   : > { %4863 = vmatprep.mubr.bf16.mxu1 %v8972_v6  ;;  %4916 = vmatprep.mubr.bf16.mxu0 %v8972_v6  ;;  %v7312_v49 = vcombine.high %v3982_v50, %v3990_v61  ;;  %v3893_v39 = vld [vmem:[%s9549_s26 + $0xf0] sm:$0xff] }
0x1ab7   : > { %4930 = vmatpush1.bf16.msra.mxu1 %v7289_v60  ;;  %4983 = vmatpush1.bf16.msra.mxu0 %v7291_v54  ;;  %v3966_v60 = vld [vmem:[%s9549_s26 + $0x338] sm:$0xff] }
0x1ab8   : > { %4931 = vmatprep.subr.bf16.mxu1 %v7274_v56  ;;  %4984 = vmatprep.subr.bf16.mxu0 %v7276_v62  ;;  %v3974_v54 = vld [vmem:[%s9549_s26 + $0x378] sm:$0xff]  ;;  %v7309_v56 = vcombine.low %v3981_v12, %v3989_v14  ;;  %v7311_v62 = vcombine.low %v3982_v50, %v3990_v61  ;;  %v7214_v12 = vcombine.high %v3885_v59, %v3893_v39  ;;  %v3869_v50 = vld [vmem:[%s9549_s26 + $0x30] sm:$0xff] }
0x1ab9   : > { %v7296_v0 = vcombine.high %v3966_v60, %v3974_v54  ;;  %v3877_v61 = vld [vmem:[%s9549_s26 + $0x70] sm:$0xff] }
0x1aba   : > { %4864 = vmatmul.mubr.bf16.gmra.mxu1 %v10129_v22  ;;  %4917 = vmatmul.mubr.bf16.gmra.mxu0 %v10129_v22 }
0x1abb   : > { %4932 = vmatpush1.bf16.msra.mxu1 %v7273_v8  ;;  %4985 = vmatpush1.bf16.msra.mxu0 %v7275_v13  ;;  %v3950_v8 = vld [vmem:[%s9549_s26 + $0x2b8] sm:$0xff] }
0x1abc   : > { %4933 = vmatprep.subr.bf16.mxu1 %v7258_v17  ;;  %4986 = vmatprep.subr.bf16.mxu0 %v7260_v18  ;;  %v3958_v13 = vld [vmem:[%s9549_s26 + $0x2f8] sm:$0xff]  ;;  %v7293_v17 = vcombine.low %v3965_v15, %v3973_v20  ;;  %v7295_v18 = vcombine.low %v3966_v60, %v3974_v54  ;;  %v7198_v15 = vcombine.high %v3869_v50, %v3877_v61 }
0x1abd   : > { %4959 = vmatprep.mubr.bf16.mxu1 %v8972_v6  ;;  %5012 = vmatprep.mubr.bf16.mxu0 %v8972_v6  ;;  %v7280_v23 = vcombine.high %v3950_v8, %v3958_v13  ;;  %v7197_v60 = vcombine.low %v3869_v50, %v3877_v61 }
0x1abf   : > { %4934 = vmatpush1.bf16.msra.mxu1 %v7257_v26  ;;  %4987 = vmatpush1.bf16.msra.mxu0 %v7259_v41  ;;  %v3934_v26 = vld [vmem:[%s9549_s26 + $0x238] sm:$0xff] }
0x1ac0   : > { %4935 = vmatprep.subr.bf16.mxu1 %v7242_v57  ;;  %4988 = vmatprep.subr.bf16.mxu0 %v7244_v40  ;;  %v3942_v41 = vld [vmem:[%s9549_s26 + $0x278] sm:$0xff]  ;;  %v7277_v57 = vcombine.low %v3949_v1, %v3957_v3  ;;  %v7279_v40 = vcombine.low %v3950_v8, %v3958_v13  ;;  %v8189_v1 = vld [vmem:[%s9553_s7 + $0x70] sm:$0xff]  }
0x1ac1   : > { %v7264_v28 = vcombine.high %v3934_v26, %v3942_v41  ;;  %v8190_v3 = vld [vmem:[%s9553_s7 + $0xf0] sm:$0xff]  }
0x1ac2   : > { %v8191_v8 = vld [vmem:[%s9553_s7 + $0x30] sm:$0xff]  }
0x1ac3   : > { %4936 = vmatpush1.bf16.msra.mxu1 %v7241_v45  ;;  %4989 = vmatpush1.bf16.msra.mxu0 %v7243_v32  ;;  %v3918_v45 = vld [vmem:[%s9549_s26 + $0x1b8] sm:$0xff]  ;;  %v8192_v13 = vld [vmem:[%s9553_s7 + $0xb0] sm:$0xff]  }
0x1ac4   : > { %4937 = vmatprep.subr.bf16.mxu1 %v7226_v21  ;;  %4990 = vmatprep.subr.bf16.mxu0 %v7228_v24  ;;  %v3926_v32 = vld [vmem:[%s9549_s26 + $0x1f8] sm:$0xff]  ;;  %v7261_v21 = vcombine.low %v3933_v36, %v3941_v37  ;;  %v7263_v24 = vcombine.low %v3934_v26, %v3942_v41  ;;  %v8199_v36 = vld [vmem:[%s9553_s7 + $0x20] sm:$0xff]  }
0x1ac5   : > { %v7248_v30 = vcombine.high %v3918_v45, %v3926_v32  ;;  %v8200_v37 = vld [vmem:[%s9553_s7 + $0xa0] sm:$0xff]   ;;  %v8201_v26 = vld [vmem:[%s9553_s7 + $0x58] sm:$0xff]  }
0x1ac6   : > { %v8202_v41 = vld [vmem:[%s9553_s7 + $0xd8] sm:$0xff]  }
0x1ac7   : > { %4938 = vmatpush1.bf16.msra.mxu1 %v7225_v35  ;;  %4991 = vmatpush1.bf16.msra.mxu0 %v7227_v4  ;;  %v3902_v35 = vld [vmem:[%s9549_s26 + $0x138] sm:$0xff] }
0x1ac8   : > { %4939 = vmatprep.subr.bf16.mxu1 %v7210_v42  ;;  %4992 = vmatprep.subr.bf16.mxu0 %v7212_v43  ;;  %v3910_v4 = vld [vmem:[%s9549_s26 + $0x178] sm:$0xff]  ;;  %v7245_v42 = vcombine.low %v3917_v58, %v3925_v29  ;;  %v7247_v43 = vcombine.low %v3918_v45, %v3926_v32  ;;  %v8208_v58 = vld [vmem:[%s9553_s7 + $0x90] sm:$0xff]   ;;  %v8209_v29 = vld [vmem:[%s9553_s7 + $0x48] sm:$0xff]  }
0x1ac9   : > { %v7232_v34 = vcombine.high %v3902_v35, %v3910_v4  ;;  %v8210_v45 = vld [vmem:[%s9553_s7 + $0xc8] sm:$0xff]  }
0x1aca   : > { %v8211_v32 = vld [vmem:[%s9553_s7 + $0x8] sm:$0xff]  }
0x1acb   : > { %4940 = vmatpush1.bf16.msra.mxu1 %v7209_v5  ;;  %4993 = vmatpush1.bf16.msra.mxu0 %v7211_v16  ;;  %v3886_v5 = vld [vmem:[%s9549_s26 + $0xb8] sm:$0xff] }
0x1acc   : > { %4941 = vmatprep.subr.bf16.mxu1 %v7194_v7  ;;  %4994 = vmatprep.subr.bf16.mxu0 %v7196_v11  ;;  %v3894_v16 = vld [vmem:[%s9549_s26 + $0xf8] sm:$0xff]  ;;  %v7229_v7 = vcombine.low %v3901_v33, %v3909_v2  ;;  %v7231_v11 = vcombine.low %v3902_v35, %v3910_v4  ;;  %v8216_v33 = vld [vmem:[%s9553_s7 + $0x80] sm:$0xff]   ;;  %v4009_v4 = vsub.s32 3, %v9592_v47 }
0x1acd   : > { %v7216_v14 = vcombine.high %v3886_v5, %v3894_v16  ;;  %v8217_v2 = vld [vmem:[%s9553_s7 + $0x178] sm:$0xff]  }
0x1ace   : > { %v8218_v35 = vld [vmem:[%s9553_s7 + $0x1f8] sm:$0xff]  }
0x1acf   : > { %4942 = vmatpush1.bf16.msra.mxu1 %v7193_v9  ;;  %4995 = vmatpush1.bf16.msra.mxu0 %v7195_v52  ;;  %v3870_v9 = vld [vmem:[%s9549_s26 + $0x38] sm:$0xff] }
0x1ad0   : > { %5033 = vmatprep.subr.bf16.mxu1 %v7310_v53  ;;  %5086 = vmatprep.subr.bf16.mxu0 %v7312_v49  ;;  %v3878_v52 = vld [vmem:[%s9549_s26 + $0x78] sm:$0xff]  ;;  %v7213_v53 = vcombine.low %v3885_v59, %v3893_v39  ;;  %v7215_v49 = vcombine.low %v3886_v5, %v3894_v16 }
0x1ad1   : > { %v7200_v20 = vcombine.high %v3870_v9, %v3878_v52  ;;  %v7199_v54 = vcombine.low %v3870_v9, %v3878_v52 }
0x1ad2   : > { %4960 = vmatmul.mubr.bf16.vlgmr.msra.gmra.mxu1 %v10109_v38  ;;  %5013 = vmatmul.mubr.bf16.vlgmr.msra.gmra.mxu0 %v10109_v38 }
0x1ad3   : > { %5034 = vmatpush1.bf16.msra.mxu1 %v7309_v56  ;;  %5087 = vmatpush1.bf16.msra.mxu0 %v7311_v62  ;;  %v8185_v56 = vld [vmem:[%s9553_s7 + $0x78] sm:$0xff]  }
0x1ad4   : > { %5035 = vmatprep.subr.bf16.mxu1 %v7294_v63  ;;  %5088 = vmatprep.subr.bf16.mxu0 %v7296_v0  ;;  %v8186_v62 = vld [vmem:[%s9553_s7 + $0xf8] sm:$0xff]  }
0x1ad5   : > { %4969 = vmatprep.mubr.bf16.mxu1 %v8972_v6  ;;  %5022 = vmatprep.mubr.bf16.mxu0 %v8972_v6  ;;  %v8187_v63 = vld [vmem:[%s9553_s7 + $0x38] sm:$0xff]  }
0x1ad6   : > { %v8188_v0 = vld [vmem:[%s9553_s7 + $0xb8] sm:$0xff]  }
0x1ad7   : > { %5036 = vmatpush1.bf16.msra.mxu1 %v7293_v17  ;;  %5089 = vmatpush1.bf16.msra.mxu0 %v7295_v18  ;;  %v8193_v17 = vld [vmem:[%s9553_s7 + $0x68] sm:$0xff]  }
0x1ad8   : > { %5037 = vmatprep.subr.bf16.mxu1 %v7278_v19  ;;  %5090 = vmatprep.subr.bf16.mxu0 %v7280_v23  ;;  %v8194_v18 = vld [vmem:[%s9553_s7 + $0xe8] sm:$0xff]   ;;  %v8198_v23 = vld [vmem:[%s9553_s7 + $0xe0] sm:$0xff]  }
0x1ad9   : > { %v8196_v19 = vld [vmem:[%s9553_s7 + $0xa8] sm:$0xff]  }
0x1ada   : > { %4970 = vmatmul.mubr.bf16.gmra.mxu1 %v10129_v22  ;;  %5023 = vmatmul.mubr.bf16.gmra.mxu0 %v10129_v22 }
0x1adb   : > { %5038 = vmatpush1.bf16.msra.mxu1 %v7277_v57  ;;  %5091 = vmatpush1.bf16.msra.mxu0 %v7279_v40  ;;  %v8203_v57 = vld [vmem:[%s9553_s7 + $0x18] sm:$0xff]  }
0x1adc   : > { %5039 = vmatprep.subr.bf16.mxu1 %v7262_v27  ;;  %5092 = vmatprep.subr.bf16.mxu0 %v7264_v28  ;;  %v8204_v40 = vld [vmem:[%s9553_s7 + $0x98] sm:$0xff]   ;;  %v8206_v27 = vld [vmem:[%s9553_s7 + $0xd0] sm:$0xff]  }
0x1add   : > { %5065 = vmatprep.mubr.bf16.mxu1 %v8972_v6  ;;  %5118 = vmatprep.mubr.bf16.mxu0 %v8972_v6  ;;  %v8207_v28 = vld [vmem:[%s9553_s7 + $0x10] sm:$0xff]  }
0x1adf   : > { %5040 = vmatpush1.bf16.msra.mxu1 %v7261_v21  ;;  %5093 = vmatpush1.bf16.msra.mxu0 %v7263_v24  ;;  %v8212_v21 = vld [vmem:[%s9553_s7 + $0x88] sm:$0xff]   ;;  %v8213_v24 = vld [vmem:[%s9553_s7 + $0x40] sm:$0xff]  }
0x1ae0   : > { %5041 = vmatprep.subr.bf16.mxu1 %v7246_v25  ;;  %5094 = vmatprep.subr.bf16.mxu0 %v7248_v30  ;;  %v8214_v25 = vld [vmem:[%s9553_s7 + $0xc0] sm:$0xff]  }
0x1ae1   : > { %v8215_v30 = vld [vmem:[%s9553_s7] sm:$0xff]  }
0x1ae3   : > { %5042 = vmatpush1.bf16.msra.mxu1 %v7245_v42  ;;  %5095 = vmatpush1.bf16.msra.mxu0 %v7247_v43  ;;  %v4005_v42 = vsub.s32 2, %v9592_v47  ;;  %v10274_v43 = vld [vmem:[%s9551_s21] sm:$0xff] }
0x1ae4   : > { %5043 = vmatprep.subr.bf16.mxu1 %v7230_v10  ;;  %5096 = vmatprep.subr.bf16.mxu0 %v7232_v34  ;;  %v4002_v59 = vrot.slane %v10274_v43, %v9595_v48  ;;  %v4010_v39 = vrot.slane %v10274_v43, %v4009_v4  ;;  %v3998_v5 = vrot.slane %v10274_v43, %v9600_v55 }
0x1ae5   : > { %v4006_v16 = vrot.slane %v10274_v43, %v4005_v42 }
0x1ae7   : > { %5044 = vmatpush1.bf16.msra.mxu1 %v7229_v7  ;;  %5097 = vmatpush1.bf16.msra.mxu0 %v7231_v11 }
0x1ae8   : > { %5045 = vmatprep.subr.bf16.mxu1 %v7214_v12  ;;  %5098 = vmatprep.subr.bf16.mxu0 %v7216_v14 }
0x1aeb   : > { %5046 = vmatpush1.bf16.msra.mxu1 %v7213_v53  ;;  %5099 = vmatpush1.bf16.msra.mxu0 %v7215_v49 }
0x1aec   : > { %5047 = vmatprep.subr.bf16.mxu1 %v7198_v15  ;;  %5100 = vmatprep.subr.bf16.mxu0 %v7200_v20 }
0x1aef   : > { %5048 = vmatpush1.bf16.msra.mxu1 %v7197_v60  ;;  %5101 = vmatpush1.bf16.msra.mxu0 %v7199_v54 }
0x1af0   : > { %7554 = vmatprep.subr.bf16.mxu1 %v8185_v56  ;;  %7582 = vmatprep.subr.bf16.mxu0 %v8186_v62 }
0x1af2   : > { %5066 = vmatmul.mubr.bf16.vlgmr.msra.gmra.mxu1 %v10109_v38  ;;  %5119 = vmatmul.mubr.bf16.vlgmr.msra.gmra.mxu0 %v10109_v38  ;;  %v8195_v38 = vld [vmem:[%s9553_s7 + $0x28] sm:$0xff]  }
0x1af3   : > { %5075 = vmatprep.mubr.bf16.mxu1 %v8972_v6  ;;  %5128 = vmatprep.mubr.bf16.mxu0 %v8972_v6  ;;  %v8197_v6 = vld [vmem:[%s9553_s7 + $0x60] sm:$0xff]  }
0x1af4   : > { %7555 = vmatpush3.bf16.msra.mxu1 %v8187_v63  ;;  %7583 = vmatpush3.bf16.msra.mxu0 %v8188_v0 }
0x1af5   : > { %7556 = vmatprep.subr.bf16.mxu1 %v8189_v1  ;;  %7584 = vmatprep.subr.bf16.mxu0 %v8190_v3 }
0x1af8   : > { %7557 = vmatpush3.bf16.msra.mxu1 %v8191_v8  ;;  %7585 = vmatpush3.bf16.msra.mxu0 %v8192_v13 }
0x1af9   : > { %7558 = vmatprep.subr.bf16.mxu1 %v8193_v17  ;;  %7586 = vmatprep.subr.bf16.mxu0 %v8194_v18 }
0x1afa   : > { %5076 = vmatmul.mubr.bf16.gmra.mxu1 %v10129_v22  ;;  %5129 = vmatmul.mubr.bf16.gmra.mxu0 %v10129_v22  ;;  %v8205_v22 = vld [vmem:[%s9553_s7 + $0x50] sm:$0xff]  }
0x1afc   : > { %7559 = vmatpush3.bf16.msra.mxu1 %v8195_v38  ;;  %7587 = vmatpush3.bf16.msra.mxu0 %v8196_v19 }
0x1afd   : > { %7560 = vmatprep.subr.bf16.mxu1 %v8197_v6  ;;  %7588 = vmatprep.subr.bf16.mxu0 %v8198_v23 }
0x1b00   : > { %7561 = vmatpush3.bf16.msra.mxu1 %v8199_v36  ;;  %7589 = vmatpush3.bf16.msra.mxu0 %v8200_v37  ;;  %v8219_v36 = vld [vmem:[%s9553_s7 + $0x138] sm:$0xff]  }
0x1b01   : > { %7562 = vmatprep.subr.bf16.mxu1 %v8201_v26  ;;  %7590 = vmatprep.subr.bf16.mxu0 %v8202_v41  ;;  %v8220_v37 = vld [vmem:[%s9553_s7 + $0x1b8] sm:$0xff]  }
0x1b04   : > { %7563 = vmatpush3.bf16.msra.mxu1 %v8203_v57  ;;  %7591 = vmatpush3.bf16.msra.mxu0 %v8204_v40 }
0x1b05   : > { %7564 = vmatprep.subr.bf16.mxu1 %v8205_v22  ;;  %7592 = vmatprep.subr.bf16.mxu0 %v8206_v27  ;;  %v8221_v27 = vld [vmem:[%s9553_s7 + $0x170] sm:$0xff]  }
0x1b08   : > { %7565 = vmatpush3.bf16.msra.mxu1 %v8207_v28  ;;  %7593 = vmatpush3.bf16.msra.mxu0 %v8208_v58  ;;  %v8222_v28 = vld [vmem:[%s9553_s7 + $0x1f0] sm:$0xff]  }
0x1b09   : > { %7566 = vmatprep.subr.bf16.mxu1 %v8209_v29  ;;  %7594 = vmatprep.subr.bf16.mxu0 %v8210_v45 }
0x1b0c   : > { %7567 = vmatpush3.bf16.msra.mxu1 %v8211_v32  ;;  %7595 = vmatpush3.bf16.msra.mxu0 %v8212_v21 }
0x1b0d   : > { %7568 = vmatprep.subr.bf16.mxu1 %v8213_v24  ;;  %7596 = vmatprep.subr.bf16.mxu0 %v8214_v25 }
0x1b10   : > { %7569 = vmatpush3.bf16.msra.mxu1 %v8215_v30  ;;  %7597 = vmatpush3.bf16.msra.mxu0 %v8216_v33 }
0x1b11   : > { %7610 = vmatprep.subr.bf16.mxu1 %v8217_v2  ;;  %7638 = vmatprep.subr.bf16.mxu0 %v8218_v35  ;;  %v8223_v2 = vld [vmem:[%s9553_s7 + $0x130] sm:$0xff]  }
0x1b12   : > { %v8224_v35 = vld [vmem:[%s9553_s7 + $0x1b0] sm:$0xff]  }
0x1b52   : > { %v4749_v10 = vpop.f32.mrf.mxu1  ;;  %v4802_v34 = vpop.f32.mrf.mxu0 }
0x1b53   : > { %v4750_v53 = vadd.f32 %v4749_v10, %v3998_v5  ;;  %v4803_v49 = vadd.f32 %v4802_v34, %v4006_v16 }
0x1b54   : > { %v4751_v7 = vpop.f32.mrf.mxu1  ;;  %v4804_v11 = vpop.f32.mrf.mxu0 }
0x1b55   : > { %v4752_v50 = vadd.f32 %v4751_v7, %v4002_v59  ;;  %v4805_v61 = vadd.f32 %v4804_v11, %v4010_v39  ;;  %v5139_v17 = vmax.f32 %v4750_v53, 0.0  ;;  %v5141_v18 = vmax.f32 %v4803_v49, 0.0  ;;  %v8226_v7 = vld [vmem:[%s9553_s7 + $0x1e8] sm:$0xff]  }
0x1b56   : > { %v4753_v12 = vpop.f32.mrf.mxu1  ;;  %v4806_v14 = vpop.f32.mrf.mxu0 }
0x1b57   : > { %v4754_v9 = vadd.f32 %v4753_v12, %v3998_v5  ;;  %v4807_v52 = vadd.f32 %v4806_v14, %v4006_v16  ;;  %v5140_v1 = vmax.f32 %v4752_v50, 0.0  ;;  %v5142_v3 = vmax.f32 %v4805_v61, 0.0 }
0x1b58   : > { %v4755_v15 = vpop.f32.mrf.mxu1  ;;  %v4808_v20 = vpop.f32.mrf.mxu0 }
0x1b59   : > { %v4756_v60 = vadd.f32 %v4755_v15, %v4002_v59  ;;  %v4809_v54 = vadd.f32 %v4808_v20, %v4010_v39  ;;  %v5155_v56 = vmax.f32 %v4754_v9, 0.0  ;;  %v5157_v62 = vmax.f32 %v4807_v52, 0.0  ;;  %v8227_v9 = vld [vmem:[%s9553_s7 + $0x128] sm:$0xff]   ;;  %v8229_v15 = vld [vmem:[%s9553_s7 + $0x160] sm:$0xff]  }
0x1b5a   : > { %v4759_v63 = vpop.f32.mrf.mxu1  ;;  %v4812_v0 = vpop.f32.mrf.mxu0  ;;  %v8228_v52 = vld [vmem:[%s9553_s7 + $0x1a8] sm:$0xff]   ;;  %v8230_v20 = vld [vmem:[%s9553_s7 + $0x1e0] sm:$0xff]  }
0x1b5b   : > { %v5156_v8 = vmax.f32 %v4756_v60, 0.0  ;;  %v5158_v13 = vmax.f32 %v4809_v54, 0.0  ;;  %v5203_v26 = vpack.c.bf16 %v5155_v56, %v5139_v17  ;;  %v5205_v41 = vpack.c.bf16 %v5157_v62, %v5141_v18  ;;  %v8231_v60 = vld [vmem:[%s9553_s7 + $0x120] sm:$0xff]   ;;  %v8233_v56 = vld [vmem:[%s9553_s7 + $0x158] sm:$0xff]  }
0x1b5c   : > { %v4761_v38 = vpop.f32.mrf.mxu1  ;;  %v4814_v19 = vpop.f32.mrf.mxu0  ;;  %v4760_v32 = vadd.f32 %v4759_v63, %v3998_v5  ;;  %v4813_v21 = vadd.f32 %v4812_v0, %v4006_v16  ;;  %v8232_v54 = vld [vmem:[%s9553_s7 + $0x1a0] sm:$0xff]   ;;  %v8234_v62 = vld [vmem:[%s9553_s7 + $0x1d8] sm:$0xff]   ;;  %v4013_v17 = vsub.s32 4, %v9592_v47  ;;  %v4021_v18 = vsub.s32 6, %v9592_v47 }
0x1b5d   : > { %v5204_v6 = vpack.c.bf16 %v5156_v8, %v5140_v1  ;;  %v5206_v23 = vpack.c.bf16 %v5158_v13, %v5142_v3  ;;  %v4762_v57 = vadd.f32 %v4761_v38, %v4002_v59  ;;  %v4815_v58 = vadd.f32 %v4814_v19, %v4010_v39  ;;  %v8235_v63 = vld [vmem:[%s9553_s7 + $0x118] sm:$0xff]   ;;  %v8237_v1 = vld [vmem:[%s9553_s7 + $0x150] sm:$0xff]  }
0x1b5e   : > { %v4763_v40 = vpop.f32.mrf.mxu1  ;;  %v4816_v22 = vpop.f32.mrf.mxu0  ;;  %v8236_v0 = vld [vmem:[%s9553_s7 + $0x198] sm:$0xff]   ;;  %v8238_v3 = vld [vmem:[%s9553_s7 + $0x1d0] sm:$0xff]   ;;  %v4017_v8 = vsub.s32 5, %v9592_v47  ;;  %v4025_v13 = vsub.s32 7, %v9592_v47 }
0x1b5f   : > { %v4764_v29 = vadd.f32 %v4763_v40, %v3998_v5  ;;  %v4817_v45 = vadd.f32 %v4816_v22, %v4006_v16  ;;  %6298 = vmatprep.mubr.bf16.mxu1 %v5204_v6  ;;  %6347 = vmatprep.mubr.bf16.mxu0 %v5206_v23  ;;  %v8225_v5 = vld [vmem:[%s9553_s7 + $0x168] sm:$0xff]   ;;  %v5172_v16 = vmax.f32 %v4762_v57, 0.0  ;;  %v5174_v11 = vmax.f32 %v4815_v58, 0.0  ;;  %v8239_v38 = vld [vmem:[%s9553_s7 + $0x110] sm:$0xff]  }
0x1b60   : > { %v4765_v24 = vpop.f32.mrf.mxu1  ;;  %v4818_v25 = vpop.f32.mrf.mxu0  ;;  %6299 = vmatmul.mubr.bf16.vlgmr.msra.gmra.mxu1 %v5203_v26  ;;  %6348 = vmatmul.mubr.bf16.vlgmr.msra.gmra.mxu0 %v5205_v41  ;;  %v8240_v19 = vld [vmem:[%s9553_s7 + $0x190] sm:$0xff]   ;;  %v10317_v26 = vrot.slane %v10274_v43, %v4017_v8  ;;  %v10322_v41 = vrot.slane %v10274_v43, %v4025_v13  ;;  %v10327_v57 = vrot.slane %v10274_v43, %v4013_v17  ;;  %v8244_v58 = vld [vmem:[%s9553_s7 + $0x188] sm:$0xff]  }
0x1b61   : > { %v4766_v30 = vadd.f32 %v4765_v24, %v4002_v59  ;;  %v4819_v33 = vadd.f32 %v4818_v25, %v4010_v39  ;;  %7611 = vmatpush3.bf16.msra.mxu1 %v8219_v36  ;;  %7639 = vmatpush3.bf16.msra.mxu0 %v8220_v37  ;;  %v5187_v10 = vmax.f32 %v4764_v29, 0.0  ;;  %v5189_v34 = vmax.f32 %v4817_v45, 0.0  ;;  %v8241_v36 = vld [vmem:[%s9553_s7 + $0x148] sm:$0xff]  }
0x1b62   : > { %7612 = vmatprep.subr.bf16.mxu1 %v8221_v27  ;;  %7640 = vmatprep.subr.bf16.mxu0 %v8222_v28  ;;  %v5171_v59 = vmax.f32 %v4760_v32, 0.0  ;;  %v5173_v39 = vmax.f32 %v4813_v21, 0.0  ;;  %v8242_v37 = vld [vmem:[%s9553_s7 + $0x1c8] sm:$0xff]   ;;  %v10332_v40 = vrot.slane %v10274_v43, %v4021_v18  ;;  %v8245_v32 = vld [vmem:[%s9553_s7 + $0x140] sm:$0xff]  }
0x1b63   : > { %v5188_v12 = vmax.f32 %v4766_v30, 0.0  ;;  %v5190_v14 = vmax.f32 %v4819_v33, 0.0  ;;  %v8243_v28 = vld [vmem:[%s9553_s7 + $0x108] sm:$0xff]   ;;  %v8246_v21 = vld [vmem:[%s9553_s7 + $0x1c0] sm:$0xff]  }
0x1b64   : > { %v5219_v53 = vpack.c.bf16 %v5187_v10, %v5171_v59  ;;  %v5221_v49 = vpack.c.bf16 %v5189_v34, %v5173_v39  ;;  %v8248_v59 = vld [vmem:[%s9553_s7 + $0x180] sm:$0xff]   ;;  %v8249_v39 = vld [vmem:[%s9553_s7 + $0x278] sm:$0xff]  }
0x1b65   : > { %v5220_v50 = vpack.c.bf16 %v5188_v12, %v5172_v16  ;;  %v5222_v61 = vpack.c.bf16 %v5190_v14, %v5174_v11  ;;  %7613 = vmatpush3.bf16.msra.mxu1 %v8223_v2  ;;  %7641 = vmatpush3.bf16.msra.mxu0 %v8224_v35 }
0x1b66   : > { %7614 = vmatprep.subr.bf16.mxu1 %v8225_v5  ;;  %7642 = vmatprep.subr.bf16.mxu0 %v8226_v7  ;;  %v8247_v7 = vld [vmem:[%s9553_s7 + $0x100] sm:$0xff]  }
0x1b67   : > { %6306 = vmatprep.mubr.bf16.mxu1 %v5220_v50  ;;  %6355 = vmatprep.mubr.bf16.mxu0 %v5222_v61 }
0x1b68   : > { %6307 = vmatmul.mubr.bf16.gmra.mxu1 %v5219_v53  ;;  %6356 = vmatmul.mubr.bf16.gmra.mxu0 %v5221_v49 }
0x1b69   : > { %7615 = vmatpush3.bf16.msra.mxu1 %v8227_v9  ;;  %7643 = vmatpush3.bf16.msra.mxu0 %v8228_v52 }
0x1b6a   : > { %7616 = vmatprep.subr.bf16.mxu1 %v8229_v15  ;;  %7644 = vmatprep.subr.bf16.mxu0 %v8230_v20 }
0x1b6d   : > { %7617 = vmatpush3.bf16.msra.mxu1 %v8231_v60  ;;  %7645 = vmatpush3.bf16.msra.mxu0 %v8232_v54  ;;  %v8250_v60 = vld [vmem:[%s9553_s7 + $0x2f8] sm:$0xff]  }
0x1b6e   : > { %7618 = vmatprep.subr.bf16.mxu1 %v8233_v56  ;;  %7646 = vmatprep.subr.bf16.mxu0 %v8234_v62  ;;  %v8251_v62 = vld [vmem:[%s9553_s7 + $0x238] sm:$0xff]  }
0x1b71   : > { %7619 = vmatpush3.bf16.msra.mxu1 %v8235_v63  ;;  %7647 = vmatpush3.bf16.msra.mxu0 %v8236_v0 }
0x1b72   : > { %v4855_v6 = vpop.f32.mrf.mxu1  ;;  %v4908_v23 = vpop.f32.mrf.mxu0  ;;  %7620 = vmatprep.subr.bf16.mxu1 %v8237_v1  ;;  %7648 = vmatprep.subr.bf16.mxu0 %v8238_v3 }
0x1b73   : > { %v4856_v33 = vadd.f32 %v4855_v6, %v10327_v57  ;;  %v4909_v2 = vadd.f32 %v4908_v23, %v10332_v40  ;;  %v8253_v6 = vld [vmem:[%s9553_s7 + $0x270] sm:$0xff]  }
0x1b74   : > { %v4857_v22 = vpop.f32.mrf.mxu1  ;;  %v4910_v27 = vpop.f32.mrf.mxu0 }
0x1b75   : > { %7621 = vmatpush3.bf16.msra.mxu1 %v8239_v38  ;;  %7649 = vmatpush3.bf16.msra.mxu0 %v8240_v19  ;;  %v4858_v24 = vadd.f32 %v4857_v22, %v10317_v26  ;;  %v4911_v25 = vadd.f32 %v4910_v27, %v10322_v41  ;;  %v5143_v53 = vmax.f32 %v4856_v33, 0.0  ;;  %v5145_v49 = vmax.f32 %v4909_v2, 0.0  ;;  %v8252_v19 = vld [vmem:[%s9553_s7 + $0x2b8] sm:$0xff]   ;;  %v8254_v22 = vld [vmem:[%s9553_s7 + $0x2f0] sm:$0xff]  }
0x1b76   : > { %v4859_v29 = vpop.f32.mrf.mxu1  ;;  %v4912_v45 = vpop.f32.mrf.mxu0  ;;  %7622 = vmatprep.subr.bf16.mxu1 %v8241_v36  ;;  %7650 = vmatprep.subr.bf16.mxu0 %v8242_v37 }
0x1b77   : > { %v4860_v43 = vadd.f32 %v4859_v29, %v10327_v57  ;;  %v4913_v30 = vadd.f32 %v4912_v45, %v10332_v40  ;;  %v5144_v50 = vmax.f32 %v4858_v24, 0.0  ;;  %v5146_v61 = vmax.f32 %v4911_v25, 0.0 }
0x1b78   : > { %v4861_v35 = vpop.f32.mrf.mxu1  ;;  %v4914_v10 = vpop.f32.mrf.mxu0 }
0x1b79   : > { %v4862_v34 = vadd.f32 %v4861_v35, %v10317_v26  ;;  %v4915_v5 = vadd.f32 %v4914_v10, %v10322_v41  ;;  %7623 = vmatpush3.bf16.msra.mxu1 %v8243_v28  ;;  %7651 = vmatpush3.bf16.msra.mxu0 %v8244_v58  ;;  %v5159_v16 = vmax.f32 %v4860_v43, 0.0  ;;  %v5161_v11 = vmax.f32 %v4913_v30, 0.0  ;;  %v8257_v43 = vld [vmem:[%s9553_s7 + $0x268] sm:$0xff]  }
0x1b7a   : > { %v4865_v12 = vpop.f32.mrf.mxu1  ;;  %v4918_v14 = vpop.f32.mrf.mxu0  ;;  %7624 = vmatprep.subr.bf16.mxu1 %v8245_v32  ;;  %7652 = vmatprep.subr.bf16.mxu0 %v8246_v21  ;;  %v8255_v21 = vld [vmem:[%s9553_s7 + $0x230] sm:$0xff]  }
0x1b7b   : > { %v5160_v9 = vmax.f32 %v4862_v34, 0.0  ;;  %v5162_v52 = vmax.f32 %v4915_v5, 0.0  ;;  %v5207_v63 = vpack.c.bf16 %v5159_v16, %v5143_v53  ;;  %v5209_v0 = vpack.c.bf16 %v5161_v11, %v5145_v49  ;;  %v8259_v5 = vld [vmem:[%s9553_s7 + $0x228] sm:$0xff]   ;;  %v8261_v11 = vld [vmem:[%s9553_s7 + $0x260] sm:$0xff]   ;;  %v8269_v53 = vld [vmem:[%s9553_s7 + $0x250] sm:$0xff]  }
0x1b7c   : > { %v4867_v15 = vpop.f32.mrf.mxu1  ;;  %v4920_v20 = vpop.f32.mrf.mxu0  ;;  %v4866_v27 = vadd.f32 %v4865_v12, %v10327_v57  ;;  %v4919_v29 = vadd.f32 %v4918_v14, %v10332_v40  ;;  %v8260_v16 = vld [vmem:[%s9553_s7 + $0x2a8] sm:$0xff]   ;;  %v8262_v14 = vld [vmem:[%s9553_s7 + $0x2e0] sm:$0xff]   ;;  %v8270_v49 = vld [vmem:[%s9553_s7 + $0x2d0] sm:$0xff]  }
0x1b7d   : > { %v5208_v54 = vpack.c.bf16 %v5160_v9, %v5144_v50  ;;  %v5210_v56 = vpack.c.bf16 %v5162_v52, %v5146_v61  ;;  %7625 = vmatpush3.bf16.msra.mxu1 %v8247_v7  ;;  %v4868_v1 = vadd.f32 %v4867_v15, %v10317_v26  ;;  %7653 = vmatpush3.bf16.msra.mxu0 %v8248_v59  ;;  %v8263_v59 = vld [vmem:[%s9553_s7 + $0x220] sm:$0xff]   ;;  %v8265_v50 = vld [vmem:[%s9553_s7 + $0x258] sm:$0xff]  }
0x1b7e   : > { %v4869_v3 = vpop.f32.mrf.mxu1  ;;  %v4922_v38 = vpop.f32.mrf.mxu0  ;;  %7666 = vmatprep.subr.bf16.mxu1 %v8249_v39  ;;  %v4921_v23 = vadd.f32 %v4920_v20, %v10322_v41  ;;  %7694 = vmatprep.subr.bf16.mxu0 %v8250_v60  ;;  %v5177_v35 = vmax.f32 %v4919_v29, 0.0  ;;  %v8264_v39 = vld [vmem:[%s9553_s7 + $0x2a0] sm:$0xff]   ;;  %v8266_v61 = vld [vmem:[%s9553_s7 + $0x2d8] sm:$0xff]   ;;  %v8271_v20 = vld [vmem:[%s9553_s7 + $0x210] sm:$0xff]  }
0x1b7f   : > { %v4870_v36 = vadd.f32 %v4869_v3, %v10327_v57  ;;  %v4923_v37 = vadd.f32 %v4922_v38, %v10332_v40  ;;  %6396 = vmatprep.mubr.bf16.mxu1 %v5208_v54  ;;  %6445 = vmatprep.mubr.bf16.mxu0 %v5210_v56  ;;  %v5176_v24 = vmax.f32 %v4868_v1, 0.0  ;;  %v8256_v57 = vld [vmem:[%s9553_s7 + $0x2b0] sm:$0xff]   ;;  %v8267_v9 = vld [vmem:[%s9553_s7 + $0x218] sm:$0xff]   ;;  %v8274_v1 = vld [vmem:[%s9553_s7 + $0x2c8] sm:$0xff]  }
0x1b80   : > { %v4871_v28 = vpop.f32.mrf.mxu1  ;;  %v4924_v58 = vpop.f32.mrf.mxu0  ;;  %6397 = vmatmul.mubr.bf16.vlgmr.msra.gmra.mxu1 %v5207_v63  ;;  %6446 = vmatmul.mubr.bf16.vlgmr.msra.gmra.mxu0 %v5209_v0  ;;  %v5178_v30 = vmax.f32 %v4921_v23, 0.0  ;;  %v8268_v52 = vld [vmem:[%s9553_s7 + $0x298] sm:$0xff]   ;;  %v8272_v56 = vld [vmem:[%s9553_s7 + $0x290] sm:$0xff]  }
0x1b81   : > { %v4872_v45 = vadd.f32 %v4871_v28, %v10317_v26  ;;  %v4925_v32 = vadd.f32 %v4924_v58, %v10322_v41  ;;  %7667 = vmatpush3.bf16.msra.mxu1 %v8251_v62  ;;  %v5191_v25 = vmax.f32 %v4870_v36, 0.0  ;;  %7695 = vmatpush3.bf16.msra.mxu0 %v8252_v19  ;;  %v5193_v33 = vmax.f32 %v4923_v37, 0.0  ;;  %v8258_v41 = vld [vmem:[%s9553_s7 + $0x2e8] sm:$0xff]   ;;  %v8277_v37 = vld [vmem:[%s9553_s7 + $0x240] sm:$0xff]  }
0x1b82   : > { %7668 = vmatprep.subr.bf16.mxu1 %v8253_v6  ;;  %7696 = vmatprep.subr.bf16.mxu0 %v8254_v22  ;;  %v5175_v26 = vmax.f32 %v4866_v27, 0.0  ;;  %v10379_v15 = vld [vmem:[%s9551_s21 + $0x8] sm:$0xff]  ;;  %v8278_v28 = vld [vmem:[%s9553_s7 + $0x2c0] sm:$0xff]  }
0x1b83   : > { %v5192_v40 = vmax.f32 %v4872_v45, 0.0  ;;  %v5194_v2 = vmax.f32 %v4925_v32, 0.0  ;;  %v5225_v12 = vpack.c.bf16 %v5193_v33, %v5177_v35  ;;  %v8273_v62 = vld [vmem:[%s9553_s7 + $0x248] sm:$0xff]   ;;  %v10386_v63 = vrot.slane %v10379_v15, %v9595_v48 }
0x1b84   : > { %v5223_v7 = vpack.c.bf16 %v5191_v25, %v5175_v26  ;;  %v10391_v0 = vrot.slane %v10379_v15, %v4009_v4  ;;  %v10396_v3 = vrot.slane %v10379_v15, %v9600_v55  ;;  %v10401_v38 = vrot.slane %v10379_v15, %v4005_v42  ;;  %v8275_v6 = vld [vmem:[%s9553_s7 + $0x208] sm:$0xff]   ;;  %v8279_v25 = vld [vmem:[%s9553_s7 + $0x200] sm:$0xff]  }
0x1b85   : > { %v5224_v10 = vpack.c.bf16 %v5192_v40, %v5176_v24  ;;  %v5226_v34 = vpack.c.bf16 %v5194_v2, %v5178_v30  ;;  %7669 = vmatpush3.bf16.msra.mxu1 %v8255_v21  ;;  %7697 = vmatpush3.bf16.msra.mxu0 %v8256_v57  ;;  %v8276_v36 = vld [vmem:[%s9553_s7 + $0x288] sm:$0xff]   ;;  %v8280_v40 = vld [vmem:[%s9553_s7 + $0x280] sm:$0xff]   ;;  %v8281_v2 = vld [vmem:[%s9553_s7 + $0x378] sm:$0xff]  }
0x1b86   : > { %7670 = vmatprep.subr.bf16.mxu1 %v8257_v43  ;;  %7698 = vmatprep.subr.bf16.mxu0 %v8258_v41 }
0x1b87   : > { %6404 = vmatprep.mubr.bf16.mxu1 %v5224_v10  ;;  %6453 = vmatprep.mubr.bf16.mxu0 %v5226_v34 }
0x1b88   : > { %6405 = vmatmul.mubr.bf16.gmra.mxu1 %v5223_v7  ;;  %6454 = vmatmul.mubr.bf16.gmra.mxu0 %v5225_v12 }
0x1b89   : > { %7671 = vmatpush3.bf16.msra.mxu1 %v8259_v5  ;;  %7699 = vmatpush3.bf16.msra.mxu0 %v8260_v16 }
0x1b8a   : > { %7672 = vmatprep.subr.bf16.mxu1 %v8261_v11  ;;  %7700 = vmatprep.subr.bf16.mxu0 %v8262_v14  ;;  %v8282_v11 = vld [vmem:[%s9553_s7 + $0x3f8] sm:$0xff]  }
0x1b8d   : > { %7673 = vmatpush3.bf16.msra.mxu1 %v8263_v59  ;;  %7701 = vmatpush3.bf16.msra.mxu0 %v8264_v39  ;;  %v8283_v59 = vld [vmem:[%s9553_s7 + $0x338] sm:$0xff]  }
0x1b8e   : > { %7674 = vmatprep.subr.bf16.mxu1 %v8265_v50  ;;  %7702 = vmatprep.subr.bf16.mxu0 %v8266_v61 }
0x1b91   : > { %7675 = vmatpush3.bf16.msra.mxu1 %v8267_v9  ;;  %7703 = vmatpush3.bf16.msra.mxu0 %v8268_v52 }
0x1b92   : > { %v4961_v60 = vpop.f32.mrf.mxu1  ;;  %v5014_v54 = vpop.f32.mrf.mxu0  ;;  %7676 = vmatprep.subr.bf16.mxu1 %v8269_v53  ;;  %7704 = vmatprep.subr.bf16.mxu0 %v8270_v49  ;;  %v8284_v53 = vld [vmem:[%s9553_s7 + $0x3b8] sm:$0xff]   ;;  %v8285_v49 = vld [vmem:[%s9553_s7 + $0x370] sm:$0xff]  }
0x1b93   : > { %v4962_v58 = vadd.f32 %v4961_v60, %v10396_v3  ;;  %v5015_v29 = vadd.f32 %v5014_v54, %v10401_v38 }
0x1b94   : > { %v4963_v19 = vpop.f32.mrf.mxu1  ;;  %v5016_v48 = vpop.f32.mrf.mxu0 }
0x1b95   : > { %7677 = vmatpush3.bf16.msra.mxu1 %v8271_v20  ;;  %7705 = vmatpush3.bf16.msra.mxu0 %v8272_v56  ;;  %v4964_v55 = vadd.f32 %v4963_v19, %v10386_v63  ;;  %v5017_v22 = vadd.f32 %v5016_v48, %v10391_v0  ;;  %v5147_v34 = vmax.f32 %v4962_v58, 0.0  ;;  %v5149_v5 = vmax.f32 %v5015_v29, 0.0  ;;  %v8286_v56 = vld [vmem:[%s9553_s7 + $0x3f0] sm:$0xff]  }
0x1b96   : > { %v4965_v23 = vpop.f32.mrf.mxu1  ;;  %v5018_v4 = vpop.f32.mrf.mxu0  ;;  %7678 = vmatprep.subr.bf16.mxu1 %v8273_v62  ;;  %7706 = vmatprep.subr.bf16.mxu0 %v8274_v1 }
0x1b97   : > { %v4966_v27 = vadd.f32 %v4965_v23, %v10396_v3  ;;  %v5019_v42 = vadd.f32 %v5018_v4, %v10401_v38  ;;  %v5148_v26 = vmax.f32 %v4964_v55, 0.0  ;;  %v5150_v41 = vmax.f32 %v5017_v22, 0.0  ;;  %v8287_v4 = vld [vmem:[%s9553_s7 + $0x330] sm:$0xff]   ;;  %v8289_v55 = vld [vmem:[%s9553_s7 + $0x368] sm:$0xff]  }
0x1b98   : > { %v4967_v45 = vpop.f32.mrf.mxu1  ;;  %v5020_v32 = vpop.f32.mrf.mxu0 }
0x1b99   : > { %v4968_v21 = vadd.f32 %v4967_v45, %v10386_v63  ;;  %v5021_v24 = vadd.f32 %v5020_v32, %v10391_v0  ;;  %7679 = vmatpush3.bf16.msra.mxu1 %v8275_v6  ;;  %v5163_v57 = vmax.f32 %v4966_v27, 0.0  ;;  %v5165_v43 = vmax.f32 %v5019_v42, 0.0  ;;  %7707 = vmatpush3.bf16.msra.mxu0 %v8276_v36  ;;  %v8291_v45 = vld [vmem:[%s9553_s7 + $0x328] sm:$0xff]  }
0x1b9a   : > { %v4971_v30 = vpop.f32.mrf.mxu1  ;;  %v5024_v33 = vpop.f32.mrf.mxu0  ;;  %7680 = vmatprep.subr.bf16.mxu1 %v8277_v37  ;;  %7708 = vmatprep.subr.bf16.mxu0 %v8278_v28 }
0x1b9b   : > { %v5164_v35 = vmax.f32 %v4968_v21, 0.0  ;;  %v5166_v10 = vmax.f32 %v5021_v24, 0.0  ;;  %v5211_v39 = vpack.c.bf16 %v5163_v57, %v5147_v34  ;;  %v5213_v50 = vpack.c.bf16 %v5165_v43, %v5149_v5  ;;  %v8292_v21 = vld [vmem:[%s9553_s7 + $0x3a8] sm:$0xff]   ;;  %v8293_v24 = vld [vmem:[%s9553_s7 + $0x360] sm:$0xff]  }
0x1b9c   : > { %v4973_v7 = vpop.f32.mrf.mxu1  ;;  %v5026_v16 = vpop.f32.mrf.mxu0  ;;  %v4972_v62 = vadd.f32 %v4971_v30, %v10396_v3  ;;  %v5025_v48 = vadd.f32 %v5024_v33, %v10401_v38  ;;  %v8294_v57 = vld [vmem:[%s9553_s7 + $0x3e0] sm:$0xff]   ;;  %v8297_v33 = vld [vmem:[%s9553_s7 + $0x358] sm:$0xff]  }
0x1b9d   : > { %v5212_v12 = vpack.c.bf16 %v5164_v35, %v5148_v26  ;;  %v5214_v14 = vpack.c.bf16 %v5166_v10, %v5150_v41  ;;  %7681 = vmatpush3.bf16.msra.mxu1 %v8279_v25  ;;  %v4974_v61 = vadd.f32 %v4973_v7, %v10386_v63  ;;  %7709 = vmatpush3.bf16.msra.mxu0 %v8280_v40  ;;  %v8295_v43 = vld [vmem:[%s9553_s7 + $0x320] sm:$0xff]   ;;  %v8298_v40 = vld [vmem:[%s9553_s7 + $0x3d8] sm:$0xff]   ;;  %v8301_v41 = vld [vmem:[%s9553_s7 + $0x350] sm:$0xff]  }
0x1b9e   : > { %v4975_v9 = vpop.f32.mrf.mxu1  ;;  %v5028_v52 = vpop.f32.mrf.mxu0  ;;  %7722 = vmatprep.subr.bf16.mxu1 %v8281_v2  ;;  %v5027_v20 = vadd.f32 %v5026_v16, %v10391_v0  ;;  %7750 = vmatprep.subr.bf16.mxu0 %v8282_v11  ;;  %v5181_v28 = vmax.f32 %v5025_v48, 0.0  ;;  %v8296_v30 = vld [vmem:[%s9553_s7 + $0x3a0] sm:$0xff]   ;;  %v8299_v2 = vld [vmem:[%s9553_s7 + $0x318] sm:$0xff]   ;;  %v8302_v35 = vld [vmem:[%s9553_s7 + $0x3d0] sm:$0xff]   ;;  %v10453_v11 = vrot.slane %v10379_v15, %v4017_v8 }
0x1b9f   : > { %v4976_v60 = vadd.f32 %v4975_v9, %v10396_v3  ;;  %v5029_v54 = vadd.f32 %v5028_v52, %v10401_v38  ;;  %6494 = vmatprep.mubr.bf16.mxu1 %v5212_v12  ;;  %6543 = vmatprep.mubr.bf16.mxu0 %v5214_v14  ;;  %v5180_v36 = vmax.f32 %v4974_v61, 0.0  ;;  %v8288_v3 = vld [vmem:[%s9553_s7 + $0x3b0] sm:$0xff]   ;;  %v8300_v26 = vld [vmem:[%s9553_s7 + $0x398] sm:$0xff]   ;;  %v8305_v16 = vld [vmem:[%s9553_s7 + $0x348] sm:$0xff]   ;;  %v10458_v12 = vrot.slane %v10379_v15, %v4025_v13 }
0x1ba0   : > { %v4977_v1 = vpop.f32.mrf.mxu1  ;;  %v5030_v19 = vpop.f32.mrf.mxu0  ;;  %6495 = vmatmul.mubr.bf16.vlgmr.msra.gmra.mxu1 %v5211_v39  ;;  %6544 = vmatmul.mubr.bf16.vlgmr.msra.gmra.mxu0 %v5213_v50  ;;  %v5182_v22 = vmax.f32 %v5027_v20, 0.0  ;;  %v8303_v10 = vld [vmem:[%s9553_s7 + $0x310] sm:$0xff]   ;;  %v8306_v14 = vld [vmem:[%s9553_s7 + $0x3c8] sm:$0xff]   ;;  %v4054_v39 = vrot.slane %v10379_v15, %v4021_v18  ;;  %v8310_v18 = vld [vmem:[%s9553_s7 + $0x3c0] sm:$0xff]  }
0x1ba1   : > { %v4978_v6 = vadd.f32 %v4977_v1, %v10386_v63  ;;  %v5031_v23 = vadd.f32 %v5030_v19, %v10391_v0  ;;  %7723 = vmatpush3.bf16.msra.mxu1 %v8283_v59  ;;  %v5195_v37 = vmax.f32 %v4976_v60, 0.0  ;;  %7751 = vmatpush3.bf16.msra.mxu0 %v8284_v53  ;;  %v5197_v27 = vmax.f32 %v5029_v54, 0.0  ;;  %v8290_v0 = vld [vmem:[%s9553_s7 + $0x3e8] sm:$0xff]   ;;  %v8304_v7 = vld [vmem:[%s9553_s7 + $0x390] sm:$0xff]   ;;  %v8309_v53 = vld [vmem:[%s9553_s7 + $0x340] sm:$0xff]  }
0x1ba2   : > { %7724 = vmatprep.subr.bf16.mxu1 %v8285_v49  ;;  %7752 = vmatprep.subr.bf16.mxu0 %v8286_v56  ;;  %v5179_v63 = vmax.f32 %v4972_v62, 0.0  ;;  %v4046_v59 = vrot.slane %v10379_v15, %v4013_v17  ;;  %v8307_v8 = vld [vmem:[%s9553_s7 + $0x308] sm:$0xff]   ;;  %v8311_v19 = vld [vmem:[%s9553_s7 + $0x300] sm:$0xff]  }
0x1ba3   : > { %v5196_v38 = vmax.f32 %v4978_v6, 0.0  ;;  %v5198_v42 = vmax.f32 %v5031_v23, 0.0  ;;  %v5229_v25 = vpack.c.bf16 %v5197_v27, %v5181_v28  ;;  %v8308_v13 = vld [vmem:[%s9553_s7 + $0x388] sm:$0xff]  }
0x1ba4   : > { %v5227_v32 = vpack.c.bf16 %v5195_v37, %v5179_v63 }
0x1ba5   : > { %v5228_v58 = vpack.c.bf16 %v5196_v38, %v5180_v36  ;;  %v5230_v29 = vpack.c.bf16 %v5198_v42, %v5182_v22  ;;  %7725 = vmatpush3.bf16.msra.mxu1 %v8287_v4  ;;  %7753 = vmatpush3.bf16.msra.mxu0 %v8288_v3  ;;  %v8312_v36 = vld [vmem:[%s9553_s7 + $0x380] sm:$0xff]  }
0x1ba6   : > { %7726 = vmatprep.subr.bf16.mxu1 %v8289_v55  ;;  %7754 = vmatprep.subr.bf16.mxu0 %v8290_v0 }
0x1ba7   : > { %6502 = vmatprep.mubr.bf16.mxu1 %v5228_v58  ;;  %6551 = vmatprep.mubr.bf16.mxu0 %v5230_v29 }
0x1ba8   : > { %6503 = vmatmul.mubr.bf16.gmra.mxu1 %v5227_v32  ;;  %6552 = vmatmul.mubr.bf16.gmra.mxu0 %v5229_v25 }
0x1ba9   : > { %7727 = vmatpush3.bf16.msra.mxu1 %v8291_v45  ;;  %7755 = vmatpush3.bf16.msra.mxu0 %v8292_v21 }
0x1baa   : > { %7728 = vmatprep.subr.bf16.mxu1 %v8293_v24  ;;  %7756 = vmatprep.subr.bf16.mxu0 %v8294_v57 }
0x1bad   : > { %7729 = vmatpush3.bf16.msra.mxu1 %v8295_v43  ;;  %7757 = vmatpush3.bf16.msra.mxu0 %v8296_v30 }
0x1bae   : > { %7730 = vmatprep.subr.bf16.mxu1 %v8297_v33  ;;  %7758 = vmatprep.subr.bf16.mxu0 %v8298_v40 }
0x1bb1   : > { %7731 = vmatpush3.bf16.msra.mxu1 %v8299_v2  ;;  %7759 = vmatpush3.bf16.msra.mxu0 %v8300_v26 }
0x1bb2   : > { %v5067_v34 = vpop.f32.mrf.mxu1  ;;  %v5120_v5 = vpop.f32.mrf.mxu0  ;;  %7732 = vmatprep.subr.bf16.mxu1 %v8301_v41  ;;  %7760 = vmatprep.subr.bf16.mxu0 %v8302_v35 }
0x1bb3   : > { %v5068_v15 = vadd.f32 %v5067_v34, %v4046_v59  ;;  %v5121_v60 = vadd.f32 %v5120_v5, %v4054_v39 }
0x1bb4   : > { %v5069_v50 = vpop.f32.mrf.mxu1  ;;  %v5122_v61 = vpop.f32.mrf.mxu0 }
0x1bb5   : > { %7733 = vmatpush3.bf16.msra.mxu1 %v8303_v10  ;;  %7761 = vmatpush3.bf16.msra.mxu0 %v8304_v7  ;;  %v5070_v49 = vadd.f32 %v5069_v50, %v10453_v11  ;;  %v5123_v17 = vadd.f32 %v5122_v61, %v10458_v12  ;;  %v5151_v27 = vmax.f32 %v5068_v15, 0.0  ;;  %v5153_v38 = vmax.f32 %v5121_v60, 0.0 }
0x1bb6   : > { %v5071_v9 = vpop.f32.mrf.mxu1  ;;  %v5124_v52 = vpop.f32.mrf.mxu0  ;;  %7734 = vmatprep.subr.bf16.mxu1 %v8305_v16  ;;  %7762 = vmatprep.subr.bf16.mxu0 %v8306_v14 }
0x1bb7   : > { %v5072_v20 = vadd.f32 %v5071_v9, %v4046_v59  ;;  %v5125_v47 = vadd.f32 %v5124_v52, %v4054_v39  ;;  %v5152_v37 = vmax.f32 %v5070_v49, 0.0  ;;  %v5154_v3 = vmax.f32 %v5123_v17, 0.0 }
0x1bb8   : > { %v5073_v54 = vpop.f32.mrf.mxu1  ;;  %v5126_v56 = vpop.f32.mrf.mxu0 }
0x1bb9   : > { %v5074_v62 = vadd.f32 %v5073_v54, %v10453_v11  ;;  %v5127_v1 = vadd.f32 %v5126_v56, %v10458_v12  ;;  %7735 = vmatpush3.bf16.msra.mxu1 %v8307_v8  ;;  %v5167_v48 = vmax.f32 %v5072_v20, 0.0  ;;  %v5169_v6 = vmax.f32 %v5125_v47, 0.0  ;;  %7763 = vmatpush3.bf16.msra.mxu0 %v8308_v13 }
0x1bba   : > { %v5077_v23 = vpop.f32.mrf.mxu1  ;;  %v5130_v4 = vpop.f32.mrf.mxu0  ;;  %7736 = vmatprep.subr.bf16.mxu1 %v8309_v53  ;;  %7764 = vmatprep.subr.bf16.mxu0 %v8310_v18 }
0x1bbb   : > { %v5168_v55 = vmax.f32 %v5074_v62, 0.0  ;;  %v5170_v22 = vmax.f32 %v5127_v1, 0.0  ;;  %v5215_v58 = vpack.c.bf16 %v5167_v48, %v5151_v27  ;;  %v5217_v29 = vpack.c.bf16 %v5169_v6, %v5153_v38 }
0x1bbc   : > { %v5079_v42 = vpop.f32.mrf.mxu1  ;;  %v5132_v63 = vpop.f32.mrf.mxu0  ;;  %v5078_v43 = vadd.f32 %v5077_v23, %v4046_v59  ;;  %v5131_v40 = vadd.f32 %v5130_v4, %v4054_v39 }
0x1bbd   : > { %v5216_v0 = vpack.c.bf16 %v5168_v55, %v5152_v37  ;;  %v5218_v28 = vpack.c.bf16 %v5170_v22, %v5154_v3  ;;  %7737 = vmatpush3.bf16.msra.mxu1 %v8311_v19  ;;  %v5080_v45 = vadd.f32 %v5079_v42, %v10453_v11  ;;  %7765 = vmatpush3.bf16.msra.mxu0 %v8312_v36 }
0x1bbe   : > { %v5081_v32 = vpop.f32.mrf.mxu1  ;;  %v5134_v21 = vpop.f32.mrf.mxu0  ;;  %v5133_v24 = vadd.f32 %v5132_v63, %v10458_v12  ;;  %v5183_v16 = vmax.f32 %v5078_v43, 0.0  ;;  %v5185_v14 = vmax.f32 %v5131_v40, 0.0 }
0x1bbf   : > { %v5082_v25 = vadd.f32 %v5081_v32, %v4046_v59  ;;  %v5135_v57 = vadd.f32 %v5134_v21, %v4054_v39  ;;  %6592 = vmatprep.mubr.bf16.mxu1 %v5216_v0  ;;  %6641 = vmatprep.mubr.bf16.mxu0 %v5218_v28  ;;  %v5184_v41 = vmax.f32 %v5080_v45, 0.0 }
0x1bc0   : > { %v5083_v30 = vpop.f32.mrf.mxu1  ;;  %v5136_v33 = vpop.f32.mrf.mxu0  ;;  %6593 = vmatmul.mubr.bf16.vlgmr.msra.gmra.mxu1 %v5215_v58  ;;  %6642 = vmatmul.mubr.bf16.vlgmr.msra.gmra.mxu0 %v5217_v29  ;;  %v5186_v10 = vmax.f32 %v5133_v24, 0.0 }
0x1bc1   : > { %v5084_v2 = vadd.f32 %v5083_v30, %v10453_v11  ;;  %v5137_v26 = vadd.f32 %v5136_v33, %v10458_v12  ;;  %v5199_v35 = vmax.f32 %v5082_v25, 0.0  ;;  %v5201_v34 = vmax.f32 %v5135_v57, 0.0  ;;  %v7313_v57 = vld [vmem:[%s872_s2] ss:$0 sm:$0xff] }
0x1bc3   : > { %v5200_v5 = vmax.f32 %v5084_v2, 0.0  ;;  %v5202_v7 = vmax.f32 %v5137_v26, 0.0  ;;  %v5231_v59 = vpack.c.bf16 %v5199_v35, %v5183_v16  ;;  %v5233_v8 = vpack.c.bf16 %v5201_v34, %v5185_v14 }
0x1bc5   : > { %v5232_v50 = vpack.c.bf16 %v5200_v5, %v5184_v41  ;;  %v5234_v61 = vpack.c.bf16 %v5202_v7, %v5186_v10 }
0x1bc7   : > { %6600 = vmatprep.mubr.bf16.mxu1 %v5232_v50  ;;  %6649 = vmatprep.mubr.bf16.mxu0 %v5234_v61 }
0x1bc8   : > { %6601 = vmatmul.mubr.bf16.gmra.mxu1 %v5231_v59  ;;  %6650 = vmatmul.mubr.bf16.gmra.mxu0 %v5233_v8 }
0x1c20   : > { %v7570_v11 = vpop.f32.mrf.mxu1  ;;  %v7598_v39 = vpop.f32.mrf.mxu0 }
0x1c22   : > { %v7571_v12 = vpop.f32.mrf.mxu1  ;;  %v7599_v9 = vpop.f32.mrf.mxu0 }
0x1c23   : > { %v7572_v24 = vadd.f32 %v7571_v12, %v7570_v11  ;;  %v7600_v2 = vadd.f32 %v7599_v9, %v7598_v39 }
0x1c24   : > { %v7573_v52 = vpop.f32.mrf.mxu1  ;;  %v7601_v13 = vpop.f32.mrf.mxu0 }
0x1c25   : > { %v6301_v33 = vadd.f32 %v7572_v24, %v7313_v57 }
0x1c26   : > { %v7574_v53 = vpop.f32.mrf.mxu1  ;;  %v7602_v49 = vpop.f32.mrf.mxu0 }
0x1c27   : > { %v7575_v43 = vadd.f32 %v7574_v53, %v7573_v52  ;;  %v6350_v10 = vadd.f32 %v7600_v2, %v6301_v33  ;;  %v7603_v7 = vadd.f32 %v7602_v49, %v7601_v13 }
0x1c28   : > { %v7576_v17 = vpop.f32.mrf.mxu1  ;;  %v7604_v20 = vpop.f32.mrf.mxu0 }
0x1c29   : > { %v6304_v41 = vadd.f32 %v7575_v43, %v7313_v57 }
0x1c2a   : > { %v7577_v47 = vpop.f32.mrf.mxu1  ;;  %v7605_v18 = vpop.f32.mrf.mxu0 }
0x1c2b   : > { %v7578_v34 = vadd.f32 %v7577_v47, %v7576_v17  ;;  %v6353_v50 = vadd.f32 %v7603_v7, %v6304_v41  ;;  %v7606_v24 = vadd.f32 %v7605_v18, %v7604_v20 }
0x1c2c   : > { %v7579_v15 = vpop.f32.mrf.mxu1  ;;  %v7607_v60 = vpop.f32.mrf.mxu0 }
0x1c2d   : > { %v6309_v8 = vadd.f32 %v7578_v34, %v7313_v57 }
0x1c2e   : > { %v7580_v54 = vpop.f32.mrf.mxu1  ;;  %v7608_v56 = vpop.f32.mrf.mxu0 }
0x1c2f   : > { %v7581_v61 = vadd.f32 %v7580_v54, %v7579_v15  ;;  %v6358_v17 = vadd.f32 %v7606_v24, %v6309_v8  ;;  %v7609_v49 = vadd.f32 %v7608_v56, %v7607_v60 }
0x1c31   : > { %v6312_v9 = vadd.f32 %v7581_v61, %v7313_v57 }
0x1c40   : > { %v7626_v62 = vpop.f32.mrf.mxu1  ;;  %v7654_v1 = vpop.f32.mrf.mxu0 }
0x1c42   : > { %v7627_v19 = vpop.f32.mrf.mxu1  ;;  %v7655_v48 = vpop.f32.mrf.mxu0 }
0x1c43   : > { %v7628_v26 = vadd.f32 %v7627_v19, %v7626_v62  ;;  %v7656_v11 = vadd.f32 %v7655_v48, %v7654_v1  ;;  %v6361_v48 = vadd.f32 %v7609_v49, %v6312_v9 }
0x1c44   : > { %v7629_v6 = vpop.f32.mrf.mxu1  ;;  %v7657_v23 = vpop.f32.mrf.mxu0 }
0x1c45   : > { %v6399_v14 = vadd.f32 %v7628_v26, %v6350_v10 }
0x1c46   : > { %v7630_v4 = vpop.f32.mrf.mxu1  ;;  %v7658_v36 = vpop.f32.mrf.mxu0 }
0x1c47   : > { %v7631_v16 = vadd.f32 %v7630_v4, %v7629_v6  ;;  %v6448_v46 = vadd.f32 %v7656_v11, %v6399_v14  ;;  %v7659_v62 = vadd.f32 %v7658_v36, %v7657_v23 }
0x1c48   : > { %v7632_v37 = vpop.f32.mrf.mxu1  ;;  %v7660_v3 = vpop.f32.mrf.mxu0 }
0x1c49   : > { %v6402_v53 = vadd.f32 %v7631_v16, %v6353_v50 }
0x1c4a   : > { %v7633_v55 = vpop.f32.mrf.mxu1  ;;  %v7661_v22 = vpop.f32.mrf.mxu0 }
0x1c4b   : > { %v7634_v39 = vadd.f32 %v7633_v55, %v7632_v37  ;;  %v6451_v6 = vadd.f32 %v7659_v62, %v6402_v53  ;;  %v7662_v20 = vadd.f32 %v7661_v22, %v7660_v3 }
0x1c4c   : > { %v7635_v27 = vpop.f32.mrf.mxu1  ;;  %v10481_v38 = vpop.f32.mrf.mxu0 }
0x1c4d   : > { %v6407_v54 = vadd.f32 %v7634_v39, %v6358_v17  ;;  %v10603_v17 = vld [vmem:[#allocation33_spill] sm:$0xff] }
0x1c4e   : > { %v7636_v42 = vpop.f32.mrf.mxu1  ;;  %v10483_v63 = vpop.f32.mrf.mxu0 }
0x1c4f   : > { %v7637_v4 = vadd.f32 %v7636_v42, %v7635_v27  ;;  %v7665_v27 = vadd.f32 %v10483_v63, %v10481_v38 }
0x1c51   : > { %v6410_v36 = vadd.f32 %v7637_v4, %v6361_v48 }
0x1c60   : > { %v7682_v0 = vpop.f32.mrf.mxu1  ;;  %v7710_v28 = vpop.f32.mrf.mxu0 }
0x1c62   : > { %v7683_v58 = vpop.f32.mrf.mxu1  ;;  %v7711_v29 = vpop.f32.mrf.mxu0 }
0x1c63   : > { %v7684_v12 = vadd.f32 %v7683_v58, %v7682_v0  ;;  %v7712_v33 = vadd.f32 %v7711_v29, %v7710_v28 }
0x1c64   : > { %v7685_v45 = vpop.f32.mrf.mxu1  ;;  %v7713_v32 = vpop.f32.mrf.mxu0 }
0x1c65   : > { %v6497_v47 = vadd.f32 %v7684_v12, %v6448_v46  ;;  %v6456_v46 = vadd.f32 %v7662_v20, %v6407_v54 }
0x1c66   : > { %v7686_v21 = vpop.f32.mrf.mxu1  ;;  %v7714_v25 = vpop.f32.mrf.mxu0 }
0x1c67   : > { %v7687_v19 = vadd.f32 %v7686_v21, %v7685_v45  ;;  %v6546_v18 = vadd.f32 %v7712_v33, %v6497_v47  ;;  %v7715_v45 = vadd.f32 %v7714_v25, %v7713_v32 }
0x1c68   : > { %v7688_v30 = vpop.f32.mrf.mxu1  ;;  %v7716_v40 = vpop.f32.mrf.mxu0 }
0x1c69   : > { %v6500_v0 = vadd.f32 %v7687_v19, %v6451_v6 }
0x1c6a   : > { %v7689_v35 = vpop.f32.mrf.mxu1  ;;  %v7717_v5 = vpop.f32.mrf.mxu0 }
0x1c6b   : > { %v7690_v37 = vadd.f32 %v7689_v35, %v7688_v30  ;;  %v6549_v42 = vadd.f32 %v7715_v45, %v6500_v0  ;;  %v6459_v30 = vadd.f32 %v7665_v27, %v6410_v36  ;;  %v7718_v35 = vadd.f32 %v7717_v5, %v7716_v40 }
0x1c6c   : > { %v7691_v59 = vpop.f32.mrf.mxu1  ;;  %v7719_v52 = vpop.f32.mrf.mxu0 }
0x1c6d   : > { %v6505_v29 = vadd.f32 %v7690_v37, %v6456_v46 }
0x1c6e   : > { %v7692_v43 = vpop.f32.mrf.mxu1  ;;  %v7720_v13 = vpop.f32.mrf.mxu0 }
0x1c6f   : > { %v7693_v2 = vadd.f32 %v7692_v43, %v7691_v59  ;;  %v6554_v16 = vadd.f32 %v7718_v35, %v6505_v29  ;;  %v7721_v59 = vadd.f32 %v7720_v13, %v7719_v52  ;;  %v7442_v29 = vld [vmem:[%s880_s30] ss:$0 sm:$0xff] }
0x1c71   : > { %v6508_v14 = vadd.f32 %v7693_v2, %v6459_v30 }
0x1c73   : > { %v6557_v5 = vadd.f32 %v7721_v59, %v6508_v14 }
0x1c80   : > { %v7738_v15 = vpop.f32.mrf.mxu1  ;;  %v7766_v1 = vpop.f32.mrf.mxu0 }
0x1c82   : > { %v7739_v58 = vpop.f32.mrf.mxu1  ;;  %v7767_v23 = vpop.f32.mrf.mxu0 }
0x1c83   : > { %v7740_v55 = vadd.f32 %v7739_v58, %v7738_v15  ;;  %v7768_v60 = vadd.f32 %v7767_v23, %v7766_v1 }
0x1c84   : > { %v7741_v21 = vpop.f32.mrf.mxu1  ;;  %v7769_v56 = vpop.f32.mrf.mxu0 }
0x1c85   : > { %v6595_v57 = vadd.f32 %v7740_v55, %v6546_v18 }
0x1c86   : > { %v7742_v28 = vpop.f32.mrf.mxu1  ;;  %v7770_v22 = vpop.f32.mrf.mxu0 }
0x1c87   : > { %v6644_v26 = vadd.f32 %v7768_v60, %v6595_v57  ;;  %v7743_v3 = vadd.f32 %v7742_v28, %v7741_v21  ;;  %v7771_v32 = vadd.f32 %v7770_v22, %v7769_v56 }
0x1c88   : > { %v7744_v41 = vpop.f32.mrf.mxu1  ;;  %v7772_v25 = vpop.f32.mrf.mxu0 }
0x1c89   : > { %v6598_v10 = vadd.f32 %v7743_v3, %v6549_v42  ;;  %v6658_v34 = vadd.f32 %v6644_v26, %v10101_v44  ;;  %v7443_v26 = vld [vmem:[%s888_s4] ss:$0 sm:$0xff] }
0x1c8a   : > { %v7745_v7 = vpop.f32.mrf.mxu1  ;;  %v7773_v63 = vpop.f32.mrf.mxu0 }
0x1c8b   : > { %v6647_v50 = vadd.f32 %v7771_v32, %v6598_v10  ;;  %v7746_v38 = vadd.f32 %v7745_v7, %v7744_v41  ;;  %6664 = vadd.xlane.f32.xlu0 %v6658_v34  ;;  %v7774_v11 = vadd.f32 %v7773_v63, %v7772_v25 }
0x1c8c   : > { %v7747_v61 = vpop.f32.mrf.mxu1  ;;  %v7775_v12 = vpop.f32.mrf.mxu0 }
0x1c8d   : > { %v6603_v8 = vadd.f32 %v7746_v38, %v6554_v16  ;;  %v6659_v53 = vadd.f32 %v6647_v50, %v10103_v31 }
0x1c8e   : > { %v7748_v40 = vpop.f32.mrf.mxu1  ;;  %v7776_v9 = vpop.f32.mrf.mxu0 }
0x1c8f   : > { %v6652_v24 = vadd.f32 %v7774_v11, %v6603_v8  ;;  %v7749_v39 = vadd.f32 %v7748_v40, %v7747_v61  ;;  %6666 = vadd.xlane.f32.xlu1 %v6659_v53  ;;  %v7777_v62 = vadd.f32 %v7776_v9, %v7775_v12 }
0x1c91   : > { %v6606_v44 = vadd.f32 %v7749_v39, %v6557_v5  ;;  %v6660_v19 = vadd.f32 %v6652_v24, %v10119_v51 }
0x1c93   : > { %v6655_v43 = vadd.f32 %v7777_v62, %v6606_v44  ;;  %6668 = vadd.xlane.f32.xlu0 %v6660_v19 }
0x1c95   : > { %v6661_v47 = vadd.f32 %v6655_v43, %v10603_v17 }
0x1c97   : > { %6670 = vadd.xlane.f32.xlu1 %v6661_v47 }
0x1d14   : > { %v6665_v52 = vpop.xlane.xlu0 %6664 }
0x1d15   : > { %v6672_v13 = vmul.f32 0.0078125, %v6665_v52 }
0x1d17   : > { %v6676_v49 = vsub.f32 %v6658_v34, %v6672_v13 }
0x1d18   : > { %v6667_v6 = vpop.xlane.xlu1 %6666 }
0x1d19   : > { %v6673_v31 = vmul.f32 0.0078125, %v6667_v6  ;;  %v6680_v4 = vmul.f32 %v6676_v49, %v6676_v49 }
0x1d1b   : > { %v6677_v15 = vsub.f32 %v6659_v53, %v6673_v31  ;;  %6684 = vadd.xlane.f32.xlu0 %v6680_v4 }
0x1d1c   : > { %v6669_v54 = vpop.xlane.xlu0 %6668 }
0x1d1d   : > { %v6674_v33 = vmul.f32 0.0078125, %v6669_v54  ;;  %v6681_v1 = vmul.f32 %v6677_v15, %v6677_v15 }
0x1d1f   : > { %v6678_v48 = vsub.f32 %v6660_v19, %v6674_v33  ;;  %6686 = vadd.xlane.f32.xlu1 %v6681_v1 }
0x1d20   : > { %v6671_v0 = vpop.xlane.xlu1 %6670 }
0x1d21   : > { %v6675_v51 = vmul.f32 0.0078125, %v6671_v0  ;;  %v6682_v58 = vmul.f32 %v6678_v48, %v6678_v48 }
0x1d23   : > { %v6679_v20 = vsub.f32 %v6661_v47, %v6675_v51  ;;  %6688 = vadd.xlane.f32.xlu0 %v6682_v58 }
0x1d25   : > { %v6683_v18 = vmul.f32 %v6679_v20, %v6679_v20 }
0x1d27   : > { %6690 = vadd.xlane.f32.xlu1 %v6683_v18 }
0x1da4   : > { %v6685_v37 = vpop.xlane.xlu0 %6684 }
0x1da5   : > { %v6692_v55 = vmul.f32 0.0078125, %v6685_v37 }
0x1da7   : > { %v6696_v23 = vadd.f32 1e-05, %v6692_v55 }
0x1da8   : > { %v6687_v36 = vpop.xlane.xlu1 %6686 }
0x1da9   : > { %8449 = vrsqrt.f32 %v6696_v23  ;;  %v6693_v45 = vmul.f32 0.0078125, %v6687_v36 }
0x1dab   : > { %v6697_v21 = vadd.f32 1e-05, %v6693_v45 }
0x1dac   : > { %v6689_v46 = vpop.xlane.xlu0 %6688 }
0x1dad   : > { %8451 = vrsqrt.f32 %v6697_v21  ;;  %v6694_v57 = vmul.f32 0.0078125, %v6689_v46 }
0x1daf   : > { %v6698_v60 = vadd.f32 1e-05, %v6694_v57 }
0x1db0   : > { %v6691_v56 = vpop.xlane.xlu1 %6690 }
0x1db1   : > { %8453 = vrsqrt.f32 %v6698_v60  ;;  %v6695_v27 = vmul.f32 0.0078125, %v6691_v56 }
0x1db3   : > { %v6699_v42 = vadd.f32 1e-05, %v6695_v27 }
0x1db5   : > { %8455 = vrsqrt.f32 %v6699_v42 }
0x1db6   : > { %v8450_v28 = vpop.eup %8449 }
0x1db7   : > { %v6704_v2 = vmul.f32 %v8450_v28, %v6676_v49 }
0x1db9   : > { %v6714_v3 = vmul.f32 %v7442_v29, %v6704_v2 }
0x1dba   : > { %v8452_v22 = vpop.eup %8451 }
0x1dbb   : > { %v6724_v30 = vadd.f32 %v7443_v26, %v6714_v3  ;;  %v6705_v41 = vmul.f32 %v8452_v22, %v6677_v15 }
0x1dbd   : > { %6728 = vst [vmem:[#allocation2 + $0x10] sm:$0xff] %v6724_v30  ;;  %v6715_v35 = vmul.f32 %v7442_v29, %v6705_v41 }
0x1dbe   : > { %v8454_v10 = vpop.eup %8453 }
0x1dbf   : > { %v6725_v32 = vadd.f32 %v7443_v26, %v6715_v35  ;;  %v6706_v25 = vmul.f32 %v8454_v10, %v6678_v48 }
0x1dc1   : > { %6729 = vst [vmem:[#allocation2] sm:$0xff] %v6725_v32  ;;  %v6716_v34 = vmul.f32 %v7442_v29, %v6706_v25 }
0x1dc2   : > { %v8456_v7 = vpop.eup %8455 }
0x1dc3   : > { %v6726_v16 = vadd.f32 %v7443_v26, %v6716_v34  ;;  %v6707_v14 = vmul.f32 %v8456_v7, %v6679_v20 }
0x1dc5   : > { %6730 = vst [vmem:[#allocation2 + $0x18] sm:$0xff] %v6726_v16  ;;  %v6717_v50 = vmul.f32 %v7442_v29, %v6707_v14  ;;  %6735 = sbr.rel (%p7444_p1) target bundleno = 7628 (0x1dcc), region = 156 }
0x1dc7   : > { %v6727_v38 = vadd.f32 %v7443_v26, %v6717_v50 }
0x1dc9   : > { %6731 = vst [vmem:[#allocation2 + $0x8] sm:$0xff] %v6727_v38 }
0x1dca   : > { %6736 = vst [vmem:[#allocation22] sm:$0xff] %v6724_v30  ;;  %6737 = vst [vmem:[#allocation22 + $0x8] sm:$0xff] %v6725_v32 }
0x1dcb   : > { %6738 = vst [vmem:[#allocation22 + $0x10] sm:$0xff] %v6726_v16  ;;  %6739 = vst [vmem:[#allocation22 + $0x18] sm:$0xff] %v6727_v38 }
0x1dcc PF: > { %s10605_s23 = sld [smem:[#allocation29_spill]]  ;;  %s8982_s22 = smov [#allocation22]  }
0x1dcd   : > { %s6746_s20 = sshll.u32 %s8982_s22, 4  ;;  %s6747_s20 = int_to_ptr.vmem [resolvable:$true] %s6746_s20 }
0x1dce   : > { %s8877_s25 = scalar_lea.vmem %s6747_s20, 512  ;;  %p8884_p8 = scmp.lt.s32.totalorder %s6747_s20, %s6747_s20 }
0x1dcf   : > { %p8878_p2 = scmp.ne.s32.totalorder %s6747_s20, %s8877_s25  ;;  %p8885_p9 = scmp.lt.s32.totalorder %s8877_s25, %s8877_s25 }
0x1dd1   : > { %p8886_p12 = por %p8885_p9, %p8884_p8 }
0x1dd2   : > { %p8089_p3 = scmp.eq.s32.totalorder %s10605_s23, 5 }
0x1dd4   : > { %p8879_p6 = pnand %p8878_p2, %p8089_p3 }
0x1dd6   : > { %p8880_p5 = pneg %p8879_p6 }
0x1dd8   : > { %p8887_p13 = pnand %p8886_p12, %p8880_p5 }
0x1dda   : > { %8890 = shalt.err (!%p8887_p13)
}
0x1ddb   : > { %s8983_s16 = smov 128   ;;  %s8984_s19 = smov 8  }
0x1ddc   : > { %s10606_s28 = sld [smem:[#allocation42_spill]] }
0x1de2   : > { %8075 = dma.vmem_to_hbm [thread:$0]  (%p8089_p3), %s6747_s20, 512, %s10606_s28, [#allocation5], %s8983_s16, %s8983_s16, %s8984_s19  }
0x1de3   : > { %8930 = dma.done.wait (%p8089_p3), [#allocation5], 512  }
0x1de4   : > { %8932 = vsyncadd (%p8089_p3), [#allocation5], 4294966784 }
0x1de5 PF: > { %s10607_s24 = sld [smem:[#allocation30_spill]] }
0x1de6   : > { %s10608_s21 = sld [smem:[#allocation27_spill]] }
0x1de7   : > { %s10609_s22 = sld [smem:[#allocation28_spill]] }
0x1de8   : > { %s10610_s23 = sld [smem:[#allocation31_spill]] }
0x1deb   : > { %p26_p7 = scmp.ge.s32.totalorder %s10607_s24, 8  }
0x1ded   :  { %28 = sbr.rel (!%p26_p7) target bundleno = 14 (0xe), region = 279 }
0x1df2   :  { %6762 = vsyncpa [#allocation4], 1 }
0x1df3   :  { %6764 = vsyncpa [#allocation4 + $0x1], 1 }
0x1df4   :  { %6765 = vsyncpa [#allocation7], 1 }
0x1df5   :  { %6766 = vsyncpa [#allocation5], 1 }
0x1df6   :  { %6768 = vsyncpa [#allocation5 + $0x1], 1 }

</bundles_post_ra>
